<compile_context>
chip_gen: v7x
topology: tpu7x:2x2x1
jax: 0.10.0
libtpu: 0.0.40
codegen_flags: <defaults>
</compile_context>

<pallas_src>
import functools

import numpy as np

import jax
import jax.numpy as jnp
from jax import lax
from jax.experimental import pallas as pl
from jax.experimental.pallas import tpu as pltpu

LANE = 128


def _round_up(v, m):
    return ((v + m - 1) // m) * m


# ----------------------------- kernels -----------------------------

def _dignn_node_kernel(num_layers, max_iter, inv_one_plus_mu,
                       x_ref, a_ref, mask_ref, pool_ref,
                       w1_ref, b1_ref, w2_ref, b2_ref, w3_ref, b3_ref,
                       wimp_ref, bimp_ref, wfc_ref, bfc_ref,
                       out_ref):
    f32, bf16 = jnp.float32, jnp.bfloat16
    x = x_ref[0]          # (n_tile, F_pad)   bf16
    a = a_ref[0]          # (n_tile, n_tile)  bf16, block-diagonal over graphs
    mask = mask_ref[0]    # (n_tile, 1)       f32, 1 for real node rows

    # --- MLP(in -> 64 -> H -> H); dropout(eval)=id; BN(eval) folded into W3/b3 ---
    h = jnp.maximum(
        jnp.dot(x, w1_ref[...], preferred_element_type=f32) + b1_ref[...], 0.0)
    h = jnp.maximum(
        jnp.dot(h.astype(bf16), w2_ref[...], preferred_element_type=f32) + b2_ref[...], 0.0)
    h = jnp.dot(h.astype(bf16), w3_ref[...], preferred_element_type=f32) + b3_ref[...]

    # --- DEQ fixed point:  z_{k+1} = (mu*A_hat@(zW+b) + h)/(1+mu)
    #                              == A_hat @ (z @ W_eff) + h_eff
    # W_eff/b_eff carry the mu/(1+mu) fold (done in prepare_params); rowsum of
    # the RW-normalized A equals `mask`, so the bias term is hoisted out of the
    # loop with no in-kernel reduce.
    h_eff = h * inv_one_plus_mu + mask * bimp_ref[...]
    wimp = wimp_ref[...]

    def fp_body(_, z):
        # TODO(synk): bf16 iterate limits fixed-point accuracy to ~1e-3 rel;
        # keep this dot in f32 precision if a tighter solver tolerance matters.
        zt = jnp.dot(z.astype(bf16), wimp, preferred_element_type=f32)
        return jnp.dot(a, zt.astype(bf16), preferred_element_type=f32) + h_eff

    unroll = True if max_iter <= 16 else 4
    z = lax.fori_loop(0, max_iter, fp_body, jnp.zeros_like(h_eff), unroll=unroll)

    # --- node-level fcs: Linear + ReLU (+dropout=identity) ---
    for i in range(num_layers):
        z = jnp.maximum(
            jnp.dot(z.astype(bf16), wfc_ref[i], preferred_element_type=f32) + bfc_ref[i], 0.0)

    # --- global_add_pool: one-hot (g_tile, n_tile) @ (n_tile, H) per-graph sums
    # (padded node rows have all-zero pooling columns, so they never leak).
    out_ref[0] = jnp.dot(pool_ref[0], z.astype(bf16), preferred_element_type=f32)


def _graph_head_kernel(num_layers, g_ref, wg_ref, bg_ref, wout_ref, bout_ref, out_ref):
    f32, bf16 = jnp.float32, jnp.bfloat16
    g = g_ref[...]                                              # (G_pad, H_pad) f32
    for i in range(num_layers):
        g = jnp.maximum(
            jnp.dot(g.astype(bf16), wg_ref[i], preferred_element_type=f32) + bg_ref[i], 0.0)
    logits = jnp.dot(g.astype(bf16), wout_ref[...], preferred_element_type=f32) + bout_ref[...]
    # log_softmax; padded class columns carry a -1e9 bias so they contribute ~0.
    m = jnp.max(logits, axis=1, keepdims=True)
    s = logits - m
    lse = jnp.log(jnp.sum(jnp.exp(s), axis=1, keepdims=True))
    out_ref[...] = s - lse


# ----------------------------- wrapper -----------------------------

def _resident_spec(arr):
    nd = arr.ndim
    return pl.BlockSpec(arr.shape, lambda *_args, _nd=nd: (0,) * _nd)


def _vmem_limit(resident_bytes, step_bytes, scratch_bytes):
    try:
        cap = int(pltpu.get_tpu_info().vmem_capacity_bytes)
    except Exception:
        cap = 64 * 1024 * 1024        # conservative fallback (v7x per-TC VMEM)
    need = resident_bytes + 2 * step_bytes + scratch_bytes
    return int(min(int(0.85 * cap), max(16 * 1024 * 1024, int(1.25 * need))))


def dignn_forward(x_groups, a_groups, mask_groups, pool_groups, gather_idx, q,
                  *, mu, num_layers, max_iter, out_channels):
    """x_groups:[Ggrp,n_tile,F_pad] bf16, a_groups:[Ggrp,n_tile,n_tile] bf16,
    mask_groups:[Ggrp,n_tile,1] f32, pool_groups:[Ggrp,g_tile,n_tile] bf16,
    gather_idx:[G] int32 (group*g_tile+slot per graph), q: padded/folded params."""
    num_groups, n_tile, f_pad = x_groups.shape
    g_tile = pool_groups.shape[1]
    mid_p = q["w1"].shape[1]
    hid_p = q["w_imp"].shape[0]
    out_p = q["w_out"].shape[1]
    num_graphs = gather_idx.shape[0]
    inv = 1.0 / (1.0 + float(mu))

    # Size guard: whole-block-resident A (double-buffered bf16) must fit VMEM.
    if 2 * n_tile * n_tile * 2 > 20 * 1024 * 1024:
        # TODO(synk): stream A row-tiles from HBM (memory_space=pl.ANY +
        # pltpu.emit_pipeline inside fp_body) for n_tile >~ 2.2k.
        raise NotImplementedError("packed A tile too large for resident kernel")

    node_kernel = functools.partial(_dignn_node_kernel,
                                    int(num_layers), int(max_iter), inv)

    per_group_args = (x_groups, a_groups, mask_groups, pool_groups)
    weight_args = (q["w1"], q["b1"], q["w2"], q["b2"], q["w3"], q["b3"],
                   q["w_imp"], q["b_imp"], q["w_fc"], q["b_fc"])

    in_specs = [
        pl.BlockSpec((1, n_tile, f_pad), lambda g: (g, 0, 0)),     # packed x
        pl.BlockSpec((1, n_tile, n_tile), lambda g: (g, 0, 0)),    # block-diag A
        pl.BlockSpec((1, n_tile, 1), lambda g: (g, 0, 0)),         # node mask
        pl.BlockSpec((1, g_tile, n_tile), lambda g: (g, 0, 0)),    # pooling one-hot
    ] + [_resident_spec(a) for a in weight_args]
    # NOTE: constant-index weight specs only need a single VMEM copy; Mosaic
    # collapses the revisited block, so no explicit pl.Buffered(1) needed here.

    out_shape = jax.ShapeDtypeStruct((num_groups, g_tile, hid_p), jnp.float32)
    out_spec = pl.BlockSpec((1, g_tile, hid_p), lambda g: (g, 0, 0))

    def nbytes(a):
        return int(a.size) * a.dtype.itemsize

    step_bytes = (n_tile * f_pad * 2 + n_tile * n_tile * 2 + n_tile * 4
                  + g_tile * n_tile * 2 + g_tile * hid_p * 4)
    resident_bytes = sum(nbytes(a) for a in weight_args)
    scratch_bytes = 6 * n_tile * max(hid_p, mid_p) * 4
    vmem_limit = _vmem_limit(resident_bytes, step_bytes, scratch_bytes)

    flops = num_groups * (
        2 * n_tile * (f_pad * mid_p + mid_p * hid_p + hid_p * hid_p)          # MLP
        + max_iter * 2 * (n_tile * hid_p * hid_p + n_tile * n_tile * hid_p)   # fixed point
        + num_layers * 2 * n_tile * hid_p * hid_p                             # node fcs
        + 2 * g_tile * n_tile * hid_p)                                        # pooling
    cost = pl.CostEstimate(flops=int(flops), transcendentals=0,
                           bytes_accessed=int(num_groups * step_bytes + resident_bytes))

    pooled = pl.pallas_call(
        node_kernel,
        out_shape=out_shape,
        grid=(num_groups,),
        in_specs=in_specs,
        out_specs=out_spec,
        compiler_params=pltpu.CompilerParams(
            dimension_semantics=("parallel",),
            vmem_limit_bytes=vmem_limit),
        cost_estimate=cost,
    )(*per_group_args, *weight_args)

    # Gather pooled graph vectors into original graph order, pad G to 8 rows.
    pooled_flat = pooled.reshape(num_groups * g_tile, hid_p)
    g_vec = jnp.take(pooled_flat, gather_idx, axis=0)           # (G, H_pad) f32
    g_pad = _round_up(max(int(num_graphs), 8), 8)
    g_vec = jnp.pad(g_vec, ((0, g_pad - num_graphs), (0, 0)))

    # Graph-level head: one batched M=G matmul chain instead of per-graph M=1.
    head_kernel = functools.partial(_graph_head_kernel, int(num_layers))
    head_args = (g_vec, q["w_gfc"], q["b_gfc"], q["w_out"], q["b_out"])
    head_specs = [_resident_spec(a) for a in head_args]
    head_vmem = _vmem_limit(sum(nbytes(a) for a in head_args),
                            g_pad * out_p * 4, 4 * g_pad * hid_p * 4)

    logp = pl.pallas_call(
        head_kernel,
        out_shape=jax.ShapeDtypeStruct((g_pad, out_p), jnp.float32),
        grid=(1,),
        in_specs=head_specs,
        out_specs=pl.BlockSpec((g_pad, out_p), lambda g: (0, 0)),
        compiler_params=pltpu.CompilerParams(
            dimension_semantics=("arbitrary",),
            vmem_limit_bytes=head_vmem),
    )(*head_args)

    return logp[:num_graphs, :out_channels]


# ------------------------- parameter construction -------------------------

def _linear_init(key, fan_in, fan_out):
    kw, kb = jax.random.split(key)
    bound = 1.0 / jnp.sqrt(jnp.float32(fan_in))
    w = jax.random.uniform(kw, (fan_in, fan_out), jnp.float32, -bound, bound)
    b = jax.random.uniform(kb, (1, fan_out), jnp.float32, -bound, bound)
    return w, b


def init_params(key, in_c, hidden, out_c, num_layers):
    keys = jax.random.split(key, 8 + 2 * num_layers)
    p = {}
    # MLP(in -> 64 -> hidden -> hidden)
    p["w1"], p["b1"] = _linear_init(keys[0], in_c, 64)
    p["w2"], p["b2"] = _linear_init(keys[1], 64, hidden)
    p["w3"], p["b3"] = _linear_init(keys[2], hidden, hidden)
    # BatchNorm1d (eval, default running stats): gamma=1, beta=0, mean=0, var=1.
    # TODO(synk): for a trained model, fold the actual running stats here.
    eps = 1e-5
    p["bn_scale"] = jnp.full((1, hidden), 1.0 / jnp.sqrt(1.0 + eps), jnp.float32)
    p["bn_bias"] = jnp.zeros((1, hidden), jnp.float32)
    # ImplicitFunc_RW linear
    p["w_imp"], p["b_imp"] = _linear_init(keys[3], hidden, hidden)
    # node-level fcs
    wfc, bfc = [], []
    for i in range(num_layers):
        w, b = _linear_init(keys[4 + i], hidden, hidden)
        wfc.append(w)
        bfc.append(b)
    p["w_fc"] = jnp.stack(wfc)
    p["b_fc"] = jnp.stack(bfc)
    # graph-level fcs
    wg, bg = [], []
    for i in range(num_layers):
        w, b = _linear_init(keys[4 + num_layers + i], hidden, hidden)
        wg.append(w)
        bg.append(b)
    p["w_gfc"] = jnp.stack(wg)
    p["b_gfc"] = jnp.stack(bg)
    # final classifier
    p["w_out"], p["b_out"] = _linear_init(keys[4 + 2 * num_layers], hidden, out_c)
    return p


def prepare_params(p, mu):
    """Pad lane dims to 128, fold BN (eval) into MLP layer 3, fold mu/(1+mu)
    into the implicit-function weight/bias, cast weight matrices to bf16."""
    in_c, mid = p["w1"].shape
    hid = p["w3"].shape[1]
    out_c = p["w_out"].shape[1]
    in_p, mid_p, hid_p, out_p = (_round_up(d, LANE) for d in (in_c, mid, hid, out_c))
    c = float(mu) / (1.0 + float(mu))

    def pad_w(w, rp, cp):
        return jnp.pad(w, ((0, rp - w.shape[0]), (0, cp - w.shape[1])))

    def pad_b(b, cp, value=0.0):
        return jnp.pad(b, ((0, 0), (0, cp - b.shape[1])), constant_values=value)

    w3_eff = p["w3"] * p["bn_scale"]
    b3_eff = p["b3"] * p["bn_scale"] + p["bn_bias"]

    q = {}
    q["w1"] = pad_w(p["w1"], in_p, mid_p).astype(jnp.bfloat16)
    q["b1"] = pad_b(p["b1"], mid_p)
    q["w2"] = pad_w(p["w2"], mid_p, hid_p).astype(jnp.bfloat16)
    q["b2"] = pad_b(p["b2"], hid_p)
    q["w3"] = pad_w(w3_eff, hid_p, hid_p).astype(jnp.bfloat16)
    q["b3"] = pad_b(b3_eff, hid_p)
    q["w_imp"] = (c * pad_w(p["w_imp"], hid_p, hid_p)).astype(jnp.bfloat16)
    q["b_imp"] = c * pad_b(p["b_imp"], hid_p)
    q["w_fc"] = jnp.stack([pad_w(w, hid_p, hid_p) for w in p["w_fc"]]).astype(jnp.bfloat16)
    q["b_fc"] = jnp.stack([pad_b(b, hid_p) for b in p["b_fc"]])
    q["w_gfc"] = jnp.stack([pad_w(w, hid_p, hid_p) for w in p["w_gfc"]]).astype(jnp.bfloat16)
    q["b_gfc"] = jnp.stack([pad_b(b, hid_p) for b in p["b_gfc"]])
    q["w_out"] = pad_w(p["w_out"], hid_p, out_p).astype(jnp.bfloat16)
    q["b_out"] = pad_b(p["b_out"], out_p, value=-1e9)   # padded classes -> -inf-ish
    return q, in_p


# ------------------------- host-side graph packing -------------------------

def pack_batch(x_np, a_hat_np, batch_ids, num_graphs, n_tile=None):
    """Pack graphs into groups of concatenated node rows with block-diagonal A.
    Returns packed x/A/mask/pool arrays plus (group, slot) of every graph."""
    node_idx = [np.nonzero(batch_ids == g)[0] for g in range(num_graphs)]
    sizes = [len(ix) for ix in node_idx]
    if n_tile is None:
        n_tile = _round_up(max(LANE, max(sizes)), LANE)   # MXU-dense M and lane-dense A

    groups, cur, cur_n = [], [], 0
    for g in range(num_graphs):
        if cur and cur_n + sizes[g] > n_tile:
            groups.append(cur)
            cur, cur_n = [], 0
        cur.append(g)
        cur_n += sizes[g]
    if cur:
        groups.append(cur)

    g_tile = _round_up(max(len(gr) for gr in groups), 8)
    num_groups = len(groups)
    feat = x_np.shape[1]

    xg = np.zeros((num_groups, n_tile, feat), np.float32)
    ag = np.zeros((num_groups, n_tile, n_tile), np.float32)
    mg = np.zeros((num_groups, n_tile, 1), np.float32)
    pg = np.zeros((num_groups, g_tile, n_tile), np.float32)
    slot_of = np.zeros((num_graphs, 2), np.int64)

    for gi, gr in enumerate(groups):
        off = 0
        for li, g in enumerate(gr):
            ix = node_idx[g]
            n = len(ix)
            xg[gi, off:off + n, :] = x_np[ix]
            ag[gi, off:off + n, off:off + n] = a_hat_np[np.ix_(ix, ix)]
            mg[gi, off:off + n, 0] = 1.0
            pg[gi, li, off:off + n] = 1.0
            slot_of[g] = (gi, li)
            off += n
    return xg, ag, mg, pg, slot_of, n_tile, g_tile


# ----------------------------- demo / self test -----------------------------

if __name__ == "__main__":
    key = jax.random.PRNGKey(0)
    k_x, k_p = jax.random.split(key)

    # Small synthetic graph-classification batch: 4 graphs x 8 nodes, ring edges.
    num_graphs, nodes_per_graph = 4, 8
    N = num_graphs * nodes_per_graph
    in_channels, hidden_channels, out_channels = 8, 32, 4
    num_layers, mu, max_iter = 2, 0.5, 10

    x = jax.random.normal(k_x, (N, in_channels), jnp.float32)

    src, dst = [], []
    for gidx in range(num_graphs):
        base = gidx * nodes_per_graph
        for i in range(nodes_per_graph):
            j = (i + 1) % nodes_per_graph
            src += [base + i, base + j]
            dst += [base + j, base + i]
    edge_index = np.array([src, dst], dtype=np.int32)            # [2, E]
    edge_weight = np.ones((edge_index.shape[1],), np.float32)    # [E]
    batch_ids = np.repeat(np.arange(num_graphs), nodes_per_graph)

    # Host glue: dense adjacency + self loops, random-walk normalization.
    A = np.zeros((N, N), np.float32)
    np.add.at(A, (edge_index[0], edge_index[1]), edge_weight)
    A = A + np.eye(N, dtype=np.float32)
    A_hat = A / A.sum(axis=1, keepdims=True)

    params = init_params(k_p, in_channels, hidden_channels, out_channels, num_layers)
    q, in_p = prepare_params(params, mu)

    xg, ag, mg, pg, slot_of, n_tile, g_tile = pack_batch(
        np.asarray(x), A_hat, batch_ids, num_graphs)

    # Lane-pad features and cast DMA-heavy arrays to bf16 in the wrapper.
    xg = np.pad(xg, ((0, 0), (0, 0), (0, in_p - xg.shape[2])))
    x_groups = jnp.asarray(xg, jnp.bfloat16)
    a_groups = jnp.asarray(ag, jnp.bfloat16)
    mask_groups = jnp.asarray(mg, jnp.float32)
    pool_groups = jnp.asarray(pg, jnp.bfloat16)
    gather_idx = jnp.asarray(slot_of[:, 0] * g_tile + slot_of[:, 1], jnp.int32)

    out = dignn_forward(x_groups, a_groups, mask_groups, pool_groups, gather_idx, q,
                        mu=mu, num_layers=num_layers, max_iter=max_iter,
                        out_channels=out_channels)
    jax.block_until_ready(out)
    assert out.shape == (num_graphs, out_channels)
    assert bool(jnp.all(jnp.isfinite(out)))
    print("KERNEL_OK")
</pallas_src>

<mosaic_0001>
module attributes {stable_mosaic.version = 11 : i64} {
  func.func @_dignn_node_kernel(%arg0: i32, %arg1: memref<1x128x128xbf16, #tpu.memory_space<vmem>>, %arg2: memref<1x128x128xbf16, #tpu.memory_space<vmem>>, %arg3: memref<1x128x1xf32, #tpu.memory_space<vmem>>, %arg4: memref<1x8x128xbf16, #tpu.memory_space<vmem>>, %arg5: memref<128x128xbf16, #tpu.memory_space<vmem>>, %arg6: memref<1x128xf32, #tpu.memory_space<vmem>>, %arg7: memref<128x128xbf16, #tpu.memory_space<vmem>>, %arg8: memref<1x128xf32, #tpu.memory_space<vmem>>, %arg9: memref<128x128xbf16, #tpu.memory_space<vmem>>, %arg10: memref<1x128xf32, #tpu.memory_space<vmem>>, %arg11: memref<128x128xbf16, #tpu.memory_space<vmem>>, %arg12: memref<1x128xf32, #tpu.memory_space<vmem>>, %arg13: memref<2x128x128xbf16, #tpu.memory_space<vmem>>, %arg14: memref<2x1x128xf32, #tpu.memory_space<vmem>>, %arg15: memref<1x8x128xf32, #tpu.memory_space<vmem>>) attributes {dimension_semantics = [#tpu.dimension_semantics<parallel>], iteration_bounds = array<i64: 1>, scalar_prefetch = 0 : i64, scratch_operands = 0 : i64, tpu.core_type = #tpu.core_type<tc>, window_params = [{transform_indices = @transform_0, window_bounds = array<i64: 1, 128, 128>}, {transform_indices = @transform_1, window_bounds = array<i64: 1, 128, 128>}, {transform_indices = @transform_2, window_bounds = array<i64: 1, 128, 1>}, {transform_indices = @transform_3, window_bounds = array<i64: 1, 8, 128>}, {pipeline_mode = #tpu.pipeline_mode<synchronous>, transform_indices = @transform_4, window_bounds = array<i64: 128, 128>}, {pipeline_mode = #tpu.pipeline_mode<synchronous>, transform_indices = @transform_5, window_bounds = array<i64: 1, 128>}, {pipeline_mode = #tpu.pipeline_mode<synchronous>, transform_indices = @transform_6, window_bounds = array<i64: 128, 128>}, {pipeline_mode = #tpu.pipeline_mode<synchronous>, transform_indices = @transform_7, window_bounds = array<i64: 1, 128>}, {pipeline_mode = #tpu.pipeline_mode<synchronous>, transform_indices = @transform_8, window_bounds = array<i64: 128, 128>}, {pipeline_mode = #tpu.pipeline_mode<synchronous>, transform_indices = @transform_9, window_bounds = array<i64: 1, 128>}, {pipeline_mode = #tpu.pipeline_mode<synchronous>, transform_indices = @transform_10, window_bounds = array<i64: 128, 128>}, {pipeline_mode = #tpu.pipeline_mode<synchronous>, transform_indices = @transform_11, window_bounds = array<i64: 1, 128>}, {pipeline_mode = #tpu.pipeline_mode<synchronous>, transform_indices = @transform_12, window_bounds = array<i64: 2, 128, 128>}, {pipeline_mode = #tpu.pipeline_mode<synchronous>, transform_indices = @transform_13, window_bounds = array<i64: 2, 1, 128>}, {transform_indices = @transform_14, window_bounds = array<i64: 1, 8, 128>}]} {
    %c0 = arith.constant 0 : index
    %c0_0 = arith.constant 0 : index
    %c0_1 = arith.constant 0 : index
    %0 = vector.load %arg1[%c0, %c0_0, %c0_1] : memref<1x128x128xbf16, #tpu.memory_space<vmem>>, vector<1x128x128xbf16>
    %1 = vector.shape_cast %0 : vector<1x128x128xbf16> to vector<128x128xbf16>
    %c0_2 = arith.constant 0 : index
    %c0_3 = arith.constant 0 : index
    %c0_4 = arith.constant 0 : index
    %2 = vector.load %arg2[%c0_2, %c0_3, %c0_4] : memref<1x128x128xbf16, #tpu.memory_space<vmem>>, vector<1x128x128xbf16>
    %3 = vector.shape_cast %2 : vector<1x128x128xbf16> to vector<128x128xbf16>
    %c0_5 = arith.constant 0 : index
    %c0_6 = arith.constant 0 : index
    %c0_7 = arith.constant 0 : index
    %4 = vector.load %arg3[%c0_5, %c0_6, %c0_7] : memref<1x128x1xf32, #tpu.memory_space<vmem>>, vector<1x128x1xf32>
    %5 = vector.shape_cast %4 : vector<1x128x1xf32> to vector<128x1xf32>
    %c0_8 = arith.constant 0 : index
    %c0_9 = arith.constant 0 : index
    %6 = vector.load %arg5[%c0_8, %c0_9] : memref<128x128xbf16, #tpu.memory_space<vmem>>, vector<128x128xbf16>
    %cst = arith.constant dense<0.000000e+00> : vector<128x128xf32>
    %7 = tpu.matmul %1, %6, %cst {dimension_numbers = #tpu.dot_dimension_numbers<[1], [0], [0], [1], [0, 0, 1, 1], [], []>} : vector<128x128xbf16>, vector<128x128xbf16>, vector<128x128xf32> -> vector<128x128xf32>
    %c0_10 = arith.constant 0 : index
    %c0_11 = arith.constant 0 : index
    %8 = vector.load %arg6[%c0_10, %c0_11] : memref<1x128xf32, #tpu.memory_space<vmem>>, vector<1x128xf32>
    %9 = vector.broadcast %8 : vector<1x128xf32> to vector<128x128xf32>
    %10 = arith.addf %7, %9 : vector<128x128xf32>
    %cst_12 = arith.constant 0.000000e+00 : f32
    %11 = vector.broadcast %cst_12 : f32 to vector<128x128xf32>
    %12 = arith.maximumf %10, %11 : vector<128x128xf32>
    %13 = arith.truncf %12 : vector<128x128xf32> to vector<128x128xbf16>
    %c0_13 = arith.constant 0 : index
    %c0_14 = arith.constant 0 : index
    %14 = vector.load %arg7[%c0_13, %c0_14] : memref<128x128xbf16, #tpu.memory_space<vmem>>, vector<128x128xbf16>
    %cst_15 = arith.constant dense<0.000000e+00> : vector<128x128xf32>
    %15 = tpu.matmul %13, %14, %cst_15 {dimension_numbers = #tpu.dot_dimension_numbers<[1], [0], [0], [1], [0, 0, 1, 1], [], []>} : vector<128x128xbf16>, vector<128x128xbf16>, vector<128x128xf32> -> vector<128x128xf32>
    %c0_16 = arith.constant 0 : index
    %c0_17 = arith.constant 0 : index
    %16 = vector.load %arg8[%c0_16, %c0_17] : memref<1x128xf32, #tpu.memory_space<vmem>>, vector<1x128xf32>
    %17 = vector.broadcast %16 : vector<1x128xf32> to vector<128x128xf32>
    %18 = arith.addf %15, %17 : vector<128x128xf32>
    %cst_18 = arith.constant 0.000000e+00 : f32
    %19 = vector.broadcast %cst_18 : f32 to vector<128x128xf32>
    %20 = arith.maximumf %18, %19 : vector<128x128xf32>
    %21 = arith.truncf %20 : vector<128x128xf32> to vector<128x128xbf16>
    %c0_19 = arith.constant 0 : index
    %c0_20 = arith.constant 0 : index
    %22 = vector.load %arg9[%c0_19, %c0_20] : memref<128x128xbf16, #tpu.memory_space<vmem>>, vector<128x128xbf16>
    %cst_21 = arith.constant dense<0.000000e+00> : vector<128x128xf32>
    %23 = tpu.matmul %21, %22, %cst_21 {dimension_numbers = #tpu.dot_dimension_numbers<[1], [0], [0], [1], [0, 0, 1, 1], [], []>} : vector<128x128xbf16>, vector<128x128xbf16>, vector<128x128xf32> -> vector<128x128xf32>
    %c0_22 = arith.constant 0 : index
    %c0_23 = arith.constant 0 : index
    %24 = vector.load %arg10[%c0_22, %c0_23] : memref<1x128xf32, #tpu.memory_space<vmem>>, vector<1x128xf32>
    %25 = vector.broadcast %24 : vector<1x128xf32> to vector<128x128xf32>
    %26 = arith.addf %23, %25 : vector<128x128xf32>
    %cst_24 = arith.constant 0.666666686 : f32
    %27 = vector.broadcast %cst_24 : f32 to vector<128x128xf32>
    %28 = arith.mulf %26, %27 : vector<128x128xf32>
    %c0_25 = arith.constant 0 : index
    %c0_26 = arith.constant 0 : index
    %29 = vector.load %arg12[%c0_25, %c0_26] : memref<1x128xf32, #tpu.memory_space<vmem>>, vector<1x128xf32>
    %30 = vector.broadcast %5 : vector<128x1xf32> to vector<128x128xf32>
    %31 = vector.broadcast %29 : vector<1x128xf32> to vector<128x128xf32>
    %32 = arith.mulf %30, %31 : vector<128x128xf32>
    %33 = arith.addf %28, %32 : vector<128x128xf32>
    %c0_27 = arith.constant 0 : index
    %c0_28 = arith.constant 0 : index
    %34 = vector.load %arg11[%c0_27, %c0_28] : memref<128x128xbf16, #tpu.memory_space<vmem>>, vector<128x128xbf16>
    %cst_29 = arith.constant 0.000000e+00 : f32
    %35 = vector.broadcast %cst_29 : f32 to vector<128x128xf32>
    %c0_i32 = arith.constant 0 : i32
    %36 = arith.truncf %35 : vector<128x128xf32> to vector<128x128xbf16>
    %cst_30 = arith.constant dense<0.000000e+00> : vector<128x128xf32>
    %37 = tpu.matmul %36, %34, %cst_30 {dimension_numbers = #tpu.dot_dimension_numbers<[1], [0], [0], [1], [0, 0, 1, 1], [], []>} : vector<128x128xbf16>, vector<128x128xbf16>, vector<128x128xf32> -> vector<128x128xf32>
    %38 = arith.truncf %37 : vector<128x128xf32> to vector<128x128xbf16>
    %cst_31 = arith.constant dense<0.000000e+00> : vector<128x128xf32>
    %39 = tpu.matmul %3, %38, %cst_31 {dimension_numbers = #tpu.dot_dimension_numbers<[1], [0], [0], [1], [0, 0, 1, 1], [], []>} : vector<128x128xbf16>, vector<128x128xbf16>, vector<128x128xf32> -> vector<128x128xf32>
    %40 = arith.addf %39, %33 : vector<128x128xf32>
    %c1_i32 = arith.constant 1 : i32
    %41 = arith.truncf %40 : vector<128x128xf32> to vector<128x128xbf16>
    %cst_32 = arith.constant dense<0.000000e+00> : vector<128x128xf32>
    %42 = tpu.matmul %41, %34, %cst_32 {dimension_numbers = #tpu.dot_dimension_numbers<[1], [0], [0], [1], [0, 0, 1, 1], [], []>} : vector<128x128xbf16>, vector<128x128xbf16>, vector<128x128xf32> -> vector<128x128xf32>
    %43 = arith.truncf %42 : vector<128x128xf32> to vector<128x128xbf16>
    %cst_33 = arith.constant dense<0.000000e+00> : vector<128x128xf32>
    %44 = tpu.matmul %3, %43, %cst_33 {dimension_numbers = #tpu.dot_dimension_numbers<[1], [0], [0], [1], [0, 0, 1, 1], [], []>} : vector<128x128xbf16>, vector<128x128xbf16>, vector<128x128xf32> -> vector<128x128xf32>
    %45 = arith.addf %44, %33 : vector<128x128xf32>
    %c2_i32 = arith.constant 2 : i32
    %46 = arith.truncf %45 : vector<128x128xf32> to vector<128x128xbf16>
    %cst_34 = arith.constant dense<0.000000e+00> : vector<128x128xf32>
    %47 = tpu.matmul %46, %34, %cst_34 {dimension_numbers = #tpu.dot_dimension_numbers<[1], [0], [0], [1], [0, 0, 1, 1], [], []>} : vector<128x128xbf16>, vector<128x128xbf16>, vector<128x128xf32> -> vector<128x128xf32>
    %48 = arith.truncf %47 : vector<128x128xf32> to vector<128x128xbf16>
    %cst_35 = arith.constant dense<0.000000e+00> : vector<128x128xf32>
    %49 = tpu.matmul %3, %48, %cst_35 {dimension_numbers = #tpu.dot_dimension_numbers<[1], [0], [0], [1], [0, 0, 1, 1], [], []>} : vector<128x128xbf16>, vector<128x128xbf16>, vector<128x128xf32> -> vector<128x128xf32>
    %50 = arith.addf %49, %33 : vector<128x128xf32>
    %c3_i32 = arith.constant 3 : i32
    %51 = arith.truncf %50 : vector<128x128xf32> to vector<128x128xbf16>
    %cst_36 = arith.constant dense<0.000000e+00> : vector<128x128xf32>
    %52 = tpu.matmul %51, %34, %cst_36 {dimension_numbers = #tpu.dot_dimension_numbers<[1], [0], [0], [1], [0, 0, 1, 1], [], []>} : vector<128x128xbf16>, vector<128x128xbf16>, vector<128x128xf32> -> vector<128x128xf32>
    %53 = arith.truncf %52 : vector<128x128xf32> to vector<128x128xbf16>
    %cst_37 = arith.constant dense<0.000000e+00> : vector<128x128xf32>
    %54 = tpu.matmul %3, %53, %cst_37 {dimension_numbers = #tpu.dot_dimension_numbers<[1], [0], [0], [1], [0, 0, 1, 1], [], []>} : vector<128x128xbf16>, vector<128x128xbf16>, vector<128x128xf32> -> vector<128x128xf32>
    %55 = arith.addf %54, %33 : vector<128x128xf32>
    %c4_i32 = arith.constant 4 : i32
    %56 = arith.truncf %55 : vector<128x128xf32> to vector<128x128xbf16>
    %cst_38 = arith.constant dense<0.000000e+00> : vector<128x128xf32>
    %57 = tpu.matmul %56, %34, %cst_38 {dimension_numbers = #tpu.dot_dimension_numbers<[1], [0], [0], [1], [0, 0, 1, 1], [], []>} : vector<128x128xbf16>, vector<128x128xbf16>, vector<128x128xf32> -> vector<128x128xf32>
    %58 = arith.truncf %57 : vector<128x128xf32> to vector<128x128xbf16>
    %cst_39 = arith.constant dense<0.000000e+00> : vector<128x128xf32>
    %59 = tpu.matmul %3, %58, %cst_39 {dimension_numbers = #tpu.dot_dimension_numbers<[1], [0], [0], [1], [0, 0, 1, 1], [], []>} : vector<128x128xbf16>, vector<128x128xbf16>, vector<128x128xf32> -> vector<128x128xf32>
    %60 = arith.addf %59, %33 : vector<128x128xf32>
    %c5_i32 = arith.constant 5 : i32
    %61 = arith.truncf %60 : vector<128x128xf32> to vector<128x128xbf16>
    %cst_40 = arith.constant dense<0.000000e+00> : vector<128x128xf32>
    %62 = tpu.matmul %61, %34, %cst_40 {dimension_numbers = #tpu.dot_dimension_numbers<[1], [0], [0], [1], [0, 0, 1, 1], [], []>} : vector<128x128xbf16>, vector<128x128xbf16>, vector<128x128xf32> -> vector<128x128xf32>
    %63 = arith.truncf %62 : vector<128x128xf32> to vector<128x128xbf16>
    %cst_41 = arith.constant dense<0.000000e+00> : vector<128x128xf32>
    %64 = tpu.matmul %3, %63, %cst_41 {dimension_numbers = #tpu.dot_dimension_numbers<[1], [0], [0], [1], [0, 0, 1, 1], [], []>} : vector<128x128xbf16>, vector<128x128xbf16>, vector<128x128xf32> -> vector<128x128xf32>
    %65 = arith.addf %64, %33 : vector<128x128xf32>
    %c6_i32 = arith.constant 6 : i32
    %66 = arith.truncf %65 : vector<128x128xf32> to vector<128x128xbf16>
    %cst_42 = arith.constant dense<0.000000e+00> : vector<128x128xf32>
    %67 = tpu.matmul %66, %34, %cst_42 {dimension_numbers = #tpu.dot_dimension_numbers<[1], [0], [0], [1], [0, 0, 1, 1], [], []>} : vector<128x128xbf16>, vector<128x128xbf16>, vector<128x128xf32> -> vector<128x128xf32>
    %68 = arith.truncf %67 : vector<128x128xf32> to vector<128x128xbf16>
    %cst_43 = arith.constant dense<0.000000e+00> : vector<128x128xf32>
    %69 = tpu.matmul %3, %68, %cst_43 {dimension_numbers = #tpu.dot_dimension_numbers<[1], [0], [0], [1], [0, 0, 1, 1], [], []>} : vector<128x128xbf16>, vector<128x128xbf16>, vector<128x128xf32> -> vector<128x128xf32>
    %70 = arith.addf %69, %33 : vector<128x128xf32>
    %c7_i32 = arith.constant 7 : i32
    %71 = arith.truncf %70 : vector<128x128xf32> to vector<128x128xbf16>
    %cst_44 = arith.constant dense<0.000000e+00> : vector<128x128xf32>
    %72 = tpu.matmul %71, %34, %cst_44 {dimension_numbers = #tpu.dot_dimension_numbers<[1], [0], [0], [1], [0, 0, 1, 1], [], []>} : vector<128x128xbf16>, vector<128x128xbf16>, vector<128x128xf32> -> vector<128x128xf32>
    %73 = arith.truncf %72 : vector<128x128xf32> to vector<128x128xbf16>
    %cst_45 = arith.constant dense<0.000000e+00> : vector<128x128xf32>
    %74 = tpu.matmul %3, %73, %cst_45 {dimension_numbers = #tpu.dot_dimension_numbers<[1], [0], [0], [1], [0, 0, 1, 1], [], []>} : vector<128x128xbf16>, vector<128x128xbf16>, vector<128x128xf32> -> vector<128x128xf32>
    %75 = arith.addf %74, %33 : vector<128x128xf32>
    %c8_i32 = arith.constant 8 : i32
    %76 = arith.truncf %75 : vector<128x128xf32> to vector<128x128xbf16>
    %cst_46 = arith.constant dense<0.000000e+00> : vector<128x128xf32>
    %77 = tpu.matmul %76, %34, %cst_46 {dimension_numbers = #tpu.dot_dimension_numbers<[1], [0], [0], [1], [0, 0, 1, 1], [], []>} : vector<128x128xbf16>, vector<128x128xbf16>, vector<128x128xf32> -> vector<128x128xf32>
    %78 = arith.truncf %77 : vector<128x128xf32> to vector<128x128xbf16>
    %cst_47 = arith.constant dense<0.000000e+00> : vector<128x128xf32>
    %79 = tpu.matmul %3, %78, %cst_47 {dimension_numbers = #tpu.dot_dimension_numbers<[1], [0], [0], [1], [0, 0, 1, 1], [], []>} : vector<128x128xbf16>, vector<128x128xbf16>, vector<128x128xf32> -> vector<128x128xf32>
    %80 = arith.addf %79, %33 : vector<128x128xf32>
    %c9_i32 = arith.constant 9 : i32
    %81 = arith.truncf %80 : vector<128x128xf32> to vector<128x128xbf16>
    %cst_48 = arith.constant dense<0.000000e+00> : vector<128x128xf32>
    %82 = tpu.matmul %81, %34, %cst_48 {dimension_numbers = #tpu.dot_dimension_numbers<[1], [0], [0], [1], [0, 0, 1, 1], [], []>} : vector<128x128xbf16>, vector<128x128xbf16>, vector<128x128xf32> -> vector<128x128xf32>
    %83 = arith.truncf %82 : vector<128x128xf32> to vector<128x128xbf16>
    %cst_49 = arith.constant dense<0.000000e+00> : vector<128x128xf32>
    %84 = tpu.matmul %3, %83, %cst_49 {dimension_numbers = #tpu.dot_dimension_numbers<[1], [0], [0], [1], [0, 0, 1, 1], [], []>} : vector<128x128xbf16>, vector<128x128xbf16>, vector<128x128xf32> -> vector<128x128xf32>
    %85 = arith.addf %84, %33 : vector<128x128xf32>
    %86 = arith.truncf %85 : vector<128x128xf32> to vector<128x128xbf16>
    %c0_50 = arith.constant 0 : index
    %c0_51 = arith.constant 0 : index
    %c0_52 = arith.constant 0 : index
    %87 = vector.load %arg13[%c0_50, %c0_51, %c0_52] : memref<2x128x128xbf16, #tpu.memory_space<vmem>>, vector<1x128x128xbf16>
    %88 = vector.shape_cast %87 : vector<1x128x128xbf16> to vector<128x128xbf16>
    %cst_53 = arith.constant dense<0.000000e+00> : vector<128x128xf32>
    %89 = tpu.matmul %86, %88, %cst_53 {dimension_numbers = #tpu.dot_dimension_numbers<[1], [0], [0], [1], [0, 0, 1, 1], [], []>} : vector<128x128xbf16>, vector<128x128xbf16>, vector<128x128xf32> -> vector<128x128xf32>
    %c0_54 = arith.constant 0 : index
    %c0_55 = arith.constant 0 : index
    %c0_56 = arith.constant 0 : index
    %90 = vector.load %arg14[%c0_54, %c0_55, %c0_56] : memref<2x1x128xf32, #tpu.memory_space<vmem>>, vector<1x1x128xf32>
    %91 = vector.shape_cast %90 : vector<1x1x128xf32> to vector<1x128xf32>
    %92 = vector.broadcast %91 : vector<1x128xf32> to vector<128x128xf32>
    %93 = arith.addf %89, %92 : vector<128x128xf32>
    %cst_57 = arith.constant 0.000000e+00 : f32
    %94 = vector.broadcast %cst_57 : f32 to vector<128x128xf32>
    %95 = arith.maximumf %93, %94 : vector<128x128xf32>
    %96 = arith.truncf %95 : vector<128x128xf32> to vector<128x128xbf16>
    %c1 = arith.constant 1 : index
    %c0_58 = arith.constant 0 : index
    %c0_59 = arith.constant 0 : index
    %97 = vector.load %arg13[%c1, %c0_58, %c0_59] : memref<2x128x128xbf16, #tpu.memory_space<vmem>>, vector<1x128x128xbf16>
    %98 = vector.shape_cast %97 : vector<1x128x128xbf16> to vector<128x128xbf16>
    %cst_60 = arith.constant dense<0.000000e+00> : vector<128x128xf32>
    %99 = tpu.matmul %96, %98, %cst_60 {dimension_numbers = #tpu.dot_dimension_numbers<[1], [0], [0], [1], [0, 0, 1, 1], [], []>} : vector<128x128xbf16>, vector<128x128xbf16>, vector<128x128xf32> -> vector<128x128xf32>
    %c1_61 = arith.constant 1 : index
    %c0_62 = arith.constant 0 : index
    %c0_63 = arith.constant 0 : index
    %100 = vector.load %arg14[%c1_61, %c0_62, %c0_63] : memref<2x1x128xf32, #tpu.memory_space<vmem>>, vector<1x1x128xf32>
    %101 = vector.shape_cast %100 : vector<1x1x128xf32> to vector<1x128xf32>
    %102 = vector.broadcast %101 : vector<1x128xf32> to vector<128x128xf32>
    %103 = arith.addf %99, %102 : vector<128x128xf32>
    %cst_64 = arith.constant 0.000000e+00 : f32
    %104 = vector.broadcast %cst_64 : f32 to vector<128x128xf32>
    %105 = arith.maximumf %103, %104 : vector<128x128xf32>
    %c0_65 = arith.constant 0 : index
    %c0_66 = arith.constant 0 : index
    %c0_67 = arith.constant 0 : index
    %106 = vector.load %arg4[%c0_65, %c0_66, %c0_67] : memref<1x8x128xbf16, #tpu.memory_space<vmem>>, vector<1x8x128xbf16>
    %107 = vector.shape_cast %106 : vector<1x8x128xbf16> to vector<8x128xbf16>
    %108 = arith.truncf %105 : vector<128x128xf32> to vector<128x128xbf16>
    %cst_68 = arith.constant dense<0.000000e+00> : vector<8x128xf32>
    %109 = tpu.matmul %107, %108, %cst_68 {dimension_numbers = #tpu.dot_dimension_numbers<[1], [0], [0], [1], [0, 0, 1, 1], [], []>} : vector<8x128xbf16>, vector<128x128xbf16>, vector<8x128xf32> -> vector<8x128xf32>
    %c0_69 = arith.constant 0 : index
    %c0_70 = arith.constant 0 : index
    %c0_71 = arith.constant 0 : index
    %110 = vector.load %arg15[%c0_69, %c0_70, %c0_71] : memref<1x8x128xf32, #tpu.memory_space<vmem>>, vector<1x8x128xf32>
    %111 = vector.shape_cast %110 : vector<1x8x128xf32> to vector<8x128xf32>
    %112 = vector.shape_cast %109 : vector<8x128xf32> to vector<1x8x128xf32>
    tpu.vector_store %arg15[%c0_69, %c0_70, %c0_71], %112 {strides = array<i32>} : memref<1x8x128xf32, #tpu.memory_space<vmem>>, vector<1x8x128xf32>,
    return
  }
  func.func @transform_0(%arg0: i32) -> (i32, i32, i32) {
    %c0_i32 = arith.constant 0 : i32
    %c0_i32_0 = arith.constant 0 : i32
    %c0_i32_1 = arith.constant 0 : i32
    return %arg0, %c0_i32, %c0_i32_0 : i32, i32, i32
  }
  func.func @transform_1(%arg0: i32) -> (i32, i32, i32) {
    %c0_i32 = arith.constant 0 : i32
    %c0_i32_0 = arith.constant 0 : i32
    %c0_i32_1 = arith.constant 0 : i32
    return %arg0, %c0_i32, %c0_i32_0 : i32, i32, i32
  }
  func.func @transform_2(%arg0: i32) -> (i32, i32, i32) {
    %c0_i32 = arith.constant 0 : i32
    %c0_i32_0 = arith.constant 0 : i32
    %c0_i32_1 = arith.constant 0 : i32
    return %arg0, %c0_i32, %c0_i32_0 : i32, i32, i32
  }
  func.func @transform_3(%arg0: i32) -> (i32, i32, i32) {
    %c0_i32 = arith.constant 0 : i32
    %c0_i32_0 = arith.constant 0 : i32
    %c0_i32_1 = arith.constant 0 : i32
    return %arg0, %c0_i32, %c0_i32_0 : i32, i32, i32
  }
  func.func @transform_4(%arg0: i32) -> (i32, i32) {
    %c0_i32 = arith.constant 0 : i32
    %c0_i32_0 = arith.constant 0 : i32
    %c0_i32_1 = arith.constant 0 : i32
    return %c0_i32, %c0_i32_0 : i32, i32
  }
  func.func @transform_5(%arg0: i32) -> (i32, i32) {
    %c0_i32 = arith.constant 0 : i32
    %c0_i32_0 = arith.constant 0 : i32
    %c0_i32_1 = arith.constant 0 : i32
    return %c0_i32, %c0_i32_0 : i32, i32
  }
  func.func @transform_6(%arg0: i32) -> (i32, i32) {
    %c0_i32 = arith.constant 0 : i32
    %c0_i32_0 = arith.constant 0 : i32
    %c0_i32_1 = arith.constant 0 : i32
    return %c0_i32, %c0_i32_0 : i32, i32
  }
  func.func @transform_7(%arg0: i32) -> (i32, i32) {
    %c0_i32 = arith.constant 0 : i32
    %c0_i32_0 = arith.constant 0 : i32
    %c0_i32_1 = arith.constant 0 : i32
    return %c0_i32, %c0_i32_0 : i32, i32
  }
  func.func @transform_8(%arg0: i32) -> (i32, i32) {
    %c0_i32 = arith.constant 0 : i32
    %c0_i32_0 = arith.constant 0 : i32
    %c0_i32_1 = arith.constant 0 : i32
    return %c0_i32, %c0_i32_0 : i32, i32
  }
  func.func @transform_9(%arg0: i32) -> (i32, i32) {
    %c0_i32 = arith.constant 0 : i32
    %c0_i32_0 = arith.constant 0 : i32
    %c0_i32_1 = arith.constant 0 : i32
    return %c0_i32, %c0_i32_0 : i32, i32
  }
  func.func @transform_10(%arg0: i32) -> (i32, i32) {
    %c0_i32 = arith.constant 0 : i32
    %c0_i32_0 = arith.constant 0 : i32
    %c0_i32_1 = arith.constant 0 : i32
    return %c0_i32, %c0_i32_0 : i32, i32
  }
  func.func @transform_11(%arg0: i32) -> (i32, i32) {
    %c0_i32 = arith.constant 0 : i32
    %c0_i32_0 = arith.constant 0 : i32
    %c0_i32_1 = arith.constant 0 : i32
    return %c0_i32, %c0_i32_0 : i32, i32
  }
  func.func @transform_12(%arg0: i32) -> (i32, i32, i32) {
    %c0_i32 = arith.constant 0 : i32
    %c0_i32_0 = arith.constant 0 : i32
    %c0_i32_1 = arith.constant 0 : i32
    %c0_i32_2 = arith.constant 0 : i32
    return %c0_i32, %c0_i32_0, %c0_i32_1 : i32, i32, i32
  }
  func.func @transform_13(%arg0: i32) -> (i32, i32, i32) {
    %c0_i32 = arith.constant 0 : i32
    %c0_i32_0 = arith.constant 0 : i32
    %c0_i32_1 = arith.constant 0 : i32
    %c0_i32_2 = arith.constant 0 : i32
    return %c0_i32, %c0_i32_0, %c0_i32_1 : i32, i32, i32
  }
  func.func @transform_14(%arg0: i32) -> (i32, i32, i32) {
    %c0_i32 = arith.constant 0 : i32
    %c0_i32_0 = arith.constant 0 : i32
    %c0_i32_1 = arith.constant 0 : i32
    return %arg0, %c0_i32, %c0_i32_0 : i32, i32, i32
  }
}

</mosaic_0001>

<bundles_post_ra>
// kernel: tpu_custom_call.1
= control target key start
LH: loop header
LB: loop body
LE: loop exit
PB: predicated region body
PF: predicated region fallthrough
CT: control target
= control target key end

     0   :  { %19 = vsyncpa [#allocation3], 0  ;;  %s6062_s0 = inlined_call_operand.hbm [shape: bf16[1,128,128], index: 0, kind: input, shape index: {}]   ;;  %s6063_s1 = inlined_call_operand.hbm [shape: bf16[1,128,128], index: 1, kind: input, shape index: {}]   ;;  %s6064_s2 = inlined_call_operand.vmem [shape: f32[1,128,1], index: 2, kind: input, shape index: {}]   ;;  %s6065_s3 = inlined_call_operand.vmem [shape: bf16[1,8,128], index: 3, kind: input, shape index: {}]   ;;  %s6066_s4 = inlined_call_operand.hbm [shape: bf16[128,128], index: 4, kind: input, shape index: {}]   ;;  %s6067_s5 = inlined_call_operand.vmem [shape: f32[1,128], index: 5, kind: input, shape index: {}]   ;;  %s6068_s6 = inlined_call_operand.hbm [shape: bf16[128,128], index: 6, kind: input, shape index: {}]   ;;  %s6069_s7 = inlined_call_operand.vmem [shape: f32[1,128], index: 7, kind: input, shape index: {}]   ;;  %s6070_s8 = inlined_call_operand.hbm [shape: bf16[128,128], index: 8, kind: input, shape index: {}]   ;;  %s6071_s9 = inlined_call_operand.vmem [shape: f32[1,128], index: 9, kind: input, shape index: {}]   ;;  %s6072_s10 = inlined_call_operand.hbm [shape: bf16[128,128], index: 10, kind: input, shape index: {}]   ;;  %s6073_s11 = inlined_call_operand.vmem [shape: f32[1,128], index: 11, kind: input, shape index: {}]   ;;  %s6074_s12 = inlined_call_operand.vmem [shape: bf16[2,128,128], index: 12, kind: input, shape index: {}]   ;;  %s6075_s13 = inlined_call_operand.vmem [shape: f32[2,1,128], index: 13, kind: input, shape index: {}]   ;;  %s6076_s14 = inlined_call_operand.hbm [shape: f32[1,8,128], index: 14, kind: output, shape index: {}]  }
   0x1   :  { %20 = vsyncpa [#allocation6], 0 }
   0x2   :  { %21 = vsyncpa [#allocation9], 0 }
   0x3   :  { %22 = vsyncpa [#allocation12], 0 }
   0x4   :  { %23 = vsyncpa [#allocation4], 0  ;;  %s5161_s29 = smov [#allocation5]   ;;  %s5162_s15 = smov [#allocation8]  }
   0x5   :  { %s41_s30 = sshll.u32 %s5161_s29, 4  ;;  %s71_s16 = sshll.u32 %s5162_s15, 4  ;;  %s42_s30 = int_to_ptr.vmem [resolvable:$true] %s41_s30  ;;  %s5248_s16 = int_to_ptr.vmem [resolvable:$true] %s71_s16 }
   0x6   :  { %s4997_s19 = scalar_lea.hbm %s6063_s1, 1024 }
   0x7   :  { %p4998_p0 = scmp.ne.s32.totalorder %s6063_s1, %s4997_s19  ;;  %p5001_p1 = scmp.lt.u32.totalorder %s4997_s19, %s6063_s1 }
   0x9   :  { %p5003_p2 = pnand %p5001_p1, %p4998_p0 }
   0xb   :  { %5006 = shalt.err (!%p5003_p2)
}
   0xc   :  { %s5007_s24 = scalar_lea.vmem %s42_s30, 1024  ;;  %p5012_p4 = scmp.lt.s32.totalorder %s42_s30, %s42_s30 }
   0xd   :  { %p5008_p3 = scmp.ne.s32.totalorder %s42_s30, %s5007_s24  ;;  %p5013_p5 = scmp.lt.s32.totalorder %s5007_s24, %s5007_s24 }
   0xf   :  { %p5014_p6 = por %p5013_p5, %p5012_p4 }
  0x11   :  { %p5015_p7 = pnand %p5014_p6, %p5008_p3 }
  0x13   :  { %5018 = shalt.err (!%p5015_p7)
}
  0x14   :  { %s5163_s25 = smov 64   ;;  %s5164_s26 = smov 4  }
  0x15   :  { %47 = dma.hbm_to_vmem [thread:$0]  %s6063_s1, 1024, %s42_s30, [#allocation6], %s5163_s25, %s5163_s25, %s5164_s26  }
  0x16   :  { %s5019_s17 = scalar_lea.hbm %s6068_s6, 1024 }
  0x17   :  { %p5020_p8 = scmp.ne.s32.totalorder %s6068_s6, %s5019_s17  ;;  %p5023_p9 = scmp.lt.u32.totalorder %s5019_s17, %s6068_s6 }
  0x19   :  { %p5025_p10 = pnand %p5023_p9, %p5020_p8 }
  0x1b   :  { %5028 = shalt.err (!%p5025_p10)
}
  0x1c   :  { %s5029_s22 = scalar_lea.vmem %s5248_s16, 1024  ;;  %p5034_p12 = scmp.lt.s32.totalorder %s5248_s16, %s5248_s16 }
  0x1d   :  { %p5030_p11 = scmp.ne.s32.totalorder %s5248_s16, %s5029_s22  ;;  %p5035_p13 = scmp.lt.s32.totalorder %s5029_s22, %s5029_s22 }
  0x1f   :  { %p5036_p0 = por %p5035_p13, %p5034_p12 }
  0x21   :  { %p5037_p1 = pnand %p5036_p0, %p5030_p11 }
  0x23   :  { %5040 = shalt.err (!%p5037_p1)
}
  0x24   :  { %77 = dma.hbm_to_vmem [thread:$0]  %s6068_s6, 1024, %s5248_s16, [#allocation9], %s5163_s25, %s5163_s25, %s5164_s26  }
  0x25   :  { %s5165_s23 = smov [#allocation2]   ;;  %s5166_s27 = smov [#allocation7]  }
  0x26   :  { %s29_s24 = sshll.u32 %s5165_s23, 4  ;;  %s57_s28 = sshll.u32 %s5166_s27, 4  ;;  %s30_s24 = int_to_ptr.vmem [resolvable:$true] %s29_s24  ;;  %s5285_s28 = int_to_ptr.vmem [resolvable:$true] %s57_s28 }
  0x27   :  { %s5041_s17 = scalar_lea.hbm %s6062_s0, 1024 }
  0x28   :  { %p5042_p2 = scmp.ne.s32.totalorder %s6062_s0, %s5041_s17  ;;  %p5045_p3 = scmp.lt.u32.totalorder %s5041_s17, %s6062_s0 }
  0x2a   :  { %p5047_p4 = pnand %p5045_p3, %p5042_p2 }
  0x2c   :  { %5050 = shalt.err (!%p5047_p4)
}
  0x2d   :  { %s5051_s6 = scalar_lea.vmem %s30_s24, 1024  ;;  %p5056_p6 = scmp.lt.s32.totalorder %s30_s24, %s30_s24 }
  0x2e   :  { %p5052_p5 = scmp.ne.s32.totalorder %s30_s24, %s5051_s6  ;;  %p5057_p7 = scmp.lt.s32.totalorder %s5051_s6, %s5051_s6 }
  0x30   :  { %p5058_p8 = por %p5057_p7, %p5056_p6 }
  0x32   :  { %p5059_p9 = pnand %p5058_p8, %p5052_p5 }
  0x34   :  { %5062 = shalt.err (!%p5059_p9)
}
  0x35   :  { %35 = dma.hbm_to_vmem [thread:$0]  %s6062_s0, 1024, %s30_s24, [#allocation3], %s5163_s25, %s5163_s25, %s5164_s26  }
  0x36   :  { %s5063_s23 = scalar_lea.hbm %s6066_s4, 1024 }
  0x37   :  { %p5064_p10 = scmp.ne.s32.totalorder %s6066_s4, %s5063_s23  ;;  %p5067_p11 = scmp.lt.u32.totalorder %s5063_s23, %s6066_s4 }
  0x39   :  { %p5069_p12 = pnand %p5067_p11, %p5064_p10 }
  0x3b   :  { %5072 = shalt.err (!%p5069_p12)
}
  0x3c   :  { %s5073_s18 = scalar_lea.vmem %s5285_s28, 1024  ;;  %p5078_p0 = scmp.lt.s32.totalorder %s5285_s28, %s5285_s28 }
  0x3d   :  { %p5074_p13 = scmp.ne.s32.totalorder %s5285_s28, %s5073_s18  ;;  %p5079_p1 = scmp.lt.s32.totalorder %s5073_s18, %s5073_s18 }
  0x3f   :  { %p5080_p2 = por %p5079_p1, %p5078_p0 }
  0x41   :  { %p5081_p3 = pnand %p5080_p2, %p5074_p13 }
  0x43   :  { %5084 = shalt.err (!%p5081_p3)
}
  0x44   :  { %63 = dma.hbm_to_vmem [thread:$0]  %s6066_s4, 1024, %s5285_s28, [#allocation6], %s5163_s25, %s5163_s25, %s5164_s26  }
  0x45   :  { %s5167_s19 = smov [#allocation10]   ;;  %s5168_s21 = smov [#allocation11]  }
  0x46   :  { %s85_s20 = sshll.u32 %s5167_s19, 4  ;;  %s99_s6 = sshll.u32 %s5168_s21, 4  ;;  %s86_s20 = int_to_ptr.vmem [resolvable:$true] %s85_s20  ;;  %s5322_s6 = int_to_ptr.vmem [resolvable:$true] %s99_s6 }
  0x47   :  { %s5085_s1 = scalar_lea.hbm %s6070_s8, 1024 }
  0x48   :  { %p5086_p4 = scmp.ne.s32.totalorder %s6070_s8, %s5085_s1  ;;  %p5089_p5 = scmp.lt.u32.totalorder %s5085_s1, %s6070_s8 }
  0x4a   :  { %p5091_p6 = pnand %p5089_p5, %p5086_p4 }
  0x4c   :  { %5094 = shalt.err (!%p5091_p6)
}
  0x4d   :  { %s5095_s4 = scalar_lea.vmem %s86_s20, 1024  ;;  %p5100_p8 = scmp.lt.s32.totalorder %s86_s20, %s86_s20 }
  0x4e   :  { %p5096_p7 = scmp.ne.s32.totalorder %s86_s20, %s5095_s4  ;;  %p5101_p9 = scmp.lt.s32.totalorder %s5095_s4, %s5095_s4 }
  0x50   :  { %p5102_p10 = por %p5101_p9, %p5100_p8 }
  0x52   :  { %p5103_p11 = pnand %p5102_p10, %p5096_p7 }
  0x54   :  { %5106 = shalt.err (!%p5103_p11)
}
  0x55   :  { %91 = dma.hbm_to_vmem [thread:$0]  %s6070_s8, 1024, %s86_s20, [#allocation9], %s5163_s25, %s5163_s25, %s5164_s26  }
  0x56   :  { %s5107_s0 = scalar_lea.hbm %s6072_s10, 1024 }
  0x57   :  { %p5108_p12 = scmp.ne.s32.totalorder %s6072_s10, %s5107_s0  ;;  %p5111_p13 = scmp.lt.u32.totalorder %s5107_s0, %s6072_s10 }
  0x59   :  { %p5113_p0 = pnand %p5111_p13, %p5108_p12 }
  0x5b   :  { %5116 = shalt.err (!%p5113_p0)
}
  0x5c   :  { %s5117_s22 = scalar_lea.vmem %s5322_s6, 1024  ;;  %p5122_p2 = scmp.lt.s32.totalorder %s5322_s6, %s5322_s6 }
  0x5d   :  { %p5118_p1 = scmp.ne.s32.totalorder %s5322_s6, %s5117_s22  ;;  %p5123_p3 = scmp.lt.s32.totalorder %s5117_s22, %s5117_s22 }
  0x5f   :  { %p5124_p4 = por %p5123_p3, %p5122_p2 }
  0x61   :  { %p5125_p5 = pnand %p5124_p4, %p5118_p1 }
  0x63   :  { %5128 = shalt.err (!%p5125_p5)
}
  0x64   :  { %105 = dma.hbm_to_vmem [thread:$0]  %s6072_s10, 1024, %s5322_s6, [#allocation12], %s5163_s25, %s5163_s25, %s5164_s26  }
  0x65   :  { %5151 = dma.done.wait [#allocation3], 1024  }
  0x66   :  { %5152 = vsyncadd [#allocation3], 4294966272 }
  0x67   :  { %5153 = dma.done.wait [#allocation6], 2048  }
  0x68   :  { %5154 = vsyncadd [#allocation6], 4294965248 }
  0x69   :  { %5155 = dma.done.wait [#allocation9], 2048  }
  0x6a   :  { %5156 = vsyncadd [#allocation9], 4294965248 }
  0x6b   :  { %5157 = dma.done.wait [#allocation12], 1024  }
  0x6c   :  { %5158 = vsyncadd [#allocation12], 4294966272  ;;  %v4902_v0 = vld [vmem:[#allocation7] sm:$0xff]   ;;  %v4903_v1 = vld [vmem:[#allocation7 + $0x8] sm:$0xff]   ;;  %v5169_v25 = vmov 0   ;;  %vm5171_vm0 = vmmov 0  }
  0x6d   :  { %4068 = vmatprep.subr.bf16.mxu0 %v4902_v0  ;;  %v4904_v2 = vld [vmem:[#allocation7 + $0x10] sm:$0xff]   ;;  %v4905_v3 = vld [vmem:[#allocation7 + $0x18] sm:$0xff]   ;;  %v4910_v4 = vld [vmem:[#allocation2] sm:$0xff]   ;;  %4900 = vset.pattern.permute.xlu0 %v5169_v25  ;;  %s5172_s20 = smov [#allocation13]  }
  0x6e   :  { %4069 = vmatpush3.bf16.msra.mxu0 %v4902_v0  ;;  %4084 = vmatprep.mubr.bf16.mxu0 %v4910_v4  ;;  %v4906_v5 = vld [vmem:[#allocation7 + $0x20] sm:$0xff]   ;;  %v4907_v6 = vld [vmem:[#allocation7 + $0x28] sm:$0xff]   ;;  %v4908_v9 = vld [vmem:[#allocation7 + $0x30] sm:$0xff]   ;;  %s3560_s10 = sshll.u32 %s5172_s20, 4  ;;  %s3561_s10 = int_to_ptr.vmem [resolvable:$true] %s3560_s10 }
  0x6f   :  { %4070 = vmatprep.subr.bf16.mxu0 %v4903_v1  ;;  %v4918_v7 = vld [vmem:[#allocation8] sm:$0xff]   ;;  %v4919_v8 = vld [vmem:[#allocation8 + $0x8] sm:$0xff]   ;;  %v4920_v10 = vld [vmem:[#allocation8 + $0x10] sm:$0xff]   ;;  %4901 = vset.pattern.permute.xlu1 %v5169_v25  ;;  %s5129_s25 = scalar_lea.vmem %s3561_s10, 128  ;;  %p5134_p7 = scmp.lt.s32.totalorder %s3561_s10, %s3561_s10 }
  0x70   :  { %4100 = vmatprep.subr.bf16.mxu1 %v4918_v7  ;;  %v4909_v11 = vld [vmem:[#allocation7 + $0x38] sm:$0xff]   ;;  %v4922_v13 = vld [vmem:[#allocation8 + $0x20] sm:$0xff]   ;;  %v4911_v14 = vld [vmem:[#allocation2 + $0x8] sm:$0xff]   ;;  %p5130_p6 = scmp.ne.s32.totalorder %s3561_s10, %s5129_s25  ;;  %p5135_p8 = scmp.lt.s32.totalorder %s5129_s25, %s5129_s25 }
  0x71   :  { %4101 = vmatpush3.bf16.msra.mxu1 %v4918_v7  ;;  %v4921_v12 = vld [vmem:[#allocation8 + $0x18] sm:$0xff]   ;;  %v4912_v15 = vld [vmem:[#allocation2 + $0x10] sm:$0xff]   ;;  %v4923_v16 = vld [vmem:[#allocation8 + $0x28] sm:$0xff]  }
  0x72   :  { %4071 = vmatpush3.bf16.msra.mxu0 %v4903_v1  ;;  %4102 = vmatprep.subr.bf16.mxu1 %v4919_v8  ;;  %v4913_v17 = vld [vmem:[#allocation2 + $0x18] sm:$0xff]   ;;  %v4914_v18 = vld [vmem:[#allocation2 + $0x20] sm:$0xff]   ;;  %v4915_v19 = vld [vmem:[#allocation2 + $0x28] sm:$0xff]   ;;  %p5136_p9 = por %p5135_p8, %p5134_p7 }
  0x73   :  { %4072 = vmatprep.subr.bf16.mxu0 %v4904_v2  ;;  %v4916_v20 = vld [vmem:[#allocation2 + $0x30] sm:$0xff]   ;;  %v4917_v21 = vld [vmem:[#allocation2 + $0x38] sm:$0xff]   ;;  %v5359_v24 = vld [vmem:[#allocation11] sm:$0xff]  }
  0x74   :  { %v4924_v22 = vld [vmem:[#allocation8 + $0x30] sm:$0xff]   ;;  %v4925_v23 = vld [vmem:[#allocation8 + $0x38] sm:$0xff]   ;;  %v4934_v26 = vld [vmem:[#allocation10] sm:$0xff]   ;;  %p5137_p10 = pnand %p5136_p9, %p5130_p6 }
  0x75   :  { %4103 = vmatpush3.bf16.msra.mxu1 %v4919_v8  ;;  %v4935_v27 = vld [vmem:[#allocation10 + $0x8] sm:$0xff]   ;;  %v4936_v28 = vld [vmem:[#allocation10 + $0x10] sm:$0xff]   ;;  %v4937_v29 = vld [vmem:[#allocation10 + $0x18] sm:$0xff]  }
  0x76   :  { %4073 = vmatpush3.bf16.msra.mxu0 %v4904_v2  ;;  %4104 = vmatprep.subr.bf16.mxu1 %v4920_v10  ;;  %v4938_v30 = vld [vmem:[#allocation10 + $0x20] sm:$0xff]   ;;  %v4939_v31 = vld [vmem:[#allocation10 + $0x28] sm:$0xff]   ;;  %v5381_v58 = vld [vmem:[#allocation11 + $0x10] sm:$0xff]  }
  0x77   :  { %4074 = vmatprep.subr.bf16.mxu0 %v4905_v3  ;;  %v5367_v32 = vld [vmem:[%s6067_s5] ss:$0 sm:$0xff]  ;;  %v5374_v50 = vld [vmem:[#allocation11 + $0x8] sm:$0xff]   ;;  %v5386_v2 = vld [vmem:[#allocation11 + $0x18] sm:$0xff]  }
  0x79   :  { %4105 = vmatpush3.bf16.msra.mxu1 %v4920_v10  ;;  %v5393_v10 = vld [vmem:[#allocation11 + $0x20] sm:$0xff]  }
  0x7a   :  { %4075 = vmatpush3.bf16.msra.mxu0 %v4905_v3  ;;  %4106 = vmatprep.subr.bf16.mxu1 %v4921_v12 }
  0x7b   :  { %4076 = vmatprep.subr.bf16.mxu0 %v4906_v5 }
  0x7d   :  { %4107 = vmatpush3.bf16.msra.mxu1 %v4921_v12 }
  0x7e   :  { %4077 = vmatpush3.bf16.msra.mxu0 %v4906_v5  ;;  %4108 = vmatprep.subr.bf16.mxu1 %v4922_v13 }
  0x7f   :  { %4078 = vmatprep.subr.bf16.mxu0 %v4907_v6 }
  0x81   :  { %4109 = vmatpush3.bf16.msra.mxu1 %v4922_v13 }
  0x82   :  { %4079 = vmatpush3.bf16.msra.mxu0 %v4907_v6  ;;  %4110 = vmatprep.subr.bf16.mxu1 %v4923_v16 }
  0x83   :  { %4080 = vmatprep.subr.bf16.mxu0 %v4908_v9 }
  0x85   :  { %4111 = vmatpush3.bf16.msra.mxu1 %v4923_v16 }
  0x86   :  { %4081 = vmatpush3.bf16.msra.mxu0 %v4908_v9  ;;  %4112 = vmatprep.subr.bf16.mxu1 %v4924_v22 }
  0x87   :  { %4082 = vmatprep.subr.bf16.mxu0 %v4909_v11 }
  0x89   :  { %4113 = vmatpush3.bf16.msra.mxu1 %v4924_v22 }
  0x8a   :  { %4083 = vmatpush3.bf16.msra.mxu0 %v4909_v11  ;;  %4114 = vmatprep.subr.bf16.mxu1 %v4925_v23 }
  0x8b   :  { %4132 = vmatprep.subr.bf16.mxu0 %v4934_v26 }
  0x8d   :  { %4085 = vmatmul.mubr.bf16.vlgmr.msra.gmra.mrb[0].mxu0 %v4911_v14  ;;  %4115 = vmatpush3.bf16.msra.mxu1 %v4925_v23 }
  0x8e   :  { %4088 = vmatprep.mubr.bf16.mxu0 %v4912_v15  ;;  %4164 = vmatprep.subr.bf16.mxu1 %v5359_v24 }
  0x8f   :  { %4133 = vmatpush3.bf16.msra.mxu0 %v4934_v26 }
  0x90   :  { %4134 = vmatprep.subr.bf16.mxu0 %v4935_v27 }
  0x93   :  { %4135 = vmatpush3.bf16.msra.mxu0 %v4935_v27 }
  0x94   :  { %4136 = vmatprep.subr.bf16.mxu0 %v4936_v28 }
  0x95   :  { %4089 = vmatmul.mubr.bf16.gmra.mrb[4].mxu0 %v4913_v17 }
  0x96   :  { %4092 = vmatprep.mubr.bf16.mxu0 %v4914_v18  ;;  %v5398_v18 = vld [vmem:[#allocation11 + $0x28] sm:$0xff]  }
  0x97   :  { %4137 = vmatpush3.bf16.msra.mxu0 %v4936_v28  ;;  %v5405_v28 = vld [vmem:[#allocation11 + $0x30] sm:$0xff]  }
  0x98   :  { %4138 = vmatprep.subr.bf16.mxu0 %v4937_v29 }
  0x9b   :  { %4139 = vmatpush3.bf16.msra.mxu0 %v4937_v29 }
  0x9c   :  { %4140 = vmatprep.subr.bf16.mxu0 %v4938_v30 }
  0x9d   :  { %4093 = vmatmul.mubr.bf16.gmra.mrb[8].mxu0 %v4915_v19 }
  0x9e   :  { %4096 = vmatprep.mubr.bf16.mxu0 %v4916_v20 }
  0x9f   :  { %4141 = vmatpush3.bf16.msra.mxu0 %v4938_v30 }
  0xa0   :  { %4142 = vmatprep.subr.bf16.mxu0 %v4939_v31 }
  0xa3   :  { %4143 = vmatpush3.bf16.msra.mxu0 %v4939_v31 }
  0xa5   :  { %4097 = vmatmul.mubr.bf16.gmra.mrb[12].mxu0 %v4917_v21 }
 0x160   :  { %v4086_v33 = vpop.f32.mrb[0].mxu0 }
 0x161   :  { %v341_v34 = vadd.f32 %v4086_v33, %v5367_v32  ;;  %v332_v35 = vpop.f32.mrb[1].mxu0 }
 0x162   :  { %v333_v36 = vadd.f32 %v5367_v32, %v332_v35  ;;  %v4087_v37 = vpop.f32.mrb[2].mxu0  ;;  %v4941_v35 = vld [vmem:[#allocation10 + $0x38] sm:$0xff]  }
 0x163   :  { %v344_v38 = vadd.f32 %v4087_v37, %v5367_v32  ;;  %v335_v39 = vpop.f32.mrb[3].mxu0  ;;  %v397_v41 = vmax.f32 %v341_v34, 0.0  ;;  %v5409_v34 = vld [vmem:[#allocation11 + $0x38] sm:$0xff]   ;;  %v164_v37 = vld [vmem:[%s6064_s2 + $0x8] sm:$0xff] }
 0x164   :  { %v336_v40 = vadd.f32 %v5367_v32, %v335_v39  ;;  %v395_v43 = vmax.f32 %v333_v36, 0.0  ;;  %v163_v36 = vld [vmem:[%s6064_s2] sm:$0xff] }
 0x165   :  { %v398_v42 = vmax.f32 %v344_v38, 0.0  ;;  %798 = vperm.xlu0 %4900, %v163_v36   ;;  %v166_v38 = vld [vmem:[%s6064_s2 + $0x18] sm:$0xff]  ;;  %v167_v39 = vld [vmem:[%s6064_s2 + $0x20] sm:$0xff] }
 0x166   :  { %v396_v44 = vmax.f32 %v336_v40, 0.0  ;;  %v168_v40 = vld [vmem:[%s6064_s2 + $0x28] sm:$0xff] }
 0x167   :  { %v412_v45 = vpack.c.bf16 %v398_v42, %v397_v41  ;;  %v169_v41 = vld [vmem:[%s6064_s2 + $0x30] sm:$0xff]  ;;  %v170_v42 = vld [vmem:[%s6064_s2 + $0x38] sm:$0xff] }
 0x168   :  { %v4090_v46 = vpop.f32.mrb[4].mxu0  ;;  %v411_v47 = vpack.c.bf16 %v396_v44, %v395_v43  ;;  %v171_v43 = vld [vmem:[%s6064_s2 + $0x40] sm:$0xff]  ;;  %v172_v44 = vld [vmem:[%s6064_s2 + $0x48] sm:$0xff] }
 0x169   :  { %v357_v48 = vadd.f32 %v4090_v46, %v5367_v32  ;;  %v348_v49 = vpop.f32.mrb[5].mxu0  ;;  %803 = vperm.xlu0 %4900, %v164_v37   ;;  %v174_v46 = vld [vmem:[%s6064_s2 + $0x58] sm:$0xff] }
 0x16a   :  { %v349_v51 = vadd.f32 %v5367_v32, %v348_v49  ;;  %v4091_v52 = vpop.f32.mrb[6].mxu0  ;;  %4116 = vmatprep.mubr.bf16.mxu1 %v411_v47  ;;  %v175_v47 = vld [vmem:[%s6064_s2 + $0x60] sm:$0xff]  ;;  %v177_v49 = vld [vmem:[%s6064_s2 + $0x70] sm:$0xff] }
 0x16b   :  { %v360_v53 = vadd.f32 %v4091_v52, %v5367_v32  ;;  %v351_v54 = vpop.f32.mrb[7].mxu0  ;;  %4117 = vmatmul.mubr.bf16.vlgmr.msra.gmra.mrb[0].mxu1 %v412_v45  ;;  %v401_v56 = vmax.f32 %v357_v48, 0.0  ;;  %v173_v45 = vld [vmem:[%s6064_s2 + $0x50] sm:$0xff]  ;;  %v176_v48 = vld [vmem:[%s6064_s2 + $0x68] sm:$0xff]  ;;  %v3589_v52 = vld [vmem:[%s6069_s7] ss:$0 sm:$0xff] }
 0x16c   :  { %v352_v55 = vadd.f32 %v5367_v32, %v351_v54  ;;  %4165 = vmatpush3.bf16.msra.mxu1 %v5359_v24  ;;  %v399_v59 = vmax.f32 %v349_v51, 0.0  ;;  %v178_v51 = vld [vmem:[%s6064_s2 + $0x78] sm:$0xff] }
 0x16d   :  { %v402_v57 = vmax.f32 %v360_v53, 0.0  ;;  %4166 = vmatprep.subr.bf16.mxu1 %v5374_v50  ;;  %818 = vperm.xlu0 %4900, %v167_v39  }
 0x16e   :  { %v400_v60 = vmax.f32 %v352_v55, 0.0 }
 0x16f   :  { %v414_v61 = vpack.c.bf16 %v402_v57, %v401_v56 }
 0x170   :  { %v413_v62 = vpack.c.bf16 %v400_v60, %v399_v59  ;;  %v4094_v63 = vpop.f32.mrb[8].mxu0  ;;  %4167 = vmatpush3.bf16.msra.mxu1 %v5374_v50 }
 0x171   :  { %v373_v0 = vadd.f32 %v4094_v63, %v5367_v32  ;;  %v364_v1 = vpop.f32.mrb[9].mxu0  ;;  %4168 = vmatprep.subr.bf16.mxu1 %v5381_v58  ;;  %828 = vperm.xlu0 %4900, %v169_v41  }
 0x172   :  { %v365_v3 = vadd.f32 %v5367_v32, %v364_v1  ;;  %v4095_v4 = vpop.f32.mrb[10].mxu0  ;;  %4120 = vmatprep.mubr.bf16.mxu1 %v413_v62 }
 0x173   :  { %v376_v5 = vadd.f32 %v4095_v4, %v5367_v32  ;;  %v367_v6 = vpop.f32.mrb[11].mxu0  ;;  %4121 = vmatmul.mubr.bf16.gmra.mrb[4].mxu1 %v414_v61  ;;  %v405_v8 = vmax.f32 %v373_v0, 0.0 }
 0x174   :  { %v368_v7 = vadd.f32 %v5367_v32, %v367_v6  ;;  %4169 = vmatpush3.bf16.msra.mxu1 %v5381_v58  ;;  %v403_v11 = vmax.f32 %v365_v3, 0.0 }
 0x175   :  { %v406_v9 = vmax.f32 %v376_v5, 0.0  ;;  %4170 = vmatprep.subr.bf16.mxu1 %v5386_v2  ;;  %838 = vperm.xlu0 %4900, %v171_v43  }
 0x176   :  { %v404_v12 = vmax.f32 %v368_v7, 0.0 }
 0x177   :  { %v416_v13 = vpack.c.bf16 %v406_v9, %v405_v8 }
 0x178   :  { %v415_v14 = vpack.c.bf16 %v404_v12, %v403_v11  ;;  %v4098_v15 = vpop.f32.mrb[12].mxu0  ;;  %4171 = vmatpush3.bf16.msra.mxu1 %v5386_v2 }
 0x179   :  { %v389_v16 = vadd.f32 %v4098_v15, %v5367_v32  ;;  %v380_v17 = vpop.f32.mrb[13].mxu0  ;;  %4172 = vmatprep.subr.bf16.mxu1 %v5393_v10  ;;  %848 = vperm.xlu0 %4900, %v173_v45  }
 0x17a   :  { %v381_v19 = vadd.f32 %v5367_v32, %v380_v17  ;;  %v4099_v20 = vpop.f32.mrb[14].mxu0  ;;  %4124 = vmatprep.mubr.bf16.mxu1 %v415_v14 }
 0x17b   :  { %v392_v21 = vadd.f32 %v4099_v20, %v5367_v32  ;;  %v383_v22 = vpop.f32.mrb[15].mxu0  ;;  %4125 = vmatmul.mubr.bf16.gmra.mrb[8].mxu1 %v416_v13  ;;  %v409_v26 = vmax.f32 %v389_v16, 0.0 }
 0x17c   :  { %v384_v23 = vadd.f32 %v5367_v32, %v383_v22  ;;  %4173 = vmatpush3.bf16.msra.mxu1 %v5393_v10  ;;  %v407_v29 = vmax.f32 %v381_v19, 0.0  ;;  %v4940_v32 = vld [vmem:[#allocation10 + $0x30] sm:$0xff]  }
 0x17d   :  { %v410_v27 = vmax.f32 %v392_v21, 0.0  ;;  %4174 = vmatprep.subr.bf16.mxu1 %v5398_v18  ;;  %4144 = vmatprep.subr.bf16.mxu0 %v4940_v32 }
 0x17e   :  { %v408_v30 = vmax.f32 %v384_v23, 0.0  ;;  %4145 = vmatpush3.bf16.msra.mxu0 %v4940_v32  ;;  %858 = vperm.xlu0 %4900, %v175_v47  }
 0x17f   :  { %v418_v31 = vpack.c.bf16 %v410_v27, %v409_v26  ;;  %4146 = vmatprep.subr.bf16.mxu0 %v4941_v35 }
 0x180   :  { %v417_v33 = vpack.c.bf16 %v408_v30, %v407_v29  ;;  %4175 = vmatpush3.bf16.msra.mxu1 %v5398_v18 }
 0x181   :  { %4176 = vmatprep.subr.bf16.mxu1 %v5405_v28 }
 0x182   :  { %4128 = vmatprep.mubr.bf16.mxu1 %v417_v33  ;;  %4147 = vmatpush3.bf16.msra.mxu0 %v4941_v35 }
 0x183   :  { %4129 = vmatmul.mubr.bf16.gmra.mrb[12].mxu1 %v418_v31  ;;  %868 = vperm.xlu0 %4900, %v177_v49  }
 0x184   :  { %4177 = vmatpush3.bf16.msra.mxu1 %v5405_v28  ;;  %4180 = vmatprep.mubr.bf16.mxu1 %v5169_v25 }
 0x185   :  { %4178 = vmatprep.subr.bf16.mxu1 %v5409_v34 }
 0x188   :  { %4179 = vmatpush3.bf16.msra.mxu1 %v5409_v34 }
 0x189   :  { %4228 = vmatprep.subr.bf16.mxu1 %v5359_v24 }
 0x18b   :  { %4181 = vmatmul.mubr.bf16.vlgmr.msra.gmra.mrb[16].mxu1 %v5169_v25 }
 0x18c   :  { %4184 = vmatprep.mubr.bf16.mxu1 %v5169_v25  ;;  %4229 = vmatpush3.bf16.msra.mxu1 %v5359_v24 }
 0x18d   :  { %4230 = vmatprep.subr.bf16.mxu1 %v5374_v50 }
 0x190   :  { %4231 = vmatpush3.bf16.msra.mxu1 %v5374_v50 }
 0x191   :  { %4232 = vmatprep.subr.bf16.mxu1 %v5381_v58 }
 0x193   :  { %4185 = vmatmul.mubr.bf16.gmra.mrb[20].mxu1 %v5169_v25 }
 0x194   :  { %4188 = vmatprep.mubr.bf16.mxu1 %v5169_v25  ;;  %4233 = vmatpush3.bf16.msra.mxu1 %v5381_v58 }
 0x195   :  { %4234 = vmatprep.subr.bf16.mxu1 %v5386_v2 }
 0x198   :  { %4235 = vmatpush3.bf16.msra.mxu1 %v5386_v2 }
 0x199   :  { %4236 = vmatprep.subr.bf16.mxu1 %v5393_v10 }
 0x19b   :  { %4189 = vmatmul.mubr.bf16.gmra.mrb[24].mxu1 %v5169_v25 }
 0x19c   :  { %4192 = vmatprep.mubr.bf16.mxu1 %v5169_v25  ;;  %4237 = vmatpush3.bf16.msra.mxu1 %v5393_v10 }
 0x19d   :  { %4238 = vmatprep.subr.bf16.mxu1 %v5398_v18 }
 0x1a0   :  { %4239 = vmatpush3.bf16.msra.mxu1 %v5398_v18 }
 0x1a1   :  { %4240 = vmatprep.subr.bf16.mxu1 %v5405_v28 }
 0x1a3   :  { %4193 = vmatmul.mubr.bf16.gmra.mrb[28].mxu1 %v5169_v25  ;;  %v165_v25 = vld [vmem:[%s6064_s2 + $0x10] sm:$0xff] }
 0x1a4   :  { %4241 = vmatpush3.bf16.msra.mxu1 %v5405_v28  ;;  %808 = vperm.xlu1 %4901, %v165_v25  }
 0x1a5   :  { %4242 = vmatprep.subr.bf16.mxu1 %v5409_v34 }
 0x1a8   :  { %4243 = vmatpush3.bf16.msra.mxu1 %v5409_v34  ;;  %813 = vperm.xlu1 %4901, %v166_v38  }
 0x1a9   :  { %4292 = vmatprep.subr.bf16.mxu1 %v5359_v24 }
 0x1ac   :  { %823 = vperm.xlu1 %4901, %v168_v40  }
 0x1b0   :  { %833 = vperm.xlu1 %4901, %v170_v42  }
 0x1b4   :  { %843 = vperm.xlu1 %4901, %v172_v44  }
 0x1b8   :  { %853 = vperm.xlu1 %4901, %v174_v46  }
 0x1bc   :  { %863 = vperm.xlu1 %4901, %v176_v48  }
 0x1c0   :  { %873 = vperm.xlu1 %4901, %v178_v51  }
 0x23e   :  { %v4118_v53 = vpop.f32.mrb[0].mxu1 }
 0x23f   :  { %v533_v54 = vadd.f32 %v4118_v53, %v3589_v52  ;;  %v524_v55 = vpop.f32.mrb[1].mxu1 }
 0x240   :  { %v525_v56 = vadd.f32 %v3589_v52, %v524_v55  ;;  %v4119_v57 = vpop.f32.mrb[2].mxu1  ;;  %v5490_v55 = vld [vmem:[#allocation5] sm:$0xff]  }
 0x241   :  { %v536_v59 = vadd.f32 %v4119_v57, %v3589_v52  ;;  %v527_v60 = vpop.f32.mrb[3].mxu1  ;;  %v589_v62 = vmax.f32 %v533_v54, 0.0 }
 0x242   :  { %v528_v61 = vadd.f32 %v3589_v52, %v527_v60  ;;  %v587_v0 = vmax.f32 %v525_v56, 0.0 }
 0x243   :  { %v590_v63 = vmax.f32 %v536_v59, 0.0 }
 0x244   :  { %v588_v1 = vmax.f32 %v528_v61, 0.0 }
 0x245   :  { %v604_v3 = vpack.c.bf16 %v590_v63, %v589_v62 }
 0x246   :  { %v603_v4 = vpack.c.bf16 %v588_v1, %v587_v0  ;;  %v4122_v5 = vpop.f32.mrb[4].mxu1 }
 0x247   :  { %v549_v6 = vadd.f32 %v4122_v5, %v3589_v52  ;;  %v540_v7 = vpop.f32.mrb[5].mxu1 }
 0x248   :  { %v541_v8 = vadd.f32 %v3589_v52, %v540_v7  ;;  %v4123_v9 = vpop.f32.mrb[6].mxu1  ;;  %4148 = vmatprep.mubr.bf16.mxu0 %v603_v4 }
 0x249   :  { %v552_v11 = vadd.f32 %v4123_v9, %v3589_v52  ;;  %v543_v12 = vpop.f32.mrb[7].mxu1  ;;  %4149 = vmatmul.mubr.bf16.vlgmr.msra.gmra.mrb[16].mxu0 %v604_v3  ;;  %v593_v14 = vmax.f32 %v549_v6, 0.0 }
 0x24a   :  { %v544_v13 = vadd.f32 %v3589_v52, %v543_v12  ;;  %v591_v16 = vmax.f32 %v541_v8, 0.0 }
 0x24b   :  { %v594_v15 = vmax.f32 %v552_v11, 0.0 }
 0x24c   :  { %v592_v17 = vmax.f32 %v544_v13, 0.0 }
 0x24d   :  { %v606_v19 = vpack.c.bf16 %v594_v15, %v593_v14 }
 0x24e   :  { %v605_v20 = vpack.c.bf16 %v592_v17, %v591_v16  ;;  %v4126_v21 = vpop.f32.mrb[8].mxu1  ;;  %v5493_v17 = vld [vmem:[#allocation5 + $0x8] sm:$0xff]  }
 0x24f   :  { %v565_v22 = vadd.f32 %v4126_v21, %v3589_v52  ;;  %v556_v23 = vpop.f32.mrb[9].mxu1  ;;  %v5501_v21 = vld [vmem:[#allocation5 + $0x20] sm:$0xff]  }
 0x250   :  { %v557_v26 = vadd.f32 %v3589_v52, %v556_v23  ;;  %v4127_v27 = vpop.f32.mrb[10].mxu1  ;;  %4152 = vmatprep.mubr.bf16.mxu0 %v605_v20  ;;  %v5499_v20 = vld [vmem:[#allocation5 + $0x18] sm:$0xff]   ;;  %v5507_v23 = vld [vmem:[#allocation5 + $0x30] sm:$0xff]  }
 0x251   :  { %v568_v29 = vadd.f32 %v4127_v27, %v3589_v52  ;;  %v559_v30 = vpop.f32.mrb[11].mxu1  ;;  %4153 = vmatmul.mubr.bf16.gmra.mrb[20].mxu0 %v606_v19  ;;  %v597_v33 = vmax.f32 %v565_v22, 0.0  ;;  %v5495_v19 = vld [vmem:[#allocation5 + $0x10] sm:$0xff]   ;;  %v5505_v22 = vld [vmem:[#allocation5 + $0x28] sm:$0xff]  }
 0x252   :  { %v560_v31 = vadd.f32 %v3589_v52, %v559_v30  ;;  %v595_v35 = vmax.f32 %v557_v26, 0.0  ;;  %v5511_v26 = vld [vmem:[#allocation5 + $0x38] sm:$0xff]  }
 0x253   :  { %v598_v32 = vmax.f32 %v568_v29, 0.0 }
 0x254   :  { %v596_v36 = vmax.f32 %v560_v31, 0.0 }
 0x255   :  { %v608_v25 = vpack.c.bf16 %v598_v32, %v597_v33 }
 0x256   :  { %v607_v37 = vpack.c.bf16 %v596_v36, %v595_v35  ;;  %v4130_v38 = vpop.f32.mrb[12].mxu1 }
 0x257   :  { %v581_v39 = vadd.f32 %v4130_v38, %v3589_v52  ;;  %v572_v40 = vpop.f32.mrb[13].mxu1 }
 0x258   :  { %v573_v41 = vadd.f32 %v3589_v52, %v572_v40  ;;  %v4131_v42 = vpop.f32.mrb[14].mxu1  ;;  %4156 = vmatprep.mubr.bf16.mxu0 %v607_v37 }
 0x259   :  { %v584_v43 = vadd.f32 %v4131_v42, %v3589_v52  ;;  %v575_v44 = vpop.f32.mrb[15].mxu1  ;;  %4157 = vmatmul.mubr.bf16.gmra.mrb[24].mxu0 %v608_v25  ;;  %v601_v46 = vmax.f32 %v581_v39, 0.0 }
 0x25a   :  { %v576_v45 = vadd.f32 %v3589_v52, %v575_v44  ;;  %v599_v48 = vmax.f32 %v573_v41, 0.0  ;;  %v799_v44 = vpop.permute.xlu0 %798 }
 0x25b   :  { %v602_v47 = vmax.f32 %v584_v43, 0.0 }
 0x25c   :  { %v600_v49 = vmax.f32 %v576_v45, 0.0  ;;  %v809_v45 = vpop.permute.xlu1 %808 }
 0x25d   :  { %v610_v51 = vpack.c.bf16 %v602_v47, %v601_v46 }
 0x25e   :  { %v609_v53 = vpack.c.bf16 %v600_v49, %v599_v48  ;;  %v4182_v54 = vpop.f32.mrb[16].mxu1  ;;  %v804_v46 = vpop.permute.xlu0 %803 }
 0x25f   :  { %v1012_v56 = vpop.f32.mrb[17].mxu1 }
 0x260   :  { %4160 = vmatprep.mubr.bf16.mxu0 %v609_v53  ;;  %v4183_v57 = vpop.f32.mrb[18].mxu1  ;;  %v814_v47 = vpop.permute.xlu1 %813 }
 0x261   :  { %v1076_v59 = vpack.c.bf16 %v4183_v57, %v4182_v54  ;;  %4161 = vmatmul.mubr.bf16.gmra.mrb[28].mxu0 %v610_v51  ;;  %v1015_v60 = vpop.f32.mrb[19].mxu1  ;;  %v5534_v51 = vld [vmem:[%s6071_s9] ss:$0 sm:$0xff] }
 0x262   :  { %v1075_v61 = vpack.c.bf16 %v1015_v60, %v1012_v56  ;;  %4212 = vmatprep.mubr.bf16.mxu0 %v5490_v55  ;;  %v819_v48 = vpop.permute.xlu0 %818  ;;  %v5541_v57 = vld [vmem:[%s6073_s11] ss:$0 sm:$0xff] }
 0x264   :  { %4196 = vmatprep.subr.bf16.mxu0 %v1075_v61  ;;  %v824_v49 = vpop.permute.xlu1 %823 }
 0x265   :  { %4197 = vmatpush3.bf16.msra.mxu0 %v1075_v61 }
 0x266   :  { %v4186_v52 = vpop.f32.mrb[20].mxu1  ;;  %4198 = vmatprep.subr.bf16.mxu0 %v1076_v59  ;;  %v829_v56 = vpop.permute.xlu0 %828 }
 0x267   :  { %v1028_v62 = vpop.f32.mrb[21].mxu1 }
 0x268   :  { %v4187_v63 = vpop.f32.mrb[22].mxu1  ;;  %v834_v61 = vpop.permute.xlu1 %833 }
 0x269   :  { %v1078_v0 = vpack.c.bf16 %v4187_v63, %v4186_v52  ;;  %v1031_v1 = vpop.f32.mrb[23].mxu1  ;;  %4199 = vmatpush3.bf16.msra.mxu0 %v1076_v59  ;;  %v884_v52 = vmul.f32 %v5541_v57, %v809_v45 }
 0x26a   :  { %v1077_v3 = vpack.c.bf16 %v1031_v1, %v1028_v62  ;;  %v882_v1 = vmul.f32 %v5541_v57, %v799_v44 }
 0x26c   :  { %4200 = vmatprep.subr.bf16.mxu0 %v1077_v3 }
 0x26d   :  { %4201 = vmatpush3.bf16.msra.mxu0 %v1077_v3 }
 0x26e   :  { %v4190_v4 = vpop.f32.mrb[24].mxu1  ;;  %4202 = vmatprep.subr.bf16.mxu0 %v1078_v0 }
 0x26f   :  { %v1044_v5 = vpop.f32.mrb[25].mxu1 }
 0x270   :  { %v4191_v6 = vpop.f32.mrb[26].mxu1 }
 0x271   :  { %v1080_v7 = vpack.c.bf16 %v4191_v6, %v4190_v4  ;;  %v1047_v8 = vpop.f32.mrb[27].mxu1  ;;  %4203 = vmatpush3.bf16.msra.mxu0 %v1078_v0  ;;  %v885_v0 = vmul.f32 %v5541_v57, %v814_v47  ;;  %v883_v4 = vmul.f32 %v5541_v57, %v804_v46  ;;  %v839_v6 = vpop.permute.xlu0 %838  ;;  %v886_v46 = vmul.f32 %v5541_v57, %v819_v48 }
 0x272   :  { %v1079_v9 = vpack.c.bf16 %v1047_v8, %v1044_v5 }
 0x274   :  { %4204 = vmatprep.subr.bf16.mxu0 %v1079_v9 }
 0x275   :  { %4205 = vmatpush3.bf16.msra.mxu0 %v1079_v9 }
 0x276   :  { %v4194_v11 = vpop.f32.mrb[28].mxu1  ;;  %4206 = vmatprep.subr.bf16.mxu0 %v1080_v7 }
 0x277   :  { %v1060_v12 = vpop.f32.mrb[29].mxu1 }
 0x278   :  { %v4195_v13 = vpop.f32.mrb[30].mxu1 }
 0x279   :  { %v1082_v14 = vpack.c.bf16 %v4195_v13, %v4194_v11  ;;  %v1063_v15 = vpop.f32.mrb[31].mxu1  ;;  %4207 = vmatpush3.bf16.msra.mxu0 %v1080_v7  ;;  %v844_v7 = vpop.permute.xlu1 %843 }
 0x27a   :  { %v1081_v16 = vpack.c.bf16 %v1063_v15, %v1060_v12 }
 0x27c   :  { %4208 = vmatprep.subr.bf16.mxu0 %v1081_v16 }
 0x27d   :  { %4209 = vmatpush3.bf16.msra.mxu0 %v1081_v16 }
 0x27e   :  { %4210 = vmatprep.subr.bf16.mxu0 %v1082_v14 }
 0x281   :  { %4211 = vmatpush3.bf16.msra.mxu0 %v1082_v14 }
 0x284   :  { %4213 = vmatmul.mubr.bf16.vlgmr.msra.gmra.mrb[32].mxu0 %v5493_v17 }
 0x285   :  { %4216 = vmatprep.mubr.bf16.mxu0 %v5495_v19 }
 0x28c   :  { %4217 = vmatmul.mubr.bf16.gmra.mrb[36].mxu0 %v5499_v20 }
 0x28d   :  { %4220 = vmatprep.mubr.bf16.mxu0 %v5501_v21 }
 0x294   :  { %4221 = vmatmul.mubr.bf16.gmra.mrb[40].mxu0 %v5505_v22 }
 0x295   :  { %4224 = vmatprep.mubr.bf16.mxu0 %v5507_v23 }
 0x29c   :  { %4225 = vmatmul.mubr.bf16.gmra.mrb[44].mxu0 %v5511_v26 }
 0x29d   :  { %4276 = vmatprep.mubr.bf16.mxu0 %v5490_v55 }
 0x31c   :  { %v4150_v27 = vpop.f32.mrb[16].mxu0 }
 0x31d   :  { %v716_v29 = vpop.f32.mrb[17].mxu0  ;;  %v725_v53 = vadd.f32 %v4150_v27, %v5534_v51 }
 0x31e   :  { %v4151_v30 = vpop.f32.mrb[18].mxu0  ;;  %v717_v59 = vadd.f32 %v5534_v51, %v716_v29 }
 0x31f   :  { %v719_v31 = vpop.f32.mrb[19].mxu0  ;;  %v728_v54 = vadd.f32 %v4151_v30, %v5534_v51  ;;  %v781_v62 = vmul.f32 0.6666667, %v725_v53 }
 0x320   :  { %v720_v60 = vadd.f32 %v5534_v51, %v719_v31  ;;  %v779_v3 = vmul.f32 0.6666667, %v717_v59  ;;  %v849_v59 = vpop.permute.xlu0 %848 }
 0x321   :  { %v782_v63 = vmul.f32 0.6666667, %v728_v54  ;;  %v5549_v9 = vadd.f32 %v884_v52, %v781_v62 }
 0x322   :  { %v780_v5 = vmul.f32 0.6666667, %v720_v60  ;;  %v5555_v15 = vadd.f32 %v882_v1, %v779_v3  ;;  %v887_v60 = vmul.f32 %v5541_v57, %v824_v49 }
 0x323   :  { %v5551_v11 = vadd.f32 %v885_v0, %v782_v63  ;;  %v854_v63 = vpop.permute.xlu1 %853 }
 0x324   :  { %v4154_v33 = vpop.f32.mrb[20].mxu0  ;;  %v5557_v16 = vadd.f32 %v883_v4, %v780_v5 }
 0x325   :  { %v732_v32 = vpop.f32.mrb[21].mxu0  ;;  %v741_v12 = vadd.f32 %v4154_v33, %v5534_v51  ;;  %v888_v33 = vmul.f32 %v5541_v57, %v829_v56 }
 0x326   :  { %v4155_v35 = vpop.f32.mrb[22].mxu0  ;;  %v733_v27 = vadd.f32 %v5534_v51, %v732_v32  ;;  %v889_v32 = vmul.f32 %v5541_v57, %v834_v61 }
 0x327   :  { %v735_v36 = vpop.f32.mrb[23].mxu0  ;;  %v744_v13 = vadd.f32 %v4155_v35, %v5534_v51  ;;  %v785_v53 = vmul.f32 0.6666667, %v741_v12 }
 0x328   :  { %v736_v29 = vadd.f32 %v5534_v51, %v735_v36  ;;  %v783_v52 = vmul.f32 0.6666667, %v733_v27 }
 0x329   :  { %v786_v54 = vmul.f32 0.6666667, %v744_v13  ;;  %v5569_v48 = vadd.f32 %v888_v33, %v785_v53 }
 0x32a   :  { %v784_v62 = vmul.f32 0.6666667, %v736_v29  ;;  %v5577_v5 = vadd.f32 %v886_v46, %v783_v52  ;;  %v890_v29 = vmul.f32 %v5541_v57, %v839_v6  ;;  %v893_v46 = vmul.f32 %v5541_v57, %v854_v63 }
 0x32b   :  { %v5571_v56 = vadd.f32 %v889_v32, %v786_v54 }
 0x32c   :  { %v5515_v25 = vpop.f32.mrb[24].mxu0  ;;  %v5579_v49 = vadd.f32 %v887_v60, %v784_v62 }
 0x32d   :  { %v5517_v37 = vpop.f32.mrb[25].mxu0  ;;  %v757_v3 = vadd.f32 %v5515_v25, %v5534_v51 }
 0x32e   :  { %v5519_v38 = vpop.f32.mrb[26].mxu0 }
 0x32f   :  { %v5521_v39 = vpop.f32.mrb[27].mxu0  ;;  %v760_v61 = vadd.f32 %v5519_v38, %v5534_v51 }
 0x330   :  { %v752_v12 = vadd.f32 %v5534_v51, %v5521_v39 }
 0x332   :  { %v788_v53 = vmul.f32 0.6666667, %v752_v12 }
 0x334   :  { %v5523_v40 = vpop.f32.mrb[28].mxu0 }
 0x335   :  { %v5525_v41 = vpop.f32.mrb[29].mxu0 }
 0x336   :  { %v5527_v42 = vpop.f32.mrb[30].mxu0 }
 0x337   :  { %v5529_v43 = vpop.f32.mrb[31].mxu0 }
 0x357   :  { %v4214_v8 = vpop.f32.mrb[32].mxu0 }
 0x358   :  { %v1165_v14 = vpop.f32.mrb[33].mxu0  ;;  %v1174_v31 = vadd.f32 %v4214_v8, %v5549_v9  ;;  %v749_v8 = vadd.f32 %v5534_v51, %v5517_v37 }
 0x359   :  { %v4215_v30 = vpop.f32.mrb[34].mxu0  ;;  %v1166_v35 = vadd.f32 %v1165_v14, %v5555_v15  ;;  %v859_v14 = vpop.permute.xlu0 %858 }
 0x35a   :  { %v1177_v44 = vadd.f32 %v4215_v30, %v5551_v11  ;;  %v1168_v45 = vpop.f32.mrb[35].mxu0  ;;  %v892_v30 = vmul.f32 %v5541_v57, %v849_v59 }
 0x35b   :  { %v1169_v47 = vadd.f32 %v1168_v45, %v5557_v16  ;;  %v790_v45 = vmul.f32 0.6666667, %v760_v61 }
 0x35c   :  { %v1229_v36 = vpack.c.bf16 %v1177_v44, %v1174_v31  ;;  %v864_v31 = vpop.permute.xlu1 %863  ;;  %v789_v44 = vmul.f32 0.6666667, %v757_v3 }
 0x35d   :  { %v1228_v0 = vpack.c.bf16 %v1169_v47, %v1166_v35  ;;  %v891_v35 = vmul.f32 %v5541_v57, %v844_v7  ;;  %v787_v47 = vmul.f32 0.6666667, %v749_v8  ;;  %v5599_v59 = vadd.f32 %v893_v46, %v790_v45  ;;  %v869_v60 = vpop.permute.xlu0 %868 }
 0x35e   :  { %v5597_v32 = vadd.f32 %v892_v30, %v789_v44  ;;  %v776_v7 = vadd.f32 %v5527_v42, %v5534_v51  ;;  %v894_v8 = vmul.f32 %v5541_v57, %v859_v14  ;;  %v896_v12 = vmul.f32 %v5541_v57, %v869_v60 }
 0x35f   :  { %v4218_v1 = vpop.f32.mrb[36].mxu0  ;;  %4244 = vmatprep.mubr.bf16.mxu1 %v1228_v0  ;;  %v5605_v62 = vadd.f32 %v890_v29, %v787_v47  ;;  %v5607_v63 = vadd.f32 %v891_v35, %v788_v53  ;;  %v765_v0 = vadd.f32 %v5534_v51, %v5525_v41 }
 0x360   :  { %v1181_v4 = vpop.f32.mrb[37].mxu0  ;;  %4245 = vmatmul.mubr.bf16.vlgmr.msra.gmra.mrb[32].mxu1 %v1229_v36  ;;  %v1190_v25 = vadd.f32 %v4218_v1, %v5569_v48  ;;  %v773_v36 = vadd.f32 %v5523_v40, %v5534_v51  ;;  %v768_v1 = vadd.f32 %v5534_v51, %v5529_v43  ;;  %v874_v3 = vpop.permute.xlu1 %873  ;;  %v794_v51 = vmul.f32 0.6666667, %v776_v7 }
 0x361   :  { %v4219_v13 = vpop.f32.mrb[38].mxu0  ;;  %4293 = vmatpush3.bf16.msra.mxu1 %v5359_v24  ;;  %v1182_v37 = vadd.f32 %v1181_v4, %v5577_v5  ;;  %v791_v29 = vmul.f32 0.6666667, %v765_v0 }
 0x362   :  { %v1193_v38 = vadd.f32 %v4219_v13, %v5571_v56  ;;  %v1184_v27 = vpop.f32.mrb[39].mxu0  ;;  %4294 = vmatprep.subr.bf16.mxu1 %v5374_v50  ;;  %v793_v43 = vmul.f32 0.6666667, %v773_v36  ;;  %v792_v30 = vmul.f32 0.6666667, %v768_v1 }
 0x363   :  { %v1185_v39 = vadd.f32 %v1184_v27, %v5579_v49  ;;  %v895_v27 = vmul.f32 %v5541_v57, %v864_v31  ;;  %v5629_v46 = vadd.f32 %v894_v8, %v791_v29 }
 0x364   :  { %v1231_v33 = vpack.c.bf16 %v1193_v38, %v1190_v25  ;;  %v897_v25 = vmul.f32 %v5541_v57, %v874_v3 }
 0x365   :  { %v1230_v54 = vpack.c.bf16 %v1185_v39, %v1182_v37  ;;  %4295 = vmatpush3.bf16.msra.mxu1 %v5374_v50  ;;  %v5625_v39 = vadd.f32 %v896_v12, %v793_v43 }
 0x366   :  { %4296 = vmatprep.subr.bf16.mxu1 %v5381_v58  ;;  %v5627_v44 = vadd.f32 %v897_v25, %v794_v51 }
 0x367   :  { %v4222_v6 = vpop.f32.mrb[40].mxu0  ;;  %4248 = vmatprep.mubr.bf16.mxu1 %v1230_v54 }
 0x368   :  { %v1197_v52 = vpop.f32.mrb[41].mxu0  ;;  %4249 = vmatmul.mubr.bf16.gmra.mrb[36].mxu1 %v1231_v33  ;;  %v1206_v40 = vadd.f32 %v4222_v6, %v5597_v32  ;;  %v5631_v33 = vadd.f32 %v895_v27, %v792_v30 }
 0x369   :  { %v4223_v61 = vpop.f32.mrb[42].mxu0  ;;  %4297 = vmatpush3.bf16.msra.mxu1 %v5381_v58  ;;  %v1198_v41 = vadd.f32 %v1197_v52, %v5605_v62 }
 0x36a   :  { %v1209_v42 = vadd.f32 %v4223_v61, %v5599_v59  ;;  %v1200_v4 = vpop.f32.mrb[43].mxu0  ;;  %4298 = vmatprep.subr.bf16.mxu1 %v5386_v2 }
 0x36b   :  { %v1201_v13 = vadd.f32 %v1200_v4, %v5607_v63 }
 0x36c   :  { %v1233_v38 = vpack.c.bf16 %v1209_v42, %v1206_v40 }
 0x36d   :  { %v1232_v37 = vpack.c.bf16 %v1201_v13, %v1198_v41  ;;  %4299 = vmatpush3.bf16.msra.mxu1 %v5386_v2 }
 0x36e   :  { %4300 = vmatprep.subr.bf16.mxu1 %v5393_v10 }
 0x36f   :  { %v4226_v14 = vpop.f32.mrb[44].mxu0  ;;  %4252 = vmatprep.mubr.bf16.mxu1 %v1232_v37 }
 0x370   :  { %v1213_v45 = vpop.f32.mrb[45].mxu0  ;;  %4253 = vmatmul.mubr.bf16.gmra.mrb[40].mxu1 %v1233_v38  ;;  %v1222_v31 = vadd.f32 %v4226_v14, %v5625_v39 }
 0x371   :  { %v4227_v57 = vpop.f32.mrb[46].mxu0  ;;  %4301 = vmatpush3.bf16.msra.mxu1 %v5393_v10  ;;  %v1214_v53 = vadd.f32 %v1213_v45, %v5629_v46 }
 0x372   :  { %v1225_v35 = vadd.f32 %v4227_v57, %v5627_v44  ;;  %v1216_v47 = vpop.f32.mrb[47].mxu0  ;;  %4302 = vmatprep.subr.bf16.mxu1 %v5398_v18 }
 0x373   :  { %v1217_v54 = vadd.f32 %v1216_v47, %v5631_v33 }
 0x374   :  { %v1235_v6 = vpack.c.bf16 %v1225_v35, %v1222_v31 }
 0x375   :  { %v1234_v36 = vpack.c.bf16 %v1217_v54, %v1214_v53  ;;  %4303 = vmatpush3.bf16.msra.mxu1 %v5398_v18 }
 0x376   :  { %4304 = vmatprep.subr.bf16.mxu1 %v5405_v28 }
 0x377   :  { %4256 = vmatprep.mubr.bf16.mxu1 %v1234_v36 }
 0x378   :  { %4257 = vmatmul.mubr.bf16.gmra.mrb[44].mxu1 %v1235_v6 }
 0x379   :  { %4305 = vmatpush3.bf16.msra.mxu1 %v5405_v28 }
 0x37a   :  { %4306 = vmatprep.subr.bf16.mxu1 %v5409_v34 }
 0x37d   :  { %4307 = vmatpush3.bf16.msra.mxu1 %v5409_v34 }
 0x37e   :  { %4356 = vmatprep.subr.bf16.mxu1 %v5359_v24 }
 0x433   :  { %v4246_v60 = vpop.f32.mrb[32].mxu1 }
 0x434   :  { %v1270_v7 = vpop.f32.mrb[33].mxu1 }
 0x435   :  { %v4247_v52 = vpop.f32.mrb[34].mxu1 }
 0x436   :  { %v1334_v0 = vpack.c.bf16 %v4247_v52, %v4246_v60  ;;  %v1273_v1 = vpop.f32.mrb[35].mxu1 }
 0x437   :  { %v1333_v3 = vpack.c.bf16 %v1273_v1, %v1270_v7  ;;  %v5657_v1 = vld [vmem:[#allocation11] sm:$0xff]  }
 0x439   :  { %4260 = vmatprep.subr.bf16.mxu0 %v1333_v3 }
 0x43a   :  { %4261 = vmatpush3.bf16.msra.mxu0 %v1333_v3 }
 0x43b   :  { %v4250_v61 = vpop.f32.mrb[36].mxu1  ;;  %4262 = vmatprep.subr.bf16.mxu0 %v1334_v0 }
 0x43c   :  { %v1286_v40 = vpop.f32.mrb[37].mxu1 }
 0x43d   :  { %v4251_v42 = vpop.f32.mrb[38].mxu1 }
 0x43e   :  { %v1336_v4 = vpack.c.bf16 %v4251_v42, %v4250_v61  ;;  %v1289_v8 = vpop.f32.mrb[39].mxu1  ;;  %4263 = vmatpush3.bf16.msra.mxu0 %v1334_v0 }
 0x43f   :  { %v1335_v12 = vpack.c.bf16 %v1289_v8, %v1286_v40 }
 0x441   :  { %4264 = vmatprep.subr.bf16.mxu0 %v1335_v12 }
 0x442   :  { %4265 = vmatpush3.bf16.msra.mxu0 %v1335_v12 }
 0x443   :  { %v4254_v41 = vpop.f32.mrb[40].mxu1  ;;  %4266 = vmatprep.subr.bf16.mxu0 %v1336_v4 }
 0x444   :  { %v1302_v24 = vpop.f32.mrb[41].mxu1 }
 0x445   :  { %v4255_v13 = vpop.f32.mrb[42].mxu1 }
 0x446   :  { %v1338_v43 = vpack.c.bf16 %v4255_v13, %v4254_v41  ;;  %v1305_v51 = vpop.f32.mrb[43].mxu1  ;;  %4267 = vmatpush3.bf16.msra.mxu0 %v1336_v4 }
 0x447   :  { %v1337_v25 = vpack.c.bf16 %v1305_v51, %v1302_v24 }
 0x449   :  { %4268 = vmatprep.subr.bf16.mxu0 %v1337_v25 }
 0x44a   :  { %4269 = vmatpush3.bf16.msra.mxu0 %v1337_v25 }
 0x44b   :  { %v4258_v38 = vpop.f32.mrb[44].mxu1  ;;  %4270 = vmatprep.subr.bf16.mxu0 %v1338_v43 }
 0x44c   :  { %v1318_v27 = vpop.f32.mrb[45].mxu1 }
 0x44d   :  { %v4259_v29 = vpop.f32.mrb[46].mxu1 }
 0x44e   :  { %v1340_v30 = vpack.c.bf16 %v4259_v29, %v4258_v38  ;;  %v1321_v37 = vpop.f32.mrb[47].mxu1  ;;  %4271 = vmatpush3.bf16.msra.mxu0 %v1338_v43 }
 0x44f   :  { %v1339_v14 = vpack.c.bf16 %v1321_v37, %v1318_v27 }
 0x451   :  { %4272 = vmatprep.subr.bf16.mxu0 %v1339_v14 }
 0x452   :  { %4273 = vmatpush3.bf16.msra.mxu0 %v1339_v14 }
 0x453   :  { %4274 = vmatprep.subr.bf16.mxu0 %v1340_v30 }
 0x456   :  { %4275 = vmatpush3.bf16.msra.mxu0 %v1340_v30 }
 0x459   :  { %4277 = vmatmul.mubr.bf16.vlgmr.msra.gmra.mrb[48].mxu0 %v5493_v17 }
 0x45a   :  { %4280 = vmatprep.mubr.bf16.mxu0 %v5495_v19 }
 0x461   :  { %4281 = vmatmul.mubr.bf16.gmra.mrb[52].mxu0 %v5499_v20 }
 0x462   :  { %4284 = vmatprep.mubr.bf16.mxu0 %v5501_v21 }
 0x469   :  { %4285 = vmatmul.mubr.bf16.gmra.mrb[56].mxu0 %v5505_v22 }
 0x46a   :  { %4288 = vmatprep.mubr.bf16.mxu0 %v5507_v23 }
 0x471   :  { %4289 = vmatmul.mubr.bf16.gmra.mrb[60].mxu0 %v5511_v26 }
 0x472   :  { %4340 = vmatprep.mubr.bf16.mxu0 %v5490_v55 }
 0x52c   :  { %v4278_v45 = vpop.f32.mrb[48].mxu0 }
 0x52d   :  { %v1375_v57 = vpop.f32.mrb[49].mxu0  ;;  %v1384_v35 = vadd.f32 %v4278_v45, %v5549_v9 }
 0x52e   :  { %v4279_v31 = vpop.f32.mrb[50].mxu0  ;;  %v1376_v54 = vadd.f32 %v1375_v57, %v5555_v15 }
 0x52f   :  { %v1387_v47 = vadd.f32 %v4279_v31, %v5551_v11  ;;  %v1378_v53 = vpop.f32.mrb[51].mxu0 }
 0x530   :  { %v1379_v6 = vadd.f32 %v1378_v53, %v5557_v16 }
 0x531   :  { %v1439_v36 = vpack.c.bf16 %v1387_v47, %v1384_v35 }
 0x532   :  { %v1438_v60 = vpack.c.bf16 %v1379_v6, %v1376_v54 }
 0x534   :  { %v4282_v7 = vpop.f32.mrb[52].mxu0  ;;  %4308 = vmatprep.mubr.bf16.mxu1 %v1438_v60 }
 0x535   :  { %v1391_v52 = vpop.f32.mrb[53].mxu0  ;;  %4309 = vmatmul.mubr.bf16.vlgmr.msra.gmra.mrb[48].mxu1 %v1439_v36  ;;  %v1400_v3 = vadd.f32 %v4282_v7, %v5569_v48 }
 0x536   :  { %v4283_v0 = vpop.f32.mrb[54].mxu0  ;;  %4357 = vmatpush3.bf16.msra.mxu1 %v5657_v1  ;;  %v1392_v42 = vadd.f32 %v1391_v52, %v5577_v5 }
 0x537   :  { %v1403_v61 = vadd.f32 %v4283_v0, %v5571_v56  ;;  %v1394_v40 = vpop.f32.mrb[55].mxu0  ;;  %4358 = vmatprep.subr.bf16.mxu1 %v5374_v50 }
 0x538   :  { %v1395_v4 = vadd.f32 %v1394_v40, %v5579_v49 }
 0x539   :  { %v1441_v8 = vpack.c.bf16 %v1403_v61, %v1400_v3 }
 0x53a   :  { %v1440_v12 = vpack.c.bf16 %v1395_v4, %v1392_v42  ;;  %4359 = vmatpush3.bf16.msra.mxu1 %v5374_v50 }
 0x53b   :  { %4360 = vmatprep.subr.bf16.mxu1 %v5381_v58 }
 0x53c   :  { %v4286_v41 = vpop.f32.mrb[56].mxu0  ;;  %4312 = vmatprep.mubr.bf16.mxu1 %v1440_v12 }
 0x53d   :  { %v1407_v24 = vpop.f32.mrb[57].mxu0  ;;  %4313 = vmatmul.mubr.bf16.gmra.mrb[52].mxu1 %v1441_v8  ;;  %v1416_v43 = vadd.f32 %v4286_v41, %v5597_v32 }
 0x53e   :  { %v4287_v13 = vpop.f32.mrb[58].mxu0  ;;  %4361 = vmatpush3.bf16.msra.mxu1 %v5381_v58  ;;  %v1408_v38 = vadd.f32 %v1407_v24, %v5605_v62 }
 0x53f   :  { %v1419_v51 = vadd.f32 %v4287_v13, %v5599_v59  ;;  %v1410_v25 = vpop.f32.mrb[59].mxu0  ;;  %4362 = vmatprep.subr.bf16.mxu1 %v5386_v2 }
 0x540   :  { %v1411_v50 = vadd.f32 %v1410_v25, %v5607_v63 }
 0x541   :  { %v1443_v27 = vpack.c.bf16 %v1419_v51, %v1416_v43 }
 0x542   :  { %v1442_v29 = vpack.c.bf16 %v1411_v50, %v1408_v38  ;;  %4363 = vmatpush3.bf16.msra.mxu1 %v5386_v2 }
 0x543   :  { %4364 = vmatprep.subr.bf16.mxu1 %v5393_v10 }
 0x544   :  { %v4290_v30 = vpop.f32.mrb[60].mxu0  ;;  %4316 = vmatprep.mubr.bf16.mxu1 %v1442_v29 }
 0x545   :  { %v1423_v58 = vpop.f32.mrb[61].mxu0  ;;  %4317 = vmatmul.mubr.bf16.gmra.mrb[56].mxu1 %v1443_v27  ;;  %v1432_v14 = vadd.f32 %v4290_v30, %v5625_v39 }
 0x546   :  { %v4291_v37 = vpop.f32.mrb[62].mxu0  ;;  %4365 = vmatpush3.bf16.msra.mxu1 %v5393_v10  ;;  %v1424_v31 = vadd.f32 %v1423_v58, %v5629_v46 }
 0x547   :  { %v1435_v45 = vadd.f32 %v4291_v37, %v5627_v44  ;;  %v1426_v57 = vpop.f32.mrb[63].mxu0  ;;  %4366 = vmatprep.subr.bf16.mxu1 %v5398_v18 }
 0x548   :  { %v1427_v2 = vadd.f32 %v1426_v57, %v5631_v33 }
 0x549   :  { %v1445_v35 = vpack.c.bf16 %v1435_v45, %v1432_v14 }
 0x54a   :  { %v1444_v47 = vpack.c.bf16 %v1427_v2, %v1424_v31  ;;  %4367 = vmatpush3.bf16.msra.mxu1 %v5398_v18 }
 0x54b   :  { %4368 = vmatprep.subr.bf16.mxu1 %v5405_v28 }
 0x54c   :  { %4320 = vmatprep.mubr.bf16.mxu1 %v1444_v47 }
 0x54d   :  { %4321 = vmatmul.mubr.bf16.gmra.mrb[60].mxu1 %v1445_v35 }
 0x54e   :  { %4369 = vmatpush3.bf16.msra.mxu1 %v5405_v28 }
 0x54f   :  { %4370 = vmatprep.subr.bf16.mxu1 %v5409_v34 }
 0x552   :  { %4371 = vmatpush3.bf16.msra.mxu1 %v5409_v34 }
 0x553   :  { %4420 = vmatprep.subr.bf16.mxu1 %v5657_v1 }
 0x608   :  { %v4310_v10 = vpop.f32.mrb[48].mxu1 }
 0x609   :  { %v1480_v53 = vpop.f32.mrb[49].mxu1 }
 0x60a   :  { %v4311_v54 = vpop.f32.mrb[50].mxu1 }
 0x60b   :  { %v1544_v6 = vpack.c.bf16 %v4311_v54, %v4310_v10  ;;  %v1483_v36 = vpop.f32.mrb[51].mxu1 }
 0x60c   :  { %v1543_v60 = vpack.c.bf16 %v1483_v36, %v1480_v53  ;;  %v5702_v53 = vld [vmem:[#allocation11 + $0x8] sm:$0xff]  }
 0x60e   :  { %4324 = vmatprep.subr.bf16.mxu0 %v1543_v60 }
 0x60f   :  { %4325 = vmatpush3.bf16.msra.mxu0 %v1543_v60 }
 0x610   :  { %v4314_v18 = vpop.f32.mrb[52].mxu1  ;;  %4326 = vmatprep.subr.bf16.mxu0 %v1544_v6 }
 0x611   :  { %v1496_v7 = vpop.f32.mrb[53].mxu1 }
 0x612   :  { %v4315_v52 = vpop.f32.mrb[54].mxu1 }
 0x613   :  { %v1546_v0 = vpack.c.bf16 %v4315_v52, %v4314_v18  ;;  %v1499_v28 = vpop.f32.mrb[55].mxu1  ;;  %4327 = vmatpush3.bf16.msra.mxu0 %v1544_v6  ;;  %v5708_v18 = vld [vmem:[#allocation11 + $0x10] sm:$0xff]  }
 0x614   :  { %v1545_v3 = vpack.c.bf16 %v1499_v28, %v1496_v7 }
 0x616   :  { %4328 = vmatprep.subr.bf16.mxu0 %v1545_v3 }
 0x617   :  { %4329 = vmatpush3.bf16.msra.mxu0 %v1545_v3 }
 0x618   :  { %v4318_v34 = vpop.f32.mrb[56].mxu1  ;;  %4330 = vmatprep.subr.bf16.mxu0 %v1546_v0 }
 0x619   :  { %v1512_v61 = vpop.f32.mrb[57].mxu1 }
 0x61a   :  { %v4319_v40 = vpop.f32.mrb[58].mxu1 }
 0x61b   :  { %v1548_v42 = vpack.c.bf16 %v4319_v40, %v4318_v34  ;;  %v1515_v4 = vpop.f32.mrb[59].mxu1  ;;  %4331 = vmatpush3.bf16.msra.mxu0 %v1546_v0 }
 0x61c   :  { %v1547_v8 = vpack.c.bf16 %v1515_v4, %v1512_v61  ;;  %v5714_v61 = vld [vmem:[#allocation11 + $0x18] sm:$0xff]  }
 0x61e   :  { %4332 = vmatprep.subr.bf16.mxu0 %v1547_v8 }
 0x61f   :  { %4333 = vmatpush3.bf16.msra.mxu0 %v1547_v8 }
 0x620   :  { %v4322_v12 = vpop.f32.mrb[60].mxu1  ;;  %4334 = vmatprep.subr.bf16.mxu0 %v1548_v42 }
 0x621   :  { %v1528_v41 = vpop.f32.mrb[61].mxu1 }
 0x622   :  { %v4323_v24 = vpop.f32.mrb[62].mxu1 }
 0x623   :  { %v1550_v13 = vpack.c.bf16 %v4323_v24, %v4322_v12  ;;  %v1531_v43 = vpop.f32.mrb[63].mxu1  ;;  %4335 = vmatpush3.bf16.msra.mxu0 %v1548_v42  ;;  %v5720_v12 = vld [vmem:[#allocation11 + $0x20] sm:$0xff]  }
 0x624   :  { %v1549_v51 = vpack.c.bf16 %v1531_v43, %v1528_v41 }
 0x626   :  { %4336 = vmatprep.subr.bf16.mxu0 %v1549_v51 }
 0x627   :  { %4337 = vmatpush3.bf16.msra.mxu0 %v1549_v51 }
 0x628   :  { %4338 = vmatprep.subr.bf16.mxu0 %v1550_v13 }
 0x62b   :  { %4339 = vmatpush3.bf16.msra.mxu0 %v1550_v13 }
 0x62e   :  { %4341 = vmatmul.mubr.bf16.vlgmr.msra.gmra.mrb[64].mxu0 %v5493_v17 }
 0x62f   :  { %4344 = vmatprep.mubr.bf16.mxu0 %v5495_v19 }
 0x636   :  { %4345 = vmatmul.mubr.bf16.gmra.mrb[68].mxu0 %v5499_v20 }
 0x637   :  { %4348 = vmatprep.mubr.bf16.mxu0 %v5501_v21 }
 0x63e   :  { %4349 = vmatmul.mubr.bf16.gmra.mrb[72].mxu0 %v5505_v22 }
 0x63f   :  { %4352 = vmatprep.mubr.bf16.mxu0 %v5507_v23 }
 0x646   :  { %4353 = vmatmul.mubr.bf16.gmra.mrb[76].mxu0 %v5511_v26 }
 0x647   :  { %4404 = vmatprep.mubr.bf16.mxu0 %v5490_v55 }
 0x701   :  { %v4342_v25 = vpop.f32.mrb[64].mxu0 }
 0x702   :  { %v1585_v38 = vpop.f32.mrb[65].mxu0  ;;  %v1594_v27 = vadd.f32 %v4342_v25, %v5549_v9 }
 0x703   :  { %v4343_v50 = vpop.f32.mrb[66].mxu0  ;;  %v1586_v58 = vadd.f32 %v1585_v38, %v5555_v15  ;;  %v5726_v38 = vld [vmem:[#allocation11 + $0x28] sm:$0xff]  }
 0x704   :  { %v1597_v29 = vadd.f32 %v4343_v50, %v5551_v11  ;;  %v1588_v30 = vpop.f32.mrb[67].mxu0 }
 0x705   :  { %v1589_v37 = vadd.f32 %v1588_v30, %v5557_v16 }
 0x706   :  { %v1649_v14 = vpack.c.bf16 %v1597_v29, %v1594_v27 }
 0x707   :  { %v1648_v45 = vpack.c.bf16 %v1589_v37, %v1586_v58  ;;  %v5732_v58 = vld [vmem:[#allocation11 + $0x30] sm:$0xff]   ;;  %v5736_v37 = vld [vmem:[#allocation11 + $0x38] sm:$0xff]  }
 0x709   :  { %v4346_v57 = vpop.f32.mrb[68].mxu0  ;;  %4372 = vmatprep.mubr.bf16.mxu1 %v1648_v45 }
 0x70a   :  { %v1601_v31 = vpop.f32.mrb[69].mxu0  ;;  %4373 = vmatmul.mubr.bf16.vlgmr.msra.gmra.mrb[64].mxu1 %v1649_v14  ;;  %v1610_v35 = vadd.f32 %v4346_v57, %v5569_v48 }
 0x70b   :  { %v4347_v2 = vpop.f32.mrb[70].mxu0  ;;  %4421 = vmatpush3.bf16.msra.mxu1 %v5657_v1  ;;  %v1602_v54 = vadd.f32 %v1601_v31, %v5577_v5 }
 0x70c   :  { %v1613_v47 = vadd.f32 %v4347_v2, %v5571_v56  ;;  %v1604_v10 = vpop.f32.mrb[71].mxu0  ;;  %4422 = vmatprep.subr.bf16.mxu1 %v5702_v53 }
 0x70d   :  { %v1605_v6 = vadd.f32 %v1604_v10, %v5579_v49 }
 0x70e   :  { %v1651_v36 = vpack.c.bf16 %v1613_v47, %v1610_v35 }
 0x70f   :  { %v1650_v60 = vpack.c.bf16 %v1605_v6, %v1602_v54  ;;  %4423 = vmatpush3.bf16.msra.mxu1 %v5702_v53 }
 0x710   :  { %4424 = vmatprep.subr.bf16.mxu1 %v5708_v18 }
 0x711   :  { %v4350_v7 = vpop.f32.mrb[72].mxu0  ;;  %4376 = vmatprep.mubr.bf16.mxu1 %v1650_v60 }
 0x712   :  { %v1617_v52 = vpop.f32.mrb[73].mxu0  ;;  %4377 = vmatmul.mubr.bf16.gmra.mrb[68].mxu1 %v1651_v36  ;;  %v1626_v28 = vadd.f32 %v4350_v7, %v5597_v32 }
 0x713   :  { %v4351_v0 = vpop.f32.mrb[74].mxu0  ;;  %4425 = vmatpush3.bf16.msra.mxu1 %v5708_v18  ;;  %v1618_v40 = vadd.f32 %v1617_v52, %v5605_v62 }
 0x714   :  { %v1629_v3 = vadd.f32 %v4351_v0, %v5599_v59  ;;  %v1620_v34 = vpop.f32.mrb[75].mxu0  ;;  %4426 = vmatprep.subr.bf16.mxu1 %v5714_v61 }
 0x715   :  { %v1621_v42 = vadd.f32 %v1620_v34, %v5607_v63 }
 0x716   :  { %v1653_v4 = vpack.c.bf16 %v1629_v3, %v1626_v28 }
 0x717   :  { %v1652_v8 = vpack.c.bf16 %v1621_v42, %v1618_v40  ;;  %4427 = vmatpush3.bf16.msra.mxu1 %v5714_v61 }
 0x718   :  { %4428 = vmatprep.subr.bf16.mxu1 %v5720_v12 }
 0x719   :  { %v4354_v41 = vpop.f32.mrb[76].mxu0  ;;  %4380 = vmatprep.mubr.bf16.mxu1 %v1652_v8 }
 0x71a   :  { %v1633_v24 = vpop.f32.mrb[77].mxu0  ;;  %4381 = vmatmul.mubr.bf16.gmra.mrb[72].mxu1 %v1653_v4  ;;  %v1642_v43 = vadd.f32 %v4354_v41, %v5625_v39 }
 0x71b   :  { %v4355_v13 = vpop.f32.mrb[78].mxu0  ;;  %4429 = vmatpush3.bf16.msra.mxu1 %v5720_v12  ;;  %v1634_v50 = vadd.f32 %v1633_v24, %v5629_v46 }
 0x71c   :  { %v1645_v51 = vadd.f32 %v4355_v13, %v5627_v44  ;;  %v1636_v25 = vpop.f32.mrb[79].mxu0  ;;  %4430 = vmatprep.subr.bf16.mxu1 %v5726_v38 }
 0x71d   :  { %v1637_v27 = vadd.f32 %v1636_v25, %v5631_v33 }
 0x71e   :  { %v1655_v29 = vpack.c.bf16 %v1645_v51, %v1642_v43 }
 0x71f   :  { %v1654_v30 = vpack.c.bf16 %v1637_v27, %v1634_v50  ;;  %4431 = vmatpush3.bf16.msra.mxu1 %v5726_v38 }
 0x720   :  { %4432 = vmatprep.subr.bf16.mxu1 %v5732_v58 }
 0x721   :  { %4384 = vmatprep.mubr.bf16.mxu1 %v1654_v30 }
 0x722   :  { %4385 = vmatmul.mubr.bf16.gmra.mrb[76].mxu1 %v1655_v29 }
 0x723   :  { %4433 = vmatpush3.bf16.msra.mxu1 %v5732_v58 }
 0x724   :  { %4434 = vmatprep.subr.bf16.mxu1 %v5736_v37 }
 0x727   :  { %4435 = vmatpush3.bf16.msra.mxu1 %v5736_v37 }
 0x728   :  { %4484 = vmatprep.subr.bf16.mxu1 %v5657_v1 }
 0x7dd   :  { %v4374_v14 = vpop.f32.mrb[64].mxu1 }
 0x7de   :  { %v1690_v45 = vpop.f32.mrb[65].mxu1 }
 0x7df   :  { %v4375_v57 = vpop.f32.mrb[66].mxu1 }
 0x7e0   :  { %v1754_v31 = vpack.c.bf16 %v4375_v57, %v4374_v14  ;;  %v1693_v2 = vpop.f32.mrb[67].mxu1 }
 0x7e1   :  { %v1753_v35 = vpack.c.bf16 %v1693_v2, %v1690_v45 }
 0x7e3   :  { %4388 = vmatprep.subr.bf16.mxu0 %v1753_v35 }
 0x7e4   :  { %4389 = vmatpush3.bf16.msra.mxu0 %v1753_v35 }
 0x7e5   :  { %v4378_v47 = vpop.f32.mrb[68].mxu1  ;;  %4390 = vmatprep.subr.bf16.mxu0 %v1754_v31 }
 0x7e6   :  { %v1706_v10 = vpop.f32.mrb[69].mxu1 }
 0x7e7   :  { %v4379_v54 = vpop.f32.mrb[70].mxu1 }
 0x7e8   :  { %v1756_v6 = vpack.c.bf16 %v4379_v54, %v4378_v47  ;;  %v1709_v36 = vpop.f32.mrb[71].mxu1  ;;  %4391 = vmatpush3.bf16.msra.mxu0 %v1754_v31 }
 0x7e9   :  { %v1755_v60 = vpack.c.bf16 %v1709_v36, %v1706_v10 }
 0x7eb   :  { %4392 = vmatprep.subr.bf16.mxu0 %v1755_v60 }
 0x7ec   :  { %4393 = vmatpush3.bf16.msra.mxu0 %v1755_v60 }
 0x7ed   :  { %v4382_v7 = vpop.f32.mrb[72].mxu1  ;;  %4394 = vmatprep.subr.bf16.mxu0 %v1756_v6 }
 0x7ee   :  { %v1722_v52 = vpop.f32.mrb[73].mxu1 }
 0x7ef   :  { %v4383_v0 = vpop.f32.mrb[74].mxu1 }
 0x7f0   :  { %v1758_v28 = vpack.c.bf16 %v4383_v0, %v4382_v7  ;;  %v1725_v3 = vpop.f32.mrb[75].mxu1  ;;  %4395 = vmatpush3.bf16.msra.mxu0 %v1756_v6 }
 0x7f1   :  { %v1757_v34 = vpack.c.bf16 %v1725_v3, %v1722_v52 }
 0x7f3   :  { %4396 = vmatprep.subr.bf16.mxu0 %v1757_v34 }
 0x7f4   :  { %4397 = vmatpush3.bf16.msra.mxu0 %v1757_v34 }
 0x7f5   :  { %v4386_v40 = vpop.f32.mrb[76].mxu1  ;;  %4398 = vmatprep.subr.bf16.mxu0 %v1758_v28 }
 0x7f6   :  { %v1738_v42 = vpop.f32.mrb[77].mxu1 }
 0x7f7   :  { %v4387_v4 = vpop.f32.mrb[78].mxu1 }
 0x7f8   :  { %v1760_v8 = vpack.c.bf16 %v4387_v4, %v4386_v40  ;;  %v1741_v41 = vpop.f32.mrb[79].mxu1  ;;  %4399 = vmatpush3.bf16.msra.mxu0 %v1758_v28 }
 0x7f9   :  { %v1759_v24 = vpack.c.bf16 %v1741_v41, %v1738_v42 }
 0x7fb   :  { %4400 = vmatprep.subr.bf16.mxu0 %v1759_v24 }
 0x7fc   :  { %4401 = vmatpush3.bf16.msra.mxu0 %v1759_v24 }
 0x7fd   :  { %4402 = vmatprep.subr.bf16.mxu0 %v1760_v8 }
 0x800   :  { %4403 = vmatpush3.bf16.msra.mxu0 %v1760_v8 }
 0x803   :  { %4405 = vmatmul.mubr.bf16.vlgmr.msra.gmra.mrb[80].mxu0 %v5493_v17 }
 0x804   :  { %4408 = vmatprep.mubr.bf16.mxu0 %v5495_v19 }
 0x80b   :  { %4409 = vmatmul.mubr.bf16.gmra.mrb[84].mxu0 %v5499_v20 }
 0x80c   :  { %4412 = vmatprep.mubr.bf16.mxu0 %v5501_v21 }
 0x813   :  { %4413 = vmatmul.mubr.bf16.gmra.mrb[88].mxu0 %v5505_v22 }
 0x814   :  { %4416 = vmatprep.mubr.bf16.mxu0 %v5507_v23 }
 0x81b   :  { %4417 = vmatmul.mubr.bf16.gmra.mrb[92].mxu0 %v5511_v26 }
 0x81c   :  { %4468 = vmatprep.mubr.bf16.mxu0 %v5490_v55 }
 0x8d6   :  { %v4406_v13 = vpop.f32.mrb[80].mxu0 }
 0x8d7   :  { %v1795_v43 = vpop.f32.mrb[81].mxu0  ;;  %v1804_v25 = vadd.f32 %v4406_v13, %v5549_v9 }
 0x8d8   :  { %v4407_v51 = vpop.f32.mrb[82].mxu0  ;;  %v1796_v20 = vadd.f32 %v1795_v43, %v5555_v15 }
 0x8d9   :  { %v1807_v17 = vadd.f32 %v4407_v51, %v5551_v11  ;;  %v1798_v19 = vpop.f32.mrb[83].mxu0 }
 0x8da   :  { %v1799_v21 = vadd.f32 %v1798_v19, %v5557_v16 }
 0x8db   :  { %v1859_v50 = vpack.c.bf16 %v1807_v17, %v1804_v25 }
 0x8dc   :  { %v1858_v22 = vpack.c.bf16 %v1799_v21, %v1796_v20 }
 0x8de   :  { %v4410_v27 = vpop.f32.mrb[84].mxu0  ;;  %4436 = vmatprep.mubr.bf16.mxu1 %v1858_v22 }
 0x8df   :  { %v1811_v23 = vpop.f32.mrb[85].mxu0  ;;  %4437 = vmatmul.mubr.bf16.vlgmr.msra.gmra.mrb[80].mxu1 %v1859_v50  ;;  %v1820_v55 = vadd.f32 %v4410_v27, %v5569_v48 }
 0x8e0   :  { %v4411_v26 = vpop.f32.mrb[86].mxu0  ;;  %4485 = vmatpush3.bf16.msra.mxu1 %v5657_v1  ;;  %v1812_v14 = vadd.f32 %v1811_v23, %v5577_v5 }
 0x8e1   :  { %v1823_v29 = vadd.f32 %v4411_v26, %v5571_v56  ;;  %v1814_v30 = vpop.f32.mrb[87].mxu0  ;;  %4486 = vmatprep.subr.bf16.mxu1 %v5702_v53 }
 0x8e2   :  { %v1815_v45 = vadd.f32 %v1814_v30, %v5579_v49 }
 0x8e3   :  { %v1861_v57 = vpack.c.bf16 %v1823_v29, %v1820_v55 }
 0x8e4   :  { %v1860_v31 = vpack.c.bf16 %v1815_v45, %v1812_v14  ;;  %4487 = vmatpush3.bf16.msra.mxu1 %v5702_v53 }
 0x8e5   :  { %4488 = vmatprep.subr.bf16.mxu1 %v5708_v18 }
 0x8e6   :  { %v4414_v2 = vpop.f32.mrb[88].mxu0  ;;  %4440 = vmatprep.mubr.bf16.mxu1 %v1860_v31 }
 0x8e7   :  { %v1827_v35 = vpop.f32.mrb[89].mxu0  ;;  %4441 = vmatmul.mubr.bf16.gmra.mrb[84].mxu1 %v1861_v57  ;;  %v1836_v10 = vadd.f32 %v4414_v2, %v5597_v32 }
 0x8e8   :  { %v4415_v47 = vpop.f32.mrb[90].mxu0  ;;  %4489 = vmatpush3.bf16.msra.mxu1 %v5708_v18  ;;  %v1828_v36 = vadd.f32 %v1827_v35, %v5605_v62 }
 0x8e9   :  { %v1839_v54 = vadd.f32 %v4415_v47, %v5599_v59  ;;  %v1830_v6 = vpop.f32.mrb[91].mxu0  ;;  %4490 = vmatprep.subr.bf16.mxu1 %v5714_v61 }
 0x8ea   :  { %v1831_v60 = vadd.f32 %v1830_v6, %v5607_v63  ;;  %v5784_v6 = vld [vmem:[#allocation5 + $0x10] sm:$0xff]  }
 0x8eb   :  { %v1863_v7 = vpack.c.bf16 %v1839_v54, %v1836_v10  ;;  %v5781_v54 = vld [vmem:[#allocation5 + $0x8] sm:$0xff]  }
 0x8ec   :  { %v1862_v52 = vpack.c.bf16 %v1831_v60, %v1828_v36  ;;  %4491 = vmatpush3.bf16.msra.mxu1 %v5714_v61  ;;  %v5787_v36 = vld [vmem:[#allocation5 + $0x18] sm:$0xff]   ;;  %v5790_v60 = vld [vmem:[#allocation5 + $0x20] sm:$0xff]  }
 0x8ed   :  { %4492 = vmatprep.subr.bf16.mxu1 %v5720_v12 }
 0x8ee   :  { %v4418_v0 = vpop.f32.mrb[92].mxu0  ;;  %4444 = vmatprep.mubr.bf16.mxu1 %v1862_v52  ;;  %v5796_v52 = vld [vmem:[#allocation5 + $0x30] sm:$0xff]  }
 0x8ef   :  { %v1843_v28 = vpop.f32.mrb[93].mxu0  ;;  %4445 = vmatmul.mubr.bf16.gmra.mrb[88].mxu1 %v1863_v7  ;;  %v1852_v34 = vadd.f32 %v4418_v0, %v5625_v39  ;;  %v5793_v7 = vld [vmem:[#allocation5 + $0x28] sm:$0xff]   ;;  %v5799_v0 = vld [vmem:[#allocation5 + $0x38] sm:$0xff]  }
 0x8f0   :  { %v4419_v3 = vpop.f32.mrb[94].mxu0  ;;  %4493 = vmatpush3.bf16.msra.mxu1 %v5720_v12  ;;  %v1844_v4 = vadd.f32 %v1843_v28, %v5629_v46  ;;  %v5802_v28 = vld [vmem:[#allocation5] sm:$0xff]  }
 0x8f1   :  { %v1855_v40 = vadd.f32 %v4419_v3, %v5627_v44  ;;  %v1846_v42 = vpop.f32.mrb[95].mxu0  ;;  %4494 = vmatprep.subr.bf16.mxu1 %v5726_v38 }
 0x8f2   :  { %v1847_v8 = vadd.f32 %v1846_v42, %v5631_v33 }
 0x8f3   :  { %v1865_v41 = vpack.c.bf16 %v1855_v40, %v1852_v34 }
 0x8f4   :  { %v1864_v24 = vpack.c.bf16 %v1847_v8, %v1844_v4  ;;  %4495 = vmatpush3.bf16.msra.mxu1 %v5726_v38 }
 0x8f5   :  { %4496 = vmatprep.subr.bf16.mxu1 %v5732_v58 }
 0x8f6   :  { %4448 = vmatprep.mubr.bf16.mxu1 %v1864_v24 }
 0x8f7   :  { %4449 = vmatmul.mubr.bf16.gmra.mrb[92].mxu1 %v1865_v41 }
 0x8f8   :  { %4497 = vmatpush3.bf16.msra.mxu1 %v5732_v58 }
 0x8f9   :  { %4498 = vmatprep.subr.bf16.mxu1 %v5736_v37 }
 0x8fc   :  { %4499 = vmatpush3.bf16.msra.mxu1 %v5736_v37 }
 0x8fd   :  { %4548 = vmatprep.subr.bf16.mxu1 %v5657_v1 }
 0x9b2   :  { %v4438_v13 = vpop.f32.mrb[80].mxu1 }
 0x9b3   :  { %v1900_v43 = vpop.f32.mrb[81].mxu1 }
 0x9b4   :  { %v4439_v51 = vpop.f32.mrb[82].mxu1 }
 0x9b5   :  { %v1964_v25 = vpack.c.bf16 %v4439_v51, %v4438_v13  ;;  %v1903_v17 = vpop.f32.mrb[83].mxu1 }
 0x9b6   :  { %v1963_v19 = vpack.c.bf16 %v1903_v17, %v1900_v43 }
 0x9b8   :  { %4452 = vmatprep.subr.bf16.mxu0 %v1963_v19 }
 0x9b9   :  { %4453 = vmatpush3.bf16.msra.mxu0 %v1963_v19 }
 0x9ba   :  { %v4442_v20 = vpop.f32.mrb[84].mxu1  ;;  %4454 = vmatprep.subr.bf16.mxu0 %v1964_v25 }
 0x9bb   :  { %v1916_v21 = vpop.f32.mrb[85].mxu1 }
 0x9bc   :  { %v4443_v50 = vpop.f32.mrb[86].mxu1 }
 0x9bd   :  { %v1966_v22 = vpack.c.bf16 %v4443_v50, %v4442_v20  ;;  %v1919_v27 = vpop.f32.mrb[87].mxu1  ;;  %4455 = vmatpush3.bf16.msra.mxu0 %v1964_v25 }
 0x9be   :  { %v1965_v23 = vpack.c.bf16 %v1919_v27, %v1916_v21 }
 0x9c0   :  { %4456 = vmatprep.subr.bf16.mxu0 %v1965_v23 }
 0x9c1   :  { %4457 = vmatpush3.bf16.msra.mxu0 %v1965_v23 }
 0x9c2   :  { %v4446_v26 = vpop.f32.mrb[88].mxu1  ;;  %4458 = vmatprep.subr.bf16.mxu0 %v1966_v22 }
 0x9c3   :  { %v1932_v55 = vpop.f32.mrb[89].mxu1 }
 0x9c4   :  { %v4447_v29 = vpop.f32.mrb[90].mxu1 }
 0x9c5   :  { %v1968_v30 = vpack.c.bf16 %v4447_v29, %v4446_v26  ;;  %v1935_v14 = vpop.f32.mrb[91].mxu1  ;;  %4459 = vmatpush3.bf16.msra.mxu0 %v1966_v22 }
 0x9c6   :  { %v1967_v45 = vpack.c.bf16 %v1935_v14, %v1932_v55 }
 0x9c8   :  { %4460 = vmatprep.subr.bf16.mxu0 %v1967_v45 }
 0x9c9   :  { %4461 = vmatpush3.bf16.msra.mxu0 %v1967_v45 }
 0x9ca   :  { %v4450_v57 = vpop.f32.mrb[92].mxu1  ;;  %4462 = vmatprep.subr.bf16.mxu0 %v1968_v30 }
 0x9cb   :  { %v1948_v31 = vpop.f32.mrb[93].mxu1 }
 0x9cc   :  { %v4451_v2 = vpop.f32.mrb[94].mxu1 }
 0x9cd   :  { %v1970_v35 = vpack.c.bf16 %v4451_v2, %v4450_v57  ;;  %v1951_v47 = vpop.f32.mrb[95].mxu1  ;;  %4463 = vmatpush3.bf16.msra.mxu0 %v1968_v30 }
 0x9ce   :  { %v1969_v10 = vpack.c.bf16 %v1951_v47, %v1948_v31 }
 0x9d0   :  { %4464 = vmatprep.subr.bf16.mxu0 %v1969_v10 }
 0x9d1   :  { %4465 = vmatpush3.bf16.msra.mxu0 %v1969_v10 }
 0x9d2   :  { %4466 = vmatprep.subr.bf16.mxu0 %v1970_v35 }
 0x9d5   :  { %4467 = vmatpush3.bf16.msra.mxu0 %v1970_v35 }
 0x9d8   :  { %4469 = vmatmul.mubr.bf16.vlgmr.msra.gmra.mrb[96].mxu0 %v5781_v54 }
 0x9d9   :  { %4472 = vmatprep.mubr.bf16.mxu0 %v5784_v6 }
 0x9e0   :  { %4473 = vmatmul.mubr.bf16.gmra.mrb[100].mxu0 %v5787_v36 }
 0x9e1   :  { %4476 = vmatprep.mubr.bf16.mxu0 %v5790_v60 }
 0x9e8   :  { %4477 = vmatmul.mubr.bf16.gmra.mrb[104].mxu0 %v5793_v7 }
 0x9e9   :  { %4480 = vmatprep.mubr.bf16.mxu0 %v5796_v52 }
 0x9f0   :  { %4481 = vmatmul.mubr.bf16.gmra.mrb[108].mxu0 %v5799_v0 }
 0x9f1   :  { %4532 = vmatprep.mubr.bf16.mxu0 %v5802_v28 }
 0xaab   :  { %v4470_v3 = vpop.f32.mrb[96].mxu0 }
 0xaac   :  { %v2005_v34 = vpop.f32.mrb[97].mxu0  ;;  %v2014_v42 = vadd.f32 %v4470_v3, %v5549_v9 }
 0xaad   :  { %v4471_v40 = vpop.f32.mrb[98].mxu0  ;;  %v2006_v41 = vadd.f32 %v2005_v34, %v5555_v15 }
 0xaae   :  { %v2017_v4 = vadd.f32 %v4471_v40, %v5551_v11  ;;  %v2008_v8 = vpop.f32.mrb[99].mxu0 }
 0xaaf   :  { %v2009_v24 = vadd.f32 %v2008_v8, %v5557_v16 }
 0xab0   :  { %v2069_v13 = vpack.c.bf16 %v2017_v4, %v2014_v42 }
 0xab1   :  { %v2068_v43 = vpack.c.bf16 %v2009_v24, %v2006_v41 }
 0xab3   :  { %v4474_v51 = vpop.f32.mrb[100].mxu0  ;;  %4500 = vmatprep.mubr.bf16.mxu1 %v2068_v43 }
 0xab4   :  { %v2021_v25 = vpop.f32.mrb[101].mxu0  ;;  %4501 = vmatmul.mubr.bf16.vlgmr.msra.gmra.mrb[96].mxu1 %v2069_v13  ;;  %v2030_v19 = vadd.f32 %v4474_v51, %v5569_v48 }
 0xab5   :  { %v4475_v17 = vpop.f32.mrb[102].mxu0  ;;  %4549 = vmatpush3.bf16.msra.mxu1 %v5657_v1  ;;  %v2022_v50 = vadd.f32 %v2021_v25, %v5577_v5 }
 0xab6   :  { %v2033_v20 = vadd.f32 %v4475_v17, %v5571_v56  ;;  %v2024_v21 = vpop.f32.mrb[103].mxu0  ;;  %4550 = vmatprep.subr.bf16.mxu1 %v5702_v53 }
 0xab7   :  { %v2025_v22 = vadd.f32 %v2024_v21, %v5579_v49 }
 0xab8   :  { %v2071_v27 = vpack.c.bf16 %v2033_v20, %v2030_v19 }
 0xab9   :  { %v2070_v23 = vpack.c.bf16 %v2025_v22, %v2022_v50  ;;  %4551 = vmatpush3.bf16.msra.mxu1 %v5702_v53 }
 0xaba   :  { %4552 = vmatprep.subr.bf16.mxu1 %v5708_v18 }
 0xabb   :  { %v4478_v26 = vpop.f32.mrb[104].mxu0  ;;  %4504 = vmatprep.mubr.bf16.mxu1 %v2070_v23 }
 0xabc   :  { %v2037_v55 = vpop.f32.mrb[105].mxu0  ;;  %4505 = vmatmul.mubr.bf16.gmra.mrb[100].mxu1 %v2071_v27  ;;  %v2046_v30 = vadd.f32 %v4478_v26, %v5597_v32 }
 0xabd   :  { %v4479_v29 = vpop.f32.mrb[106].mxu0  ;;  %4553 = vmatpush3.bf16.msra.mxu1 %v5708_v18  ;;  %v2038_v57 = vadd.f32 %v2037_v55, %v5605_v62 }
 0xabe   :  { %v2049_v14 = vadd.f32 %v4479_v29, %v5599_v59  ;;  %v2040_v45 = vpop.f32.mrb[107].mxu0  ;;  %4554 = vmatprep.subr.bf16.mxu1 %v5714_v61 }
 0xabf   :  { %v2041_v31 = vadd.f32 %v2040_v45, %v5607_v63 }
 0xac0   :  { %v2073_v2 = vpack.c.bf16 %v2049_v14, %v2046_v30 }
 0xac1   :  { %v2072_v35 = vpack.c.bf16 %v2041_v31, %v2038_v57  ;;  %4555 = vmatpush3.bf16.msra.mxu1 %v5714_v61 }
 0xac2   :  { %4556 = vmatprep.subr.bf16.mxu1 %v5720_v12 }
 0xac3   :  { %v4482_v47 = vpop.f32.mrb[108].mxu0  ;;  %4508 = vmatprep.mubr.bf16.mxu1 %v2072_v35 }
 0xac4   :  { %v2053_v10 = vpop.f32.mrb[109].mxu0  ;;  %4509 = vmatmul.mubr.bf16.gmra.mrb[104].mxu1 %v2073_v2  ;;  %v2062_v34 = vadd.f32 %v4482_v47, %v5625_v39 }
 0xac5   :  { %v4483_v3 = vpop.f32.mrb[110].mxu0  ;;  %4557 = vmatpush3.bf16.msra.mxu1 %v5720_v12  ;;  %v2054_v4 = vadd.f32 %v2053_v10, %v5629_v46 }
 0xac6   :  { %v2065_v40 = vadd.f32 %v4483_v3, %v5627_v44  ;;  %v2056_v42 = vpop.f32.mrb[111].mxu0  ;;  %4558 = vmatprep.subr.bf16.mxu1 %v5726_v38 }
 0xac7   :  { %v2057_v8 = vadd.f32 %v2056_v42, %v5631_v33 }
 0xac8   :  { %v2075_v41 = vpack.c.bf16 %v2065_v40, %v2062_v34 }
 0xac9   :  { %v2074_v24 = vpack.c.bf16 %v2057_v8, %v2054_v4  ;;  %4559 = vmatpush3.bf16.msra.mxu1 %v5726_v38 }
 0xaca   :  { %4560 = vmatprep.subr.bf16.mxu1 %v5732_v58 }
 0xacb   :  { %4512 = vmatprep.mubr.bf16.mxu1 %v2074_v24 }
 0xacc   :  { %4513 = vmatmul.mubr.bf16.gmra.mrb[108].mxu1 %v2075_v41 }
 0xacd   :  { %4561 = vmatpush3.bf16.msra.mxu1 %v5732_v58 }
 0xace   :  { %4562 = vmatprep.subr.bf16.mxu1 %v5736_v37 }
 0xad1   :  { %4563 = vmatpush3.bf16.msra.mxu1 %v5736_v37 }
 0xad2   :  { %4612 = vmatprep.subr.bf16.mxu1 %v5657_v1 }
 0xb87   :  { %v4502_v13 = vpop.f32.mrb[96].mxu1 }
 0xb88   :  { %v2110_v43 = vpop.f32.mrb[97].mxu1 }
 0xb89   :  { %v4503_v51 = vpop.f32.mrb[98].mxu1 }
 0xb8a   :  { %v2174_v25 = vpack.c.bf16 %v4503_v51, %v4502_v13  ;;  %v2113_v17 = vpop.f32.mrb[99].mxu1 }
 0xb8b   :  { %v2173_v19 = vpack.c.bf16 %v2113_v17, %v2110_v43 }
 0xb8d   :  { %4516 = vmatprep.subr.bf16.mxu0 %v2173_v19 }
 0xb8e   :  { %4517 = vmatpush3.bf16.msra.mxu0 %v2173_v19 }
 0xb8f   :  { %v4506_v20 = vpop.f32.mrb[100].mxu1  ;;  %4518 = vmatprep.subr.bf16.mxu0 %v2174_v25 }
 0xb90   :  { %v2126_v21 = vpop.f32.mrb[101].mxu1 }
 0xb91   :  { %v4507_v50 = vpop.f32.mrb[102].mxu1 }
 0xb92   :  { %v2176_v22 = vpack.c.bf16 %v4507_v50, %v4506_v20  ;;  %v2129_v27 = vpop.f32.mrb[103].mxu1  ;;  %4519 = vmatpush3.bf16.msra.mxu0 %v2174_v25 }
 0xb93   :  { %v2175_v23 = vpack.c.bf16 %v2129_v27, %v2126_v21 }
 0xb95   :  { %4520 = vmatprep.subr.bf16.mxu0 %v2175_v23 }
 0xb96   :  { %4521 = vmatpush3.bf16.msra.mxu0 %v2175_v23 }
 0xb97   :  { %v4510_v26 = vpop.f32.mrb[104].mxu1  ;;  %4522 = vmatprep.subr.bf16.mxu0 %v2176_v22 }
 0xb98   :  { %v2142_v55 = vpop.f32.mrb[105].mxu1 }
 0xb99   :  { %v4511_v29 = vpop.f32.mrb[106].mxu1 }
 0xb9a   :  { %v2178_v30 = vpack.c.bf16 %v4511_v29, %v4510_v26  ;;  %v2145_v14 = vpop.f32.mrb[107].mxu1  ;;  %4523 = vmatpush3.bf16.msra.mxu0 %v2176_v22 }
 0xb9b   :  { %v2177_v45 = vpack.c.bf16 %v2145_v14, %v2142_v55 }
 0xb9d   :  { %4524 = vmatprep.subr.bf16.mxu0 %v2177_v45 }
 0xb9e   :  { %4525 = vmatpush3.bf16.msra.mxu0 %v2177_v45 }
 0xb9f   :  { %v4514_v57 = vpop.f32.mrb[108].mxu1  ;;  %4526 = vmatprep.subr.bf16.mxu0 %v2178_v30 }
 0xba0   :  { %v2158_v31 = vpop.f32.mrb[109].mxu1 }
 0xba1   :  { %v4515_v2 = vpop.f32.mrb[110].mxu1 }
 0xba2   :  { %v2180_v35 = vpack.c.bf16 %v4515_v2, %v4514_v57  ;;  %v2161_v47 = vpop.f32.mrb[111].mxu1  ;;  %4527 = vmatpush3.bf16.msra.mxu0 %v2178_v30 }
 0xba3   :  { %v2179_v10 = vpack.c.bf16 %v2161_v47, %v2158_v31 }
 0xba5   :  { %4528 = vmatprep.subr.bf16.mxu0 %v2179_v10 }
 0xba6   :  { %4529 = vmatpush3.bf16.msra.mxu0 %v2179_v10 }
 0xba7   :  { %4530 = vmatprep.subr.bf16.mxu0 %v2180_v35 }
 0xbaa   :  { %4531 = vmatpush3.bf16.msra.mxu0 %v2180_v35 }
 0xbad   :  { %4533 = vmatmul.mubr.bf16.vlgmr.msra.gmra.mrb[112].mxu0 %v5781_v54 }
 0xbae   :  { %4536 = vmatprep.mubr.bf16.mxu0 %v5784_v6 }
 0xbb5   :  { %4537 = vmatmul.mubr.bf16.gmra.mrb[116].mxu0 %v5787_v36 }
 0xbb6   :  { %4540 = vmatprep.mubr.bf16.mxu0 %v5790_v60 }
 0xbbd   :  { %4541 = vmatmul.mubr.bf16.gmra.mrb[120].mxu0 %v5793_v7 }
 0xbbe   :  { %4544 = vmatprep.mubr.bf16.mxu0 %v5796_v52 }
 0xbc5   :  { %4545 = vmatmul.mubr.bf16.gmra.mrb[124].mxu0 %v5799_v0 }
 0xbc6   :  { %4596 = vmatprep.mubr.bf16.mxu0 %v5802_v28 }
 0xc80   :  { %v4534_v3 = vpop.f32.mrb[112].mxu0 }
 0xc81   :  { %v2215_v34 = vpop.f32.mrb[113].mxu0  ;;  %v2224_v42 = vadd.f32 %v4534_v3, %v5549_v9 }
 0xc82   :  { %v4535_v40 = vpop.f32.mrb[114].mxu0  ;;  %v2216_v41 = vadd.f32 %v2215_v34, %v5555_v15 }
 0xc83   :  { %v2227_v4 = vadd.f32 %v4535_v40, %v5551_v11  ;;  %v2218_v8 = vpop.f32.mrb[115].mxu0 }
 0xc84   :  { %v2219_v24 = vadd.f32 %v2218_v8, %v5557_v16 }
 0xc85   :  { %v2279_v13 = vpack.c.bf16 %v2227_v4, %v2224_v42 }
 0xc86   :  { %v2278_v43 = vpack.c.bf16 %v2219_v24, %v2216_v41 }
 0xc88   :  { %v4538_v51 = vpop.f32.mrb[116].mxu0  ;;  %4564 = vmatprep.mubr.bf16.mxu1 %v2278_v43 }
 0xc89   :  { %v2231_v25 = vpop.f32.mrb[117].mxu0  ;;  %4565 = vmatmul.mubr.bf16.vlgmr.msra.gmra.mrb[112].mxu1 %v2279_v13  ;;  %v2240_v19 = vadd.f32 %v4538_v51, %v5569_v48 }
 0xc8a   :  { %v4539_v17 = vpop.f32.mrb[118].mxu0  ;;  %4613 = vmatpush3.bf16.msra.mxu1 %v5657_v1  ;;  %v2232_v50 = vadd.f32 %v2231_v25, %v5577_v5 }
 0xc8b   :  { %v2243_v20 = vadd.f32 %v4539_v17, %v5571_v56  ;;  %v2234_v21 = vpop.f32.mrb[119].mxu0  ;;  %4614 = vmatprep.subr.bf16.mxu1 %v5702_v53 }
 0xc8c   :  { %v2235_v22 = vadd.f32 %v2234_v21, %v5579_v49 }
 0xc8d   :  { %v2281_v27 = vpack.c.bf16 %v2243_v20, %v2240_v19 }
 0xc8e   :  { %v2280_v23 = vpack.c.bf16 %v2235_v22, %v2232_v50  ;;  %4615 = vmatpush3.bf16.msra.mxu1 %v5702_v53 }
 0xc8f   :  { %4616 = vmatprep.subr.bf16.mxu1 %v5708_v18 }
 0xc90   :  { %v4542_v26 = vpop.f32.mrb[120].mxu0  ;;  %4568 = vmatprep.mubr.bf16.mxu1 %v2280_v23 }
 0xc91   :  { %v2247_v55 = vpop.f32.mrb[121].mxu0  ;;  %4569 = vmatmul.mubr.bf16.gmra.mrb[116].mxu1 %v2281_v27  ;;  %v2256_v30 = vadd.f32 %v4542_v26, %v5597_v32 }
 0xc92   :  { %v4543_v29 = vpop.f32.mrb[122].mxu0  ;;  %4617 = vmatpush3.bf16.msra.mxu1 %v5708_v18  ;;  %v2248_v57 = vadd.f32 %v2247_v55, %v5605_v62 }
 0xc93   :  { %v2259_v14 = vadd.f32 %v4543_v29, %v5599_v59  ;;  %v2250_v45 = vpop.f32.mrb[123].mxu0  ;;  %4618 = vmatprep.subr.bf16.mxu1 %v5714_v61 }
 0xc94   :  { %v2251_v31 = vadd.f32 %v2250_v45, %v5607_v63 }
 0xc95   :  { %v2283_v2 = vpack.c.bf16 %v2259_v14, %v2256_v30 }
 0xc96   :  { %v2282_v35 = vpack.c.bf16 %v2251_v31, %v2248_v57  ;;  %4619 = vmatpush3.bf16.msra.mxu1 %v5714_v61 }
 0xc97   :  { %4620 = vmatprep.subr.bf16.mxu1 %v5720_v12 }
 0xc98   :  { %v4546_v47 = vpop.f32.mrb[124].mxu0  ;;  %4572 = vmatprep.mubr.bf16.mxu1 %v2282_v35 }
 0xc99   :  { %v2263_v10 = vpop.f32.mrb[125].mxu0  ;;  %4573 = vmatmul.mubr.bf16.gmra.mrb[120].mxu1 %v2283_v2  ;;  %v2272_v34 = vadd.f32 %v4546_v47, %v5625_v39 }
 0xc9a   :  { %v4547_v3 = vpop.f32.mrb[126].mxu0  ;;  %4621 = vmatpush3.bf16.msra.mxu1 %v5720_v12  ;;  %v2264_v4 = vadd.f32 %v2263_v10, %v5629_v46 }
 0xc9b   :  { %v2275_v40 = vadd.f32 %v4547_v3, %v5627_v44  ;;  %v2266_v42 = vpop.f32.mrb[127].mxu0  ;;  %4622 = vmatprep.subr.bf16.mxu1 %v5726_v38 }
 0xc9c   :  { %v2267_v8 = vadd.f32 %v2266_v42, %v5631_v33 }
 0xc9d   :  { %v2285_v41 = vpack.c.bf16 %v2275_v40, %v2272_v34 }
 0xc9e   :  { %v2284_v24 = vpack.c.bf16 %v2267_v8, %v2264_v4  ;;  %4623 = vmatpush3.bf16.msra.mxu1 %v5726_v38 }
 0xc9f   :  { %4624 = vmatprep.subr.bf16.mxu1 %v5732_v58 }
 0xca0   :  { %4576 = vmatprep.mubr.bf16.mxu1 %v2284_v24 }
 0xca1   :  { %4577 = vmatmul.mubr.bf16.gmra.mrb[124].mxu1 %v2285_v41 }
 0xca2   :  { %4625 = vmatpush3.bf16.msra.mxu1 %v5732_v58 }
 0xca3   :  { %4626 = vmatprep.subr.bf16.mxu1 %v5736_v37 }
 0xca6   :  { %4627 = vmatpush3.bf16.msra.mxu1 %v5736_v37 }
 0xca7   :  { %4676 = vmatprep.subr.bf16.mxu1 %v5657_v1 }
 0xd5c   :  { %v4566_v13 = vpop.f32.mrb[112].mxu1 }
 0xd5d   :  { %v2320_v43 = vpop.f32.mrb[113].mxu1 }
 0xd5e   :  { %v4567_v51 = vpop.f32.mrb[114].mxu1 }
 0xd5f   :  { %v2384_v25 = vpack.c.bf16 %v4567_v51, %v4566_v13  ;;  %v2323_v17 = vpop.f32.mrb[115].mxu1 }
 0xd60   :  { %v2383_v19 = vpack.c.bf16 %v2323_v17, %v2320_v43  ;;  %v5889_v17 = vld [vmem:[#allocation11] sm:$0xff]  }
 0xd62   :  { %4580 = vmatprep.subr.bf16.mxu0 %v2383_v19 }
 0xd63   :  { %4581 = vmatpush3.bf16.msra.mxu0 %v2383_v19 }
 0xd64   :  { %v4570_v20 = vpop.f32.mrb[116].mxu1  ;;  %4582 = vmatprep.subr.bf16.mxu0 %v2384_v25 }
 0xd65   :  { %v2336_v21 = vpop.f32.mrb[117].mxu1 }
 0xd66   :  { %v4571_v50 = vpop.f32.mrb[118].mxu1 }
 0xd67   :  { %v2386_v22 = vpack.c.bf16 %v4571_v50, %v4570_v20  ;;  %v2339_v27 = vpop.f32.mrb[119].mxu1  ;;  %4583 = vmatpush3.bf16.msra.mxu0 %v2384_v25 }
 0xd68   :  { %v2385_v23 = vpack.c.bf16 %v2339_v27, %v2336_v21 }
 0xd6a   :  { %4584 = vmatprep.subr.bf16.mxu0 %v2385_v23 }
 0xd6b   :  { %4585 = vmatpush3.bf16.msra.mxu0 %v2385_v23 }
 0xd6c   :  { %v4574_v26 = vpop.f32.mrb[120].mxu1  ;;  %4586 = vmatprep.subr.bf16.mxu0 %v2386_v22 }
 0xd6d   :  { %v2352_v1 = vpop.f32.mrb[121].mxu1 }
 0xd6e   :  { %v4575_v55 = vpop.f32.mrb[122].mxu1 }
 0xd6f   :  { %v2388_v29 = vpack.c.bf16 %v4575_v55, %v4574_v26  ;;  %v2355_v30 = vpop.f32.mrb[123].mxu1  ;;  %4587 = vmatpush3.bf16.msra.mxu0 %v2386_v22 }
 0xd70   :  { %v2387_v14 = vpack.c.bf16 %v2355_v30, %v2352_v1 }
 0xd72   :  { %4588 = vmatprep.subr.bf16.mxu0 %v2387_v14 }
 0xd73   :  { %4589 = vmatpush3.bf16.msra.mxu0 %v2387_v14 }
 0xd74   :  { %v4578_v45 = vpop.f32.mrb[124].mxu1  ;;  %4590 = vmatprep.subr.bf16.mxu0 %v2388_v29 }
 0xd75   :  { %v2368_v57 = vpop.f32.mrb[125].mxu1 }
 0xd76   :  { %v4579_v31 = vpop.f32.mrb[126].mxu1 }
 0xd77   :  { %v2390_v2 = vpack.c.bf16 %v4579_v31, %v4578_v45  ;;  %v2371_v35 = vpop.f32.mrb[127].mxu1  ;;  %4591 = vmatpush3.bf16.msra.mxu0 %v2388_v29 }
 0xd78   :  { %v2389_v47 = vpack.c.bf16 %v2371_v35, %v2368_v57 }
 0xd7a   :  { %4592 = vmatprep.subr.bf16.mxu0 %v2389_v47 }
 0xd7b   :  { %4593 = vmatpush3.bf16.msra.mxu0 %v2389_v47 }
 0xd7c   :  { %4594 = vmatprep.subr.bf16.mxu0 %v2390_v2 }
 0xd7f   :  { %4595 = vmatpush3.bf16.msra.mxu0 %v2390_v2 }
 0xd82   :  { %4597 = vmatmul.mubr.bf16.vlgmr.msra.gmra.mrb[128].mxu0 %v5781_v54 }
 0xd83   :  { %4600 = vmatprep.mubr.bf16.mxu0 %v5784_v6 }
 0xd8a   :  { %4601 = vmatmul.mubr.bf16.gmra.mrb[132].mxu0 %v5787_v36 }
 0xd8b   :  { %4604 = vmatprep.mubr.bf16.mxu0 %v5790_v60 }
 0xd92   :  { %4605 = vmatmul.mubr.bf16.gmra.mrb[136].mxu0 %v5793_v7 }
 0xd93   :  { %4608 = vmatprep.mubr.bf16.mxu0 %v5796_v52 }
 0xd9a   :  { %4609 = vmatmul.mubr.bf16.gmra.mrb[140].mxu0 %v5799_v0 }
 0xd9b   :  { %4660 = vmatprep.mubr.bf16.mxu0 %v5802_v28 }
 0xe55   :  { %v4598_v10 = vpop.f32.mrb[128].mxu0 }
 0xe56   :  { %v2425_v3 = vpop.f32.mrb[129].mxu0  ;;  %v2434_v40 = vadd.f32 %v4598_v10, %v5549_v9 }
 0xe57   :  { %v4599_v34 = vpop.f32.mrb[130].mxu0  ;;  %v2426_v8 = vadd.f32 %v2425_v3, %v5555_v15 }
 0xe58   :  { %v2437_v42 = vadd.f32 %v4599_v34, %v5551_v11  ;;  %v2428_v4 = vpop.f32.mrb[131].mxu0 }
 0xe59   :  { %v2429_v41 = vadd.f32 %v2428_v4, %v5557_v16 }
 0xe5a   :  { %v2489_v24 = vpack.c.bf16 %v2437_v42, %v2434_v40 }
 0xe5b   :  { %v2488_v13 = vpack.c.bf16 %v2429_v41, %v2426_v8 }
 0xe5d   :  { %v4602_v43 = vpop.f32.mrb[132].mxu0  ;;  %4628 = vmatprep.mubr.bf16.mxu1 %v2488_v13 }
 0xe5e   :  { %v2441_v51 = vpop.f32.mrb[133].mxu0  ;;  %4629 = vmatmul.mubr.bf16.vlgmr.msra.gmra.mrb[128].mxu1 %v2489_v24  ;;  %v2450_v19 = vadd.f32 %v4602_v43, %v5569_v48 }
 0xe5f   :  { %v4603_v25 = vpop.f32.mrb[134].mxu0  ;;  %4677 = vmatpush3.bf16.msra.mxu1 %v5889_v17  ;;  %v2442_v50 = vadd.f32 %v2441_v51, %v5577_v5 }
 0xe60   :  { %v2453_v20 = vadd.f32 %v4603_v25, %v5571_v56  ;;  %v2444_v21 = vpop.f32.mrb[135].mxu0  ;;  %4678 = vmatprep.subr.bf16.mxu1 %v5702_v53 }
 0xe61   :  { %v2445_v22 = vadd.f32 %v2444_v21, %v5579_v49 }
 0xe62   :  { %v2491_v27 = vpack.c.bf16 %v2453_v20, %v2450_v19 }
 0xe63   :  { %v2490_v23 = vpack.c.bf16 %v2445_v22, %v2442_v50  ;;  %4679 = vmatpush3.bf16.msra.mxu1 %v5702_v53 }
 0xe64   :  { %4680 = vmatprep.subr.bf16.mxu1 %v5708_v18 }
 0xe65   :  { %v4606_v26 = vpop.f32.mrb[136].mxu0  ;;  %4632 = vmatprep.mubr.bf16.mxu1 %v2490_v23 }
 0xe66   :  { %v2457_v1 = vpop.f32.mrb[137].mxu0  ;;  %4633 = vmatmul.mubr.bf16.gmra.mrb[132].mxu1 %v2491_v27  ;;  %v2466_v29 = vadd.f32 %v4606_v26, %v5597_v32 }
 0xe67   :  { %v4607_v55 = vpop.f32.mrb[138].mxu0  ;;  %4681 = vmatpush3.bf16.msra.mxu1 %v5708_v18  ;;  %v2458_v45 = vadd.f32 %v2457_v1, %v5605_v62 }
 0xe68   :  { %v2469_v30 = vadd.f32 %v4607_v55, %v5599_v59  ;;  %v2460_v14 = vpop.f32.mrb[139].mxu0  ;;  %4682 = vmatprep.subr.bf16.mxu1 %v5714_v61 }
 0xe69   :  { %v2461_v53 = vadd.f32 %v2460_v14, %v5607_v63 }
 0xe6a   :  { %v2493_v57 = vpack.c.bf16 %v2469_v30, %v2466_v29 }
 0xe6b   :  { %v2492_v31 = vpack.c.bf16 %v2461_v53, %v2458_v45  ;;  %4683 = vmatpush3.bf16.msra.mxu1 %v5714_v61 }
 0xe6c   :  { %4684 = vmatprep.subr.bf16.mxu1 %v5720_v12 }
 0xe6d   :  { %v4610_v2 = vpop.f32.mrb[140].mxu0  ;;  %4636 = vmatprep.mubr.bf16.mxu1 %v2492_v31 }
 0xe6e   :  { %v2473_v18 = vpop.f32.mrb[141].mxu0  ;;  %4637 = vmatmul.mubr.bf16.gmra.mrb[136].mxu1 %v2493_v57  ;;  %v2482_v47 = vadd.f32 %v4610_v2, %v5625_v39 }
 0xe6f   :  { %v4611_v35 = vpop.f32.mrb[142].mxu0  ;;  %4685 = vmatpush3.bf16.msra.mxu1 %v5720_v12  ;;  %v2474_v34 = vadd.f32 %v2473_v18, %v5629_v46 }
 0xe70   :  { %v2485_v10 = vadd.f32 %v4611_v35, %v5627_v44  ;;  %v2476_v3 = vpop.f32.mrb[143].mxu0  ;;  %4686 = vmatprep.subr.bf16.mxu1 %v5726_v38 }
 0xe71   :  { %v2477_v61 = vadd.f32 %v2476_v3, %v5631_v33 }
 0xe72   :  { %v2495_v40 = vpack.c.bf16 %v2485_v10, %v2482_v47 }
 0xe73   :  { %v2494_v42 = vpack.c.bf16 %v2477_v61, %v2474_v34  ;;  %4687 = vmatpush3.bf16.msra.mxu1 %v5726_v38 }
 0xe74   :  { %4688 = vmatprep.subr.bf16.mxu1 %v5732_v58 }
 0xe75   :  { %4640 = vmatprep.mubr.bf16.mxu1 %v2494_v42 }
 0xe76   :  { %4641 = vmatmul.mubr.bf16.gmra.mrb[140].mxu1 %v2495_v40 }
 0xe77   :  { %4689 = vmatpush3.bf16.msra.mxu1 %v5732_v58 }
 0xe78   :  { %4690 = vmatprep.subr.bf16.mxu1 %v5736_v37 }
 0xe7b   :  { %4691 = vmatpush3.bf16.msra.mxu1 %v5736_v37 }
 0xe7c   :  { %4740 = vmatprep.subr.bf16.mxu1 %v5889_v17 }
 0xf31   :  { %v4630_v12 = vpop.f32.mrb[128].mxu1 }
 0xf32   :  { %v2530_v4 = vpop.f32.mrb[129].mxu1 }
 0xf33   :  { %v4631_v8 = vpop.f32.mrb[130].mxu1 }
 0xf34   :  { %v2594_v41 = vpack.c.bf16 %v4631_v8, %v4630_v12  ;;  %v2533_v24 = vpop.f32.mrb[131].mxu1 }
 0xf35   :  { %v2593_v13 = vpack.c.bf16 %v2533_v24, %v2530_v4  ;;  %v4983_v4 = vld [vmem:[#allocation11 + $0x8] sm:$0xff]  }
 0xf37   :  { %4644 = vmatprep.subr.bf16.mxu0 %v2593_v13 }
 0xf38   :  { %4645 = vmatpush3.bf16.msra.mxu0 %v2593_v13 }
 0xf39   :  { %v4634_v38 = vpop.f32.mrb[132].mxu1  ;;  %4646 = vmatprep.subr.bf16.mxu0 %v2594_v41 }
 0xf3a   :  { %v2546_v43 = vpop.f32.mrb[133].mxu1 }
 0xf3b   :  { %v4635_v51 = vpop.f32.mrb[134].mxu1 }
 0xf3c   :  { %v2596_v25 = vpack.c.bf16 %v4635_v51, %v4634_v38  ;;  %v2549_v58 = vpop.f32.mrb[135].mxu1  ;;  %4647 = vmatpush3.bf16.msra.mxu0 %v2594_v41  ;;  %v4984_v38 = vld [vmem:[#allocation11 + $0x10] sm:$0xff]  }
 0xf3d   :  { %v2595_v19 = vpack.c.bf16 %v2549_v58, %v2546_v43 }
 0xf3f   :  { %4648 = vmatprep.subr.bf16.mxu0 %v2595_v19 }
 0xf40   :  { %4649 = vmatpush3.bf16.msra.mxu0 %v2595_v19 }
 0xf41   :  { %v4638_v37 = vpop.f32.mrb[136].mxu1  ;;  %4650 = vmatprep.subr.bf16.mxu0 %v2596_v25 }
 0xf42   :  { %v2562_v20 = vpop.f32.mrb[137].mxu1 }
 0xf43   :  { %v4639_v21 = vpop.f32.mrb[138].mxu1 }
 0xf44   :  { %v2598_v50 = vpack.c.bf16 %v4639_v21, %v4638_v37  ;;  %v2565_v22 = vpop.f32.mrb[139].mxu1  ;;  %4651 = vmatpush3.bf16.msra.mxu0 %v2596_v25  ;;  %v4985_v37 = vld [vmem:[#allocation11 + $0x18] sm:$0xff]  }
 0xf45   :  { %v2597_v27 = vpack.c.bf16 %v2565_v22, %v2562_v20 }
 0xf47   :  { %4652 = vmatprep.subr.bf16.mxu0 %v2597_v27 }
 0xf48   :  { %4653 = vmatpush3.bf16.msra.mxu0 %v2597_v27  ;;  %v4986_v27 = vld [vmem:[#allocation11 + $0x20] sm:$0xff]  }
 0xf49   :  { %v4642_v23 = vpop.f32.mrb[140].mxu1  ;;  %4654 = vmatprep.subr.bf16.mxu0 %v2598_v50 }
 0xf4a   :  { %v2578_v26 = vpop.f32.mrb[141].mxu1 }
 0xf4b   :  { %v4643_v1 = vpop.f32.mrb[142].mxu1 }
 0xf4c   :  { %v2600_v55 = vpack.c.bf16 %v4643_v1, %v4642_v23  ;;  %v2581_v29 = vpop.f32.mrb[143].mxu1  ;;  %4655 = vmatpush3.bf16.msra.mxu0 %v2598_v50 }
 0xf4d   :  { %v2599_v30 = vpack.c.bf16 %v2581_v29, %v2578_v26 }
 0xf4f   :  { %4656 = vmatprep.subr.bf16.mxu0 %v2599_v30 }
 0xf50   :  { %4657 = vmatpush3.bf16.msra.mxu0 %v2599_v30 }
 0xf51   :  { %4658 = vmatprep.subr.bf16.mxu0 %v2600_v55 }
 0xf54   :  { %4659 = vmatpush3.bf16.msra.mxu0 %v2600_v55 }
 0xf57   :  { %4661 = vmatmul.mubr.bf16.vlgmr.msra.gmra.mrb[144].mxu0 %v5781_v54 }
 0xf58   :  { %4664 = vmatprep.mubr.bf16.mxu0 %v5784_v6 }
 0xf5f   :  { %4665 = vmatmul.mubr.bf16.gmra.mrb[148].mxu0 %v5787_v36 }
 0xf60   :  { %4668 = vmatprep.mubr.bf16.mxu0 %v5790_v60 }
 0xf67   :  { %4669 = vmatmul.mubr.bf16.gmra.mrb[152].mxu0 %v5793_v7 }
 0xf68   :  { %4672 = vmatprep.mubr.bf16.mxu0 %v5796_v52 }
 0xf6f   :  { %4673 = vmatmul.mubr.bf16.gmra.mrb[156].mxu0 %v5799_v0 }
 0xf70   :  { %4724 = vmatprep.mubr.bf16.mxu0 %v5802_v28 }
0x102a   :  { %v4662_v14 = vpop.f32.mrb[144].mxu0 }
0x102b   :  { %v2635_v45 = vpop.f32.mrb[145].mxu0  ;;  %v2644_v57 = vadd.f32 %v4662_v14, %v5549_v9  ;;  %v4987_v14 = vld [vmem:[#allocation11 + $0x28] sm:$0xff]  }
0x102c   :  { %v4663_v53 = vpop.f32.mrb[146].mxu0  ;;  %v2636_v18 = vadd.f32 %v2635_v45, %v5555_v15 }
0x102d   :  { %v2647_v31 = vadd.f32 %v4663_v53, %v5551_v11  ;;  %v2638_v2 = vpop.f32.mrb[147].mxu0 }
0x102e   :  { %v2639_v35 = vadd.f32 %v2638_v2, %v5557_v16  ;;  %v4988_v2 = vld [vmem:[#allocation11 + $0x30] sm:$0xff]  }
0x102f   :  { %v2699_v47 = vpack.c.bf16 %v2647_v31, %v2644_v57 }
0x1030   :  { %v2698_v10 = vpack.c.bf16 %v2639_v35, %v2636_v18  ;;  %v4989_v18 = vld [vmem:[#allocation11 + $0x38] sm:$0xff]  }
0x1032   :  { %v4666_v3 = vpop.f32.mrb[148].mxu0  ;;  %4692 = vmatprep.mubr.bf16.mxu1 %v2698_v10 }
0x1033   :  { %v2651_v34 = vpop.f32.mrb[149].mxu0  ;;  %4693 = vmatmul.mubr.bf16.vlgmr.msra.gmra.mrb[144].mxu1 %v2699_v47  ;;  %v2660_v40 = vadd.f32 %v4666_v3, %v5569_v48 }
0x1034   :  { %v4667_v61 = vpop.f32.mrb[150].mxu0  ;;  %4741 = vmatpush3.bf16.msra.mxu1 %v5889_v17  ;;  %v2652_v8 = vadd.f32 %v2651_v34, %v5577_v5 }
0x1035   :  { %v2663_v42 = vadd.f32 %v4667_v61, %v5571_v56  ;;  %v2654_v12 = vpop.f32.mrb[151].mxu0  ;;  %4742 = vmatprep.subr.bf16.mxu1 %v4983_v4 }
0x1036   :  { %v2655_v41 = vadd.f32 %v2654_v12, %v5579_v49 }
0x1037   :  { %v2701_v24 = vpack.c.bf16 %v2663_v42, %v2660_v40 }
0x1038   :  { %v2700_v13 = vpack.c.bf16 %v2655_v41, %v2652_v8  ;;  %4743 = vmatpush3.bf16.msra.mxu1 %v4983_v4 }
0x1039   :  { %4744 = vmatprep.subr.bf16.mxu1 %v4984_v38 }
0x103a   :  { %v4670_v43 = vpop.f32.mrb[152].mxu0  ;;  %4696 = vmatprep.mubr.bf16.mxu1 %v2700_v13 }
0x103b   :  { %v2667_v51 = vpop.f32.mrb[153].mxu0  ;;  %4697 = vmatmul.mubr.bf16.gmra.mrb[148].mxu1 %v2701_v24  ;;  %v2676_v25 = vadd.f32 %v4670_v43, %v5597_v32 }
0x103c   :  { %v4671_v17 = vpop.f32.mrb[154].mxu0  ;;  %4745 = vmatpush3.bf16.msra.mxu1 %v4984_v38  ;;  %v2668_v20 = vadd.f32 %v2667_v51, %v5605_v62 }
0x103d   :  { %v2679_v58 = vadd.f32 %v4671_v17, %v5599_v59  ;;  %v2670_v19 = vpop.f32.mrb[155].mxu0  ;;  %4746 = vmatprep.subr.bf16.mxu1 %v4985_v37 }
0x103e   :  { %v2671_v21 = vadd.f32 %v2670_v19, %v5607_v63 }
0x103f   :  { %v2703_v50 = vpack.c.bf16 %v2679_v58, %v2676_v25 }
0x1040   :  { %v2702_v22 = vpack.c.bf16 %v2671_v21, %v2668_v20  ;;  %4747 = vmatpush3.bf16.msra.mxu1 %v4985_v37 }
0x1041   :  { %4748 = vmatprep.subr.bf16.mxu1 %v4986_v27 }
0x1042   :  { %v4674_v23 = vpop.f32.mrb[156].mxu0  ;;  %4700 = vmatprep.mubr.bf16.mxu1 %v2702_v22 }
0x1043   :  { %v2683_v26 = vpop.f32.mrb[157].mxu0  ;;  %4701 = vmatmul.mubr.bf16.gmra.mrb[152].mxu1 %v2703_v50  ;;  %v2692_v55 = vadd.f32 %v4674_v23, %v5625_v39 }
0x1044   :  { %v4675_v1 = vpop.f32.mrb[158].mxu0  ;;  %4749 = vmatpush3.bf16.msra.mxu1 %v4986_v27  ;;  %v2684_v45 = vadd.f32 %v2683_v26, %v5629_v46 }
0x1045   :  { %v2695_v29 = vadd.f32 %v4675_v1, %v5627_v44  ;;  %v2686_v30 = vpop.f32.mrb[159].mxu0  ;;  %4750 = vmatprep.subr.bf16.mxu1 %v4987_v14 }
0x1046   :  { %v2687_v53 = vadd.f32 %v2686_v30, %v5631_v33 }
0x1047   :  { %v2705_v57 = vpack.c.bf16 %v2695_v29, %v2692_v55 }
0x1048   :  { %v2704_v31 = vpack.c.bf16 %v2687_v53, %v2684_v45  ;;  %4751 = vmatpush3.bf16.msra.mxu1 %v4987_v14 }
0x1049   :  { %4752 = vmatprep.subr.bf16.mxu1 %v4988_v2 }
0x104a   :  { %4704 = vmatprep.mubr.bf16.mxu1 %v2704_v31 }
0x104b   :  { %4705 = vmatmul.mubr.bf16.gmra.mrb[156].mxu1 %v2705_v57 }
0x104c   :  { %4753 = vmatpush3.bf16.msra.mxu1 %v4988_v2 }
0x104d   :  { %4754 = vmatprep.subr.bf16.mxu1 %v4989_v18 }
0x1050   :  { %4755 = vmatpush3.bf16.msra.mxu1 %v4989_v18 }
0x1106   :  { %v4694_v35 = vpop.f32.mrb[144].mxu1 }
0x1107   :  { %v2740_v47 = vpop.f32.mrb[145].mxu1 }
0x1108   :  { %v4695_v10 = vpop.f32.mrb[146].mxu1 }
0x1109   :  { %v2804_v3 = vpack.c.bf16 %v4695_v10, %v4694_v35  ;;  %v2743_v34 = vpop.f32.mrb[147].mxu1 }
0x110a   :  { %v2803_v61 = vpack.c.bf16 %v2743_v34, %v2740_v47 }
0x110c   :  { %4708 = vmatprep.subr.bf16.mxu0 %v2803_v61 }
0x110d   :  { %4709 = vmatpush3.bf16.msra.mxu0 %v2803_v61 }
0x110e   :  { %v4698_v40 = vpop.f32.mrb[148].mxu1  ;;  %4710 = vmatprep.subr.bf16.mxu0 %v2804_v3 }
0x110f   :  { %v2756_v42 = vpop.f32.mrb[149].mxu1 }
0x1110   :  { %v4699_v12 = vpop.f32.mrb[150].mxu1 }
0x1111   :  { %v2806_v4 = vpack.c.bf16 %v4699_v12, %v4698_v40  ;;  %v2759_v8 = vpop.f32.mrb[151].mxu1  ;;  %4711 = vmatpush3.bf16.msra.mxu0 %v2804_v3 }
0x1112   :  { %v2805_v41 = vpack.c.bf16 %v2759_v8, %v2756_v42 }
0x1114   :  { %4712 = vmatprep.subr.bf16.mxu0 %v2805_v41 }
0x1115   :  { %4713 = vmatpush3.bf16.msra.mxu0 %v2805_v41 }
0x1116   :  { %v4702_v24 = vpop.f32.mrb[152].mxu1  ;;  %4714 = vmatprep.subr.bf16.mxu0 %v2806_v4 }
0x1117   :  { %v2772_v13 = vpop.f32.mrb[153].mxu1 }
0x1118   :  { %v4703_v38 = vpop.f32.mrb[154].mxu1 }
0x1119   :  { %v2808_v43 = vpack.c.bf16 %v4703_v38, %v4702_v24  ;;  %v2775_v51 = vpop.f32.mrb[155].mxu1  ;;  %4715 = vmatpush3.bf16.msra.mxu0 %v2806_v4 }
0x111a   :  { %v2807_v17 = vpack.c.bf16 %v2775_v51, %v2772_v13  ;;  %v4950_v51 = vld [vmem:[%s6074_s12] sm:$0xff]  }
0x111b   :  { %4804 = vmatprep.subr.bf16.mxu1 %v4950_v51 }
0x111c   :  { %4716 = vmatprep.subr.bf16.mxu0 %v2807_v17 }
0x111d   :  { %4717 = vmatpush3.bf16.msra.mxu0 %v2807_v17  ;;  %v4951_v17 = vld [vmem:[%s6074_s12 + $0x8] sm:$0xff]  }
0x111e   :  { %v4706_v25 = vpop.f32.mrb[156].mxu1  ;;  %4718 = vmatprep.subr.bf16.mxu0 %v2808_v43 }
0x111f   :  { %v2788_v58 = vpop.f32.mrb[157].mxu1 }
0x1120   :  { %v4707_v19 = vpop.f32.mrb[158].mxu1 }
0x1121   :  { %v2810_v37 = vpack.c.bf16 %v4707_v19, %v4706_v25  ;;  %v2791_v20 = vpop.f32.mrb[159].mxu1  ;;  %4719 = vmatpush3.bf16.msra.mxu0 %v2808_v43  ;;  %v4952_v25 = vld [vmem:[%s6074_s12 + $0x10] sm:$0xff]   ;;  %v4954_v19 = vld [vmem:[%s6074_s12 + $0x20] sm:$0xff]  }
0x1122   :  { %v2809_v21 = vpack.c.bf16 %v2791_v20, %v2788_v58  ;;  %v4953_v58 = vld [vmem:[%s6074_s12 + $0x18] sm:$0xff]  }
0x1124   :  { %4720 = vmatprep.subr.bf16.mxu0 %v2809_v21 }
0x1125   :  { %4721 = vmatpush3.bf16.msra.mxu0 %v2809_v21 }
0x1126   :  { %4722 = vmatprep.subr.bf16.mxu0 %v2810_v37 }
0x1129   :  { %4723 = vmatpush3.bf16.msra.mxu0 %v2810_v37  ;;  %v4955_v37 = vld [vmem:[%s6074_s12 + $0x28] sm:$0xff]  }
0x112c   :  { %4725 = vmatmul.mubr.bf16.vlgmr.msra.gmra.mrb[160].mxu0 %v5781_v54 }
0x112d   :  { %4728 = vmatprep.mubr.bf16.mxu0 %v5784_v6 }
0x1134   :  { %4729 = vmatmul.mubr.bf16.gmra.mrb[164].mxu0 %v5787_v36 }
0x1135   :  { %4732 = vmatprep.mubr.bf16.mxu0 %v5790_v60 }
0x113c   :  { %4733 = vmatmul.mubr.bf16.gmra.mrb[168].mxu0 %v5793_v7 }
0x113d   :  { %4736 = vmatprep.mubr.bf16.mxu0 %v5796_v52 }
0x1144   :  { %4737 = vmatmul.mubr.bf16.gmra.mrb[172].mxu0 %v5799_v0 }
0x1145   :  { %4788 = vmatprep.mubr.bf16.mxu0 %v5802_v28 }
0x11ff   :  { %v4726_v50 = vpop.f32.mrb[160].mxu0 }
0x1200   :  { %v2845_v22 = vpop.f32.mrb[161].mxu0  ;;  %v2854_v23 = vadd.f32 %v4726_v50, %v5549_v9 }
0x1201   :  { %v4727_v27 = vpop.f32.mrb[162].mxu0  ;;  %v2846_v36 = vadd.f32 %v2845_v22, %v5555_v15 }
0x1202   :  { %v2857_v54 = vadd.f32 %v4727_v27, %v5551_v11  ;;  %v2848_v6 = vpop.f32.mrb[163].mxu0 }
0x1203   :  { %v2849_v60 = vadd.f32 %v2848_v6, %v5557_v16 }
0x1204   :  { %v2909_v26 = vpack.c.bf16 %v2857_v54, %v2854_v23 }
0x1205   :  { %v2908_v7 = vpack.c.bf16 %v2849_v60, %v2846_v36 }
0x1207   :  { %v4730_v1 = vpop.f32.mrb[164].mxu0  ;;  %4756 = vmatprep.mubr.bf16.mxu1 %v2908_v7 }
0x1208   :  { %v2861_v52 = vpop.f32.mrb[165].mxu0  ;;  %4757 = vmatmul.mubr.bf16.vlgmr.msra.gmra.mrb[160].mxu1 %v2909_v26  ;;  %v2870_v28 = vadd.f32 %v4730_v1, %v5569_v48 }
0x1209   :  { %v4731_v0 = vpop.f32.mrb[166].mxu0  ;;  %v2862_v30 = vadd.f32 %v2861_v52, %v5577_v5  ;;  %4805 = vmatpush3.bf16.msra.mxu1 %v4950_v51 }
0x120a   :  { %v2873_v55 = vadd.f32 %v4731_v0, %v5571_v56  ;;  %v2864_v29 = vpop.f32.mrb[167].mxu0  ;;  %4806 = vmatprep.subr.bf16.mxu1 %v4951_v17 }
0x120b   :  { %v2865_v14 = vadd.f32 %v2864_v29, %v5579_v49 }
0x120c   :  { %v2911_v45 = vpack.c.bf16 %v2873_v55, %v2870_v28 }
0x120d   :  { %v2910_v53 = vpack.c.bf16 %v2865_v14, %v2862_v30  ;;  %4807 = vmatpush3.bf16.msra.mxu1 %v4951_v17 }
0x120e   :  { %4808 = vmatprep.subr.bf16.mxu1 %v4952_v25 }
0x120f   :  { %v4734_v57 = vpop.f32.mrb[168].mxu0  ;;  %4760 = vmatprep.mubr.bf16.mxu1 %v2910_v53 }
0x1210   :  { %v2877_v31 = vpop.f32.mrb[169].mxu0  ;;  %4761 = vmatmul.mubr.bf16.gmra.mrb[164].mxu1 %v2911_v45  ;;  %v2886_v18 = vadd.f32 %v4734_v57, %v5597_v32 }
0x1211   :  { %v4735_v2 = vpop.f32.mrb[170].mxu0  ;;  %v2878_v10 = vadd.f32 %v2877_v31, %v5605_v62  ;;  %4809 = vmatpush3.bf16.msra.mxu1 %v4952_v25 }
0x1212   :  { %v2889_v35 = vadd.f32 %v4735_v2, %v5599_v59  ;;  %v2880_v47 = vpop.f32.mrb[171].mxu0  ;;  %4810 = vmatprep.subr.bf16.mxu1 %v4953_v58  ;;  %v4990_v2 = vld [vmem:[#allocation5 + $0x8] sm:$0xff]  }
0x1213   :  { %v2881_v3 = vadd.f32 %v2880_v47, %v5607_v63  ;;  %v4993_v47 = vld [vmem:[#allocation5 + $0x20] sm:$0xff]  }
0x1214   :  { %v2913_v34 = vpack.c.bf16 %v2889_v35, %v2886_v18  ;;  %v4991_v18 = vld [vmem:[#allocation5 + $0x10] sm:$0xff]   ;;  %v4992_v35 = vld [vmem:[#allocation5 + $0x18] sm:$0xff]  }
0x1215   :  { %v2912_v61 = vpack.c.bf16 %v2881_v3, %v2878_v10  ;;  %4811 = vmatpush3.bf16.msra.mxu1 %v4953_v58  ;;  %v4994_v10 = vld [vmem:[#allocation5 + $0x28] sm:$0xff]   ;;  %v4995_v3 = vld [vmem:[#allocation5 + $0x30] sm:$0xff]  }
0x1216   :  { %4812 = vmatprep.subr.bf16.mxu1 %v4954_v19 }
0x1217   :  { %v4738_v40 = vpop.f32.mrb[172].mxu0  ;;  %4764 = vmatprep.mubr.bf16.mxu1 %v2912_v61  ;;  %v4956_v61 = vld [vmem:[%s6074_s12 + $0x30] sm:$0xff]  }
0x1218   :  { %v2893_v42 = vpop.f32.mrb[173].mxu0  ;;  %4765 = vmatmul.mubr.bf16.gmra.mrb[168].mxu1 %v2913_v34  ;;  %v2902_v4 = vadd.f32 %v4738_v40, %v5625_v39  ;;  %v4996_v34 = vld [vmem:[#allocation5 + $0x38] sm:$0xff]  }
0x1219   :  { %v4739_v12 = vpop.f32.mrb[174].mxu0  ;;  %v2894_v24 = vadd.f32 %v2893_v42, %v5629_v46  ;;  %4813 = vmatpush3.bf16.msra.mxu1 %v4954_v19  ;;  %v4957_v40 = vld [vmem:[%s6074_s12 + $0x38] sm:$0xff]   ;;  %v4958_v42 = vld [vmem:[%s6074_s12 + $0x40] sm:$0xff]  }
0x121a   :  { %v2905_v8 = vadd.f32 %v4739_v12, %v5627_v44  ;;  %v2896_v41 = vpop.f32.mrb[175].mxu0  ;;  %4814 = vmatprep.subr.bf16.mxu1 %v4955_v37  ;;  %v4959_v12 = vld [vmem:[%s6074_s12 + $0x48] sm:$0xff]  }
0x121b   :  { %v2897_v13 = vadd.f32 %v2896_v41, %v5631_v33  ;;  %v4962_v41 = vld [vmem:[%s6074_s12 + $0x60] sm:$0xff]  }
0x121c   :  { %v2915_v38 = vpack.c.bf16 %v2905_v8, %v2902_v4  ;;  %v4960_v4 = vld [vmem:[%s6074_s12 + $0x50] sm:$0xff]   ;;  %v4961_v8 = vld [vmem:[%s6074_s12 + $0x58] sm:$0xff]  }
0x121d   :  { %v2914_v43 = vpack.c.bf16 %v2897_v13, %v2894_v24  ;;  %4815 = vmatpush3.bf16.msra.mxu1 %v4955_v37  ;;  %v4963_v24 = vld [vmem:[%s6074_s12 + $0x68] sm:$0xff]  }
0x121e   :  { %4816 = vmatprep.subr.bf16.mxu1 %v4956_v61 }
0x121f   :  { %4768 = vmatprep.mubr.bf16.mxu1 %v2914_v43 }
0x1220   :  { %4769 = vmatmul.mubr.bf16.gmra.mrb[172].mxu1 %v2915_v38 }
0x1221   :  { %4817 = vmatpush3.bf16.msra.mxu1 %v4956_v61 }
0x1222   :  { %4818 = vmatprep.subr.bf16.mxu1 %v4957_v40 }
0x1225   :  { %4819 = vmatpush3.bf16.msra.mxu1 %v4957_v40 }
0x12db   :  { %v4758_v20 = vpop.f32.mrb[160].mxu1 }
0x12dc   :  { %v2950_v21 = vpop.f32.mrb[161].mxu1 }
0x12dd   :  { %v4759_v50 = vpop.f32.mrb[162].mxu1 }
0x12de   :  { %v3014_v22 = vpack.c.bf16 %v4759_v50, %v4758_v20  ;;  %v2953_v27 = vpop.f32.mrb[163].mxu1 }
0x12df   :  { %v3013_v23 = vpack.c.bf16 %v2953_v27, %v2950_v21 }
0x12e1   :  { %4772 = vmatprep.subr.bf16.mxu0 %v3013_v23 }
0x12e2   :  { %4773 = vmatpush3.bf16.msra.mxu0 %v3013_v23 }
0x12e3   :  { %v4762_v54 = vpop.f32.mrb[164].mxu1  ;;  %4774 = vmatprep.subr.bf16.mxu0 %v3014_v22 }
0x12e4   :  { %v2966_v6 = vpop.f32.mrb[165].mxu1 }
0x12e5   :  { %v4763_v36 = vpop.f32.mrb[166].mxu1 }
0x12e6   :  { %v3016_v60 = vpack.c.bf16 %v4763_v36, %v4762_v54  ;;  %v2969_v26 = vpop.f32.mrb[167].mxu1  ;;  %4775 = vmatpush3.bf16.msra.mxu0 %v3014_v22 }
0x12e7   :  { %v3015_v7 = vpack.c.bf16 %v2969_v26, %v2966_v6 }
0x12e9   :  { %4776 = vmatprep.subr.bf16.mxu0 %v3015_v7 }
0x12ea   :  { %4777 = vmatpush3.bf16.msra.mxu0 %v3015_v7 }
0x12eb   :  { %v4766_v1 = vpop.f32.mrb[168].mxu1  ;;  %4778 = vmatprep.subr.bf16.mxu0 %v3016_v60 }
0x12ec   :  { %v2982_v52 = vpop.f32.mrb[169].mxu1 }
0x12ed   :  { %v4767_v0 = vpop.f32.mrb[170].mxu1 }
0x12ee   :  { %v3018_v28 = vpack.c.bf16 %v4767_v0, %v4766_v1  ;;  %v2985_v55 = vpop.f32.mrb[171].mxu1  ;;  %4779 = vmatpush3.bf16.msra.mxu0 %v3016_v60 }
0x12ef   :  { %v3017_v29 = vpack.c.bf16 %v2985_v55, %v2982_v52 }
0x12f1   :  { %4780 = vmatprep.subr.bf16.mxu0 %v3017_v29 }
0x12f2   :  { %4781 = vmatpush3.bf16.msra.mxu0 %v3017_v29 }
0x12f3   :  { %v4770_v30 = vpop.f32.mrb[172].mxu1  ;;  %4782 = vmatprep.subr.bf16.mxu0 %v3018_v28 }
0x12f4   :  { %v2998_v14 = vpop.f32.mrb[173].mxu1 }
0x12f5   :  { %v4771_v45 = vpop.f32.mrb[174].mxu1 }
0x12f6   :  { %v3020_v53 = vpack.c.bf16 %v4771_v45, %v4770_v30  ;;  %v3001_v57 = vpop.f32.mrb[175].mxu1  ;;  %4783 = vmatpush3.bf16.msra.mxu0 %v3018_v28 }
0x12f7   :  { %v3019_v31 = vpack.c.bf16 %v3001_v57, %v2998_v14 }
0x12f9   :  { %4784 = vmatprep.subr.bf16.mxu0 %v3019_v31 }
0x12fa   :  { %4785 = vmatpush3.bf16.msra.mxu0 %v3019_v31 }
0x12fb   :  { %4786 = vmatprep.subr.bf16.mxu0 %v3020_v53 }
0x12fe   :  { %4787 = vmatpush3.bf16.msra.mxu0 %v3020_v53 }
0x12ff   :  { %4836 = vmatprep.subr.bf16.mxu0 %v4958_v42 }
0x1301   :  { %4789 = vmatmul.mubr.bf16.vlgmr.msra.gmra.mrb[176].mxu0 %v4990_v2 }
0x1302   :  { %4792 = vmatprep.mubr.bf16.mxu0 %v4991_v18  ;;  %4837 = vmatpush3.bf16.msra.mxu0 %v4958_v42 }
0x1303   :  { %4838 = vmatprep.subr.bf16.mxu0 %v4959_v12 }
0x1306   :  { %4839 = vmatpush3.bf16.msra.mxu0 %v4959_v12 }
0x1307   :  { %4840 = vmatprep.subr.bf16.mxu0 %v4960_v4 }
0x1309   :  { %4793 = vmatmul.mubr.bf16.gmra.mrb[180].mxu0 %v4992_v35 }
0x130a   :  { %4796 = vmatprep.mubr.bf16.mxu0 %v4993_v47  ;;  %4841 = vmatpush3.bf16.msra.mxu0 %v4960_v4 }
0x130b   :  { %4842 = vmatprep.subr.bf16.mxu0 %v4961_v8 }
0x130e   :  { %4843 = vmatpush3.bf16.msra.mxu0 %v4961_v8 }
0x130f   :  { %4844 = vmatprep.subr.bf16.mxu0 %v4962_v41 }
0x1311   :  { %4797 = vmatmul.mubr.bf16.gmra.mrb[184].mxu0 %v4994_v10 }
0x1312   :  { %4800 = vmatprep.mubr.bf16.mxu0 %v4995_v3  ;;  %4845 = vmatpush3.bf16.msra.mxu0 %v4962_v41 }
0x1313   :  { %4846 = vmatprep.subr.bf16.mxu0 %v4963_v24 }
0x1316   :  { %4847 = vmatpush3.bf16.msra.mxu0 %v4963_v24 }
0x1319   :  { %4801 = vmatmul.mubr.bf16.gmra.mrb[188].mxu0 %v4996_v34 }
0x13d4   :  { %v4790_v13 = vpop.f32.mrb[176].mxu0 }
0x13d5   :  { %v3055_v38 = vpop.f32.mrb[177].mxu0  ;;  %v3064_v51 = vadd.f32 %v4790_v13, %v5549_v9 }
0x13d6   :  { %v4791_v43 = vpop.f32.mrb[178].mxu0  ;;  %v3056_v58 = vadd.f32 %v3055_v38, %v5555_v15 }
0x13d7   :  { %v3067_v17 = vadd.f32 %v4791_v43, %v5551_v11  ;;  %v3058_v25 = vpop.f32.mrb[179].mxu0 }
0x13d8   :  { %v3059_v19 = vadd.f32 %v3058_v25, %v5557_v16 }
0x13d9   :  { %v3119_v37 = vpack.c.bf16 %v3067_v17, %v3064_v51 }
0x13da   :  { %v3118_v20 = vpack.c.bf16 %v3059_v19, %v3056_v58 }
0x13dc   :  { %v4794_v21 = vpop.f32.mrb[180].mxu0  ;;  %4820 = vmatprep.mubr.bf16.mxu1 %v3118_v20 }
0x13dd   :  { %v3071_v50 = vpop.f32.mrb[181].mxu0  ;;  %4821 = vmatmul.mubr.bf16.vlgmr.msra.gmra.mrb[176].mxu1 %v3119_v37  ;;  %v3080_v27 = vadd.f32 %v4794_v21, %v5569_v48 }
0x13de   :  { %v4795_v22 = vpop.f32.mrb[182].mxu0  ;;  %v3072_v9 = vadd.f32 %v3071_v50, %v5577_v5 }
0x13df   :  { %v3083_v23 = vadd.f32 %v4795_v22, %v5571_v56  ;;  %v3074_v54 = vpop.f32.mrb[183].mxu0 }
0x13e0   :  { %v3075_v11 = vadd.f32 %v3074_v54, %v5579_v49 }
0x13e1   :  { %v3121_v6 = vpack.c.bf16 %v3083_v23, %v3080_v27 }
0x13e2   :  { %v3120_v15 = vpack.c.bf16 %v3075_v11, %v3072_v9 }
0x13e4   :  { %v4798_v36 = vpop.f32.mrb[184].mxu0  ;;  %4824 = vmatprep.mubr.bf16.mxu1 %v3120_v15 }
0x13e5   :  { %v3087_v16 = vpop.f32.mrb[185].mxu0  ;;  %4825 = vmatmul.mubr.bf16.gmra.mrb[180].mxu1 %v3121_v6  ;;  %v3096_v26 = vadd.f32 %v4798_v36, %v5597_v32 }
0x13e6   :  { %v4799_v60 = vpop.f32.mrb[186].mxu0  ;;  %v3088_v48 = vadd.f32 %v3087_v16, %v5605_v62 }
0x13e7   :  { %v3099_v7 = vadd.f32 %v4799_v60, %v5599_v59  ;;  %v3090_v1 = vpop.f32.mrb[187].mxu0 }
0x13e8   :  { %v3091_v56 = vadd.f32 %v3090_v1, %v5607_v63  ;;  %v4964_v63 = vld [vmem:[%s6074_s12 + $0x70] sm:$0xff]  }
0x13e9   :  { %v3123_v52 = vpack.c.bf16 %v3099_v7, %v3096_v26  ;;  %4848 = vmatprep.subr.bf16.mxu0 %v4964_v63 }
0x13ea   :  { %v3122_v5 = vpack.c.bf16 %v3091_v56, %v3088_v48  ;;  %4849 = vmatpush3.bf16.msra.mxu0 %v4964_v63 }
0x13ec   :  { %v4802_v0 = vpop.f32.mrb[188].mxu0  ;;  %4828 = vmatprep.mubr.bf16.mxu1 %v3122_v5 }
0x13ed   :  { %v3103_v49 = vpop.f32.mrb[189].mxu0  ;;  %4829 = vmatmul.mubr.bf16.gmra.mrb[184].mxu1 %v3123_v52  ;;  %v3112_v55 = vadd.f32 %v4802_v0, %v5625_v39  ;;  %v4965_v39 = vld [vmem:[%s6074_s12 + $0x78] sm:$0xff]  }
0x13ee   :  { %v4803_v28 = vpop.f32.mrb[190].mxu0  ;;  %v3104_v32 = vadd.f32 %v3103_v49, %v5629_v46  ;;  %4850 = vmatprep.subr.bf16.mxu0 %v4965_v39 }
0x13ef   :  { %v3115_v29 = vadd.f32 %v4803_v28, %v5627_v44  ;;  %v3106_v30 = vpop.f32.mrb[191].mxu0  ;;  %4851 = vmatpush3.bf16.msra.mxu0 %v4965_v39  ;;  %v3624_v44 = vld [vmem:[%s6075_s13] ss:$0 sm:$0xff] }
0x13f0   :  { %v3107_v59 = vadd.f32 %v3106_v30, %v5631_v33  ;;  %v5170_v30 = vmov 0.0  }
0x13f1   :  { %v3125_v14 = vpack.c.bf16 %v3115_v29, %v3112_v55  ;;  %4868 = vmatprep.subr.bf16.mxu1 %v5170_v30 }
0x13f2   :  { %v3124_v62 = vpack.c.bf16 %v3107_v59, %v3104_v32  ;;  %v3650_v32 = vld [vmem:[%s6075_s13 + $0x1] ss:$0 sm:$0xff] }
0x13f4   :  { %4832 = vmatprep.mubr.bf16.mxu1 %v3124_v62 }
0x13f5   :  { %4833 = vmatmul.mubr.bf16.gmra.mrb[188].mxu1 %v3125_v14 }
0x13f6   :  { %4884 = vmatprep.mubr.msk.bf16.mxu1 %vm5171_vm0, %v5170_v30 }
0x14b0   :  { %v4822_v46 = vpop.f32.mrb[176].mxu1 }
0x14b1   :  { %v3240_v33 = vadd.f32 %v4822_v46, %v3624_v44  ;;  %v3231_v45 = vpop.f32.mrb[177].mxu1 }
0x14b2   :  { %v3232_v53 = vadd.f32 %v3624_v44, %v3231_v45  ;;  %v4823_v57 = vpop.f32.mrb[178].mxu1 }
0x14b3   :  { %v3243_v31 = vadd.f32 %v4823_v57, %v3624_v44  ;;  %v3234_v2 = vpop.f32.mrb[179].mxu1  ;;  %v3296_v35 = vmax.f32 %v3240_v33, 0.0 }
0x14b4   :  { %v3235_v18 = vadd.f32 %v3624_v44, %v3234_v2  ;;  %v3294_v10 = vmax.f32 %v3232_v53, 0.0 }
0x14b5   :  { %v3297_v47 = vmax.f32 %v3243_v31, 0.0 }
0x14b6   :  { %v3295_v3 = vmax.f32 %v3235_v18, 0.0 }
0x14b7   :  { %v3311_v34 = vpack.c.bf16 %v3297_v47, %v3296_v35 }
0x14b8   :  { %v3310_v61 = vpack.c.bf16 %v3295_v3, %v3294_v10  ;;  %v4826_v40 = vpop.f32.mrb[180].mxu1 }
0x14b9   :  { %v3256_v42 = vadd.f32 %v4826_v40, %v3624_v44  ;;  %v3247_v12 = vpop.f32.mrb[181].mxu1 }
0x14ba   :  { %v3248_v4 = vadd.f32 %v3624_v44, %v3247_v12  ;;  %v4827_v8 = vpop.f32.mrb[182].mxu1  ;;  %4852 = vmatprep.mubr.bf16.mxu0 %v3310_v61 }
0x14bb   :  { %v3259_v41 = vadd.f32 %v4827_v8, %v3624_v44  ;;  %v3250_v24 = vpop.f32.mrb[183].mxu1  ;;  %4853 = vmatmul.mubr.bf16.vlgmr.msra.gmra.mrb[192].mxu0 %v3311_v34  ;;  %v3300_v38 = vmax.f32 %v3256_v42, 0.0 }
0x14bc   :  { %v3251_v13 = vadd.f32 %v3624_v44, %v3250_v24  ;;  %v3298_v51 = vmax.f32 %v3248_v4, 0.0 }
0x14bd   :  { %v3301_v43 = vmax.f32 %v3259_v41, 0.0 }
0x14be   :  { %v3299_v17 = vmax.f32 %v3251_v13, 0.0 }
0x14bf   :  { %v3313_v25 = vpack.c.bf16 %v3301_v43, %v3300_v38 }
0x14c0   :  { %v3312_v58 = vpack.c.bf16 %v3299_v17, %v3298_v51  ;;  %v4830_v19 = vpop.f32.mrb[184].mxu1 }
0x14c1   :  { %v3272_v37 = vadd.f32 %v4830_v19, %v3624_v44  ;;  %v3263_v20 = vpop.f32.mrb[185].mxu1 }
0x14c2   :  { %v3264_v21 = vadd.f32 %v3624_v44, %v3263_v20  ;;  %v4831_v50 = vpop.f32.mrb[186].mxu1  ;;  %4856 = vmatprep.mubr.bf16.mxu0 %v3312_v58 }
0x14c3   :  { %v3275_v22 = vadd.f32 %v4831_v50, %v3624_v44  ;;  %v3266_v27 = vpop.f32.mrb[187].mxu1  ;;  %4857 = vmatmul.mubr.bf16.gmra.mrb[196].mxu0 %v3313_v25  ;;  %v3304_v54 = vmax.f32 %v3272_v37, 0.0 }
0x14c4   :  { %v3267_v23 = vadd.f32 %v3624_v44, %v3266_v27  ;;  %v3302_v11 = vmax.f32 %v3264_v21, 0.0 }
0x14c5   :  { %v3305_v9 = vmax.f32 %v3275_v22, 0.0 }
0x14c6   :  { %v3303_v6 = vmax.f32 %v3267_v23, 0.0 }
0x14c7   :  { %v3315_v15 = vpack.c.bf16 %v3305_v9, %v3304_v54 }
0x14c8   :  { %v3314_v36 = vpack.c.bf16 %v3303_v6, %v3302_v11  ;;  %v4834_v16 = vpop.f32.mrb[188].mxu1 }
0x14c9   :  { %v3288_v60 = vadd.f32 %v4834_v16, %v3624_v44  ;;  %v3279_v26 = vpop.f32.mrb[189].mxu1 }
0x14ca   :  { %v3280_v7 = vadd.f32 %v3624_v44, %v3279_v26  ;;  %v4835_v1 = vpop.f32.mrb[190].mxu1  ;;  %4860 = vmatprep.mubr.bf16.mxu0 %v3314_v36 }
0x14cb   :  { %v3291_v48 = vadd.f32 %v4835_v1, %v3624_v44  ;;  %v3282_v56 = vpop.f32.mrb[191].mxu1  ;;  %4861 = vmatmul.mubr.bf16.gmra.mrb[200].mxu0 %v3315_v15  ;;  %v3308_v5 = vmax.f32 %v3288_v60, 0.0 }
0x14cc   :  { %v3283_v52 = vadd.f32 %v3624_v44, %v3282_v56  ;;  %v3306_v49 = vmax.f32 %v3280_v7, 0.0 }
0x14cd   :  { %v3309_v0 = vmax.f32 %v3291_v48, 0.0 }
0x14ce   :  { %v3307_v28 = vmax.f32 %v3283_v52, 0.0 }
0x14cf   :  { %v3317_v55 = vpack.c.bf16 %v3309_v0, %v3308_v5  ;;  %v3504_v5 = vld [vmem:[%s6065_s3] sm:$0xf] }
0x14d0   :  { %v3316_v29 = vpack.c.bf16 %v3307_v28, %v3306_v49 }
0x14d2   :  { %4864 = vmatprep.mubr.bf16.mxu0 %v3316_v29 }
0x14d3   :  { %4865 = vmatmul.mubr.bf16.gmra.mrb[204].mxu0 %v3317_v55 }
0x158e   :  { %v4854_v59 = vpop.f32.mrb[192].mxu0 }
0x158f   :  { %v3434_v14 = vadd.f32 %v4854_v59, %v3650_v32  ;;  %v3425_v62 = vpop.f32.mrb[193].mxu0 }
0x1590   :  { %v3426_v63 = vadd.f32 %v3650_v32, %v3425_v62  ;;  %v4855_v39 = vpop.f32.mrb[194].mxu0 }
0x1591   :  { %v3437_v44 = vadd.f32 %v4855_v39, %v3650_v32  ;;  %v3428_v46 = vpop.f32.mrb[195].mxu0  ;;  %v3490_v45 = vmax.f32 %v3434_v14, 0.0 }
0x1592   :  { %v3429_v33 = vadd.f32 %v3650_v32, %v3428_v46  ;;  %v3488_v57 = vmax.f32 %v3426_v63, 0.0 }
0x1593   :  { %v3491_v53 = vmax.f32 %v3437_v44, 0.0 }
0x1594   :  { %v3489_v31 = vmax.f32 %v3429_v33, 0.0 }
0x1595   :  { %v3506_v2 = vpack.c.bf16 %v3491_v53, %v3490_v45 }
0x1596   :  { %v3505_v18 = vpack.c.bf16 %v3489_v31, %v3488_v57  ;;  %v4858_v35 = vpop.f32.mrb[196].mxu0 }
0x1597   :  { %v3450_v47 = vadd.f32 %v4858_v35, %v3650_v32  ;;  %v3441_v10 = vpop.f32.mrb[197].mxu0 }
0x1598   :  { %v3442_v3 = vadd.f32 %v3650_v32, %v3441_v10  ;;  %v4859_v34 = vpop.f32.mrb[198].mxu0  ;;  %4869 = vmatpush3.bf16.msra.mxu1 %v3505_v18 }
0x1599   :  { %v3453_v61 = vadd.f32 %v4859_v34, %v3650_v32  ;;  %v3444_v40 = vpop.f32.mrb[199].mxu0  ;;  %4870 = vmatprep.subr.bf16.mxu1 %v5170_v30  ;;  %v3494_v12 = vmax.f32 %v3450_v47, 0.0 }
0x159a   :  { %v3445_v42 = vadd.f32 %v3650_v32, %v3444_v40  ;;  %v3492_v8 = vmax.f32 %v3442_v3, 0.0 }
0x159b   :  { %v3495_v4 = vmax.f32 %v3453_v61, 0.0 }
0x159c   :  { %v3493_v41 = vmax.f32 %v3445_v42, 0.0  ;;  %4871 = vmatpush3.bf16.msra.mxu1 %v3506_v2 }
0x159d   :  { %v3508_v24 = vpack.c.bf16 %v3495_v4, %v3494_v12  ;;  %4872 = vmatprep.subr.bf16.mxu1 %v5170_v30 }
0x159e   :  { %v3507_v13 = vpack.c.bf16 %v3493_v41, %v3492_v8  ;;  %v4862_v38 = vpop.f32.mrb[200].mxu0 }
0x159f   :  { %v3466_v43 = vadd.f32 %v4862_v38, %v3650_v32  ;;  %v3457_v51 = vpop.f32.mrb[201].mxu0 }
0x15a0   :  { %v3458_v17 = vadd.f32 %v3650_v32, %v3457_v51  ;;  %v4863_v25 = vpop.f32.mrb[202].mxu0  ;;  %4873 = vmatpush3.bf16.msra.mxu1 %v3507_v13 }
0x15a1   :  { %v3469_v58 = vadd.f32 %v4863_v25, %v3650_v32  ;;  %v3460_v19 = vpop.f32.mrb[203].mxu0  ;;  %4874 = vmatprep.subr.bf16.mxu1 %v5170_v30  ;;  %v3498_v20 = vmax.f32 %v3466_v43, 0.0 }
0x15a2   :  { %v3461_v37 = vadd.f32 %v3650_v32, %v3460_v19  ;;  %v3496_v50 = vmax.f32 %v3458_v17, 0.0 }
0x15a3   :  { %v3499_v21 = vmax.f32 %v3469_v58, 0.0 }
0x15a4   :  { %v3497_v22 = vmax.f32 %v3461_v37, 0.0  ;;  %4875 = vmatpush3.bf16.msra.mxu1 %v3508_v24 }
0x15a5   :  { %v3510_v27 = vpack.c.bf16 %v3499_v21, %v3498_v20  ;;  %4876 = vmatprep.subr.bf16.mxu1 %v5170_v30 }
0x15a6   :  { %v3509_v23 = vpack.c.bf16 %v3497_v22, %v3496_v50  ;;  %v4866_v54 = vpop.f32.mrb[204].mxu0 }
0x15a7   :  { %v3482_v9 = vadd.f32 %v4866_v54, %v3650_v32  ;;  %v3473_v11 = vpop.f32.mrb[205].mxu0 }
0x15a8   :  { %v3474_v6 = vadd.f32 %v3650_v32, %v3473_v11  ;;  %v4867_v15 = vpop.f32.mrb[206].mxu0  ;;  %4877 = vmatpush3.bf16.msra.mxu1 %v3509_v23 }
0x15a9   :  { %v3485_v36 = vadd.f32 %v4867_v15, %v3650_v32  ;;  %v3476_v16 = vpop.f32.mrb[207].mxu0  ;;  %4878 = vmatprep.subr.bf16.mxu1 %v5170_v30  ;;  %v3502_v26 = vmax.f32 %v3482_v9, 0.0 }
0x15aa   :  { %v3477_v60 = vadd.f32 %v3650_v32, %v3476_v16  ;;  %v3500_v1 = vmax.f32 %v3474_v6, 0.0 }
0x15ab   :  { %v3503_v7 = vmax.f32 %v3485_v36, 0.0 }
0x15ac   :  { %v3501_v48 = vmax.f32 %v3477_v60, 0.0  ;;  %4879 = vmatpush3.bf16.msra.mxu1 %v3510_v27 }
0x15ad   :  { %v3512_v56 = vpack.c.bf16 %v3503_v7, %v3502_v26  ;;  %4880 = vmatprep.subr.bf16.mxu1 %v5170_v30 }
0x15ae   :  { %v3511_v52 = vpack.c.bf16 %v3501_v48, %v3500_v1 }
0x15b0   :  { %4881 = vmatpush3.bf16.msra.mxu1 %v3511_v52 }
0x15b1   :  { %4882 = vmatprep.subr.bf16.mxu1 %v5170_v30 }
0x15b4   :  { %4883 = vmatpush3.bf16.msra.mxu1 %v3512_v56 }
0x15b7   :  { %4885 = vmatmul.mubr.bf16.vlgmr.msra.gmra.mrb[192].mxu1 %v3504_v5 }
0x168a   :  { %v3547_v0 = vpop.f32.mrb[192].mxu1 }
0x168b   :  { %3553 = vst [vmem:[#allocation13] sm:$0xff] %v3547_v0  ;;  %v4886_v49 = vpop.f32.mrb[193].mxu1 }
0x168c   :  { %v3550_v28 = vpop.f32.mrb[194].mxu1 }
0x168d   :  { %5140 = shalt.err (!%p5137_p10)
}
0x168e   :  { %s5141_s6 = scalar_lea.hbm %s6076_s14, 128 }
0x168f   :  { %p5142_p11 = scmp.ne.s32.totalorder %s6076_s14, %s5141_s6  ;;  %p5145_p12 = scmp.lt.u32.totalorder %s5141_s6, %s6076_s14 }
0x1691   :  { %p5147_p13 = pnand %p5145_p12, %p5142_p11 }
0x1693   :  { %5150 = shalt.err (!%p5147_p13)
}
0x1694   :  { %3563 = dma.vmem_to_hbm [thread:$0]  %s3561_s10, 128, %s6076_s14, [#allocation4]   ;;  %v4887_v55 = vpop.f32.mrb[195].mxu1 }
0x1695   :  { %5159 = dma.done.wait [#allocation4], 128  }
0x1696   :  { %5160 = vsyncadd [#allocation4], 4294967168 }
0x1697   :  { %3567 = vsyncpa [#allocation3], 1 }
0x1698   :  { %3568 = vsyncpa [#allocation6], 1 }
0x1699   :  { %3569 = vsyncpa [#allocation9], 1 }
0x169a   :  { %3570 = vsyncpa [#allocation12], 1 }
0x169b   :  { %3571 = vsyncpa [#allocation4], 1 }

</bundles_post_ra>
